<compile_context>
chip_gen: v7x
topology: tpu7x:2x2x1
jax: 0.10.0
libtpu: 0.0.40
codegen_flags: <defaults>
</compile_context>

<pallas_src>
import jax
import jax.numpy as jnp
from jax.experimental import pallas as pl
from jax.experimental.pallas import tpu as pltpu

_MAX_TN = 2048  # lane-tile cap for the (rare) stride != K fallback path


# ---------------------------------------------------------------------------
# Fused kernel: stride == K (the ResUNet configuration)
# ---------------------------------------------------------------------------
def _fused_deconv_kernel(x_ref, w_ref, e_ref, b_ref, o_ref):
    # x_ref: (1, Cin, TB, W)        input row strip
    # w_ref: (K*K*Cout, Cin)        rows ordered (kh, kw, co)
    # e_ref: (K, W, W*K)            e[kw, w, w*K + kw] = 1  (lane interleave)
    # b_ref: (Cout, 1)
    # o_ref: (1, Cout, TB*K, W*K)   final NCHW output strip
    K = e_ref.shape[0]
    Cout = b_ref.shape[0]
    TB = x_ref.shape[2]

    w_all = w_ref[...]
    b = b_ref[...]
    e = [e_ref[kw] for kw in range(K)]

    for t in range(TB):                       # static unroll (TB <= 16)
        xt = x_ref[0, :, t, :]                                       # (Cin, W)
        y = jnp.dot(w_all, xt, preferred_element_type=jnp.float32)   # (K*K*Cout, W)
        for kh in range(K):
            acc = None
            for kw in range(K):
                r0 = (kh * K + kw) * Cout
                part = jnp.dot(y[r0:r0 + Cout, :], e[kw],
                               preferred_element_type=jnp.float32)   # (Cout, W*K)
                acc = part if acc is None else acc + part
            o_ref[0, :, t * K + kh, :] = (acc + b).astype(o_ref.dtype)


def _pick_row_tile(H, W, Cout, K, N):
    """Row-strip height TB: divides H, multiple of 8 (or == H), fits a ~2 MiB
    output block, and leaves >= 2 grid steps when N == 1 (two-TC chips)."""
    budget_rows = max(1, (2 * 1024 * 1024) // (4 * Cout * K * K * W))
    cap = min(H, 16, budget_rows)
    if N == 1:
        cap = min(cap, max(1, H // 2))
    best = None
    t = 8
    while t <= cap:
        if H % t == 0:
            best = t
        t += 8
    if best is not None:
        return best
    return H  # full-height block (block dim == array dim is always legal)


def _fused_deconv_stride_eq_k(x, weight, bias):
    N, Cin, H, W = x.shape
    _, Cout, K, _ = weight.shape
    WK = W * K
    TB = _pick_row_tile(H, W, Cout, K, N)

    # weight rows ordered (kh, kw, co); column = ci
    w_t = jnp.transpose(weight, (2, 3, 1, 0)).reshape(K * K * Cout, Cin)
    w_t = w_t.astype(jnp.float32)
    b2 = bias.reshape(Cout, 1).astype(jnp.float32)

    # Lane-interleave scatter matrices: e[kw, w, w*K + kw] = 1.
    wi = jnp.arange(W)
    e = jnp.zeros((K, W, WK), jnp.float32)
    for kw in range(K):
        e = e.at[kw, wi, wi * K + kw].set(1.0)

    grid = (N, H // TB)
    out = pl.pallas_call(
        _fused_deconv_kernel,
        out_shape=jax.ShapeDtypeStruct((N, Cout, H * K, WK), jnp.float32),
        grid_spec=pltpu.PrefetchScalarGridSpec(
            num_scalar_prefetch=0,
            grid=grid,
            in_specs=[
                pl.BlockSpec((1, Cin, TB, W), lambda n, s: (n, 0, s, 0)),
                pl.BlockSpec((K * K * Cout, Cin), lambda n, s: (0, 0)),
                pl.BlockSpec((K, W, WK), lambda n, s: (0, 0, 0)),
                pl.BlockSpec((Cout, 1), lambda n, s: (0, 0)),
            ],
            out_specs=pl.BlockSpec((1, Cout, TB * K, WK),
                                   lambda n, s: (n, 0, s, 0)),
        ),
        compiler_params=pltpu.CompilerParams(
            dimension_semantics=("parallel", "parallel"),
            vmem_limit_bytes=32 * 1024 * 1024,
        ),
    )(x, w_t, e, b2)
    return out


# ---------------------------------------------------------------------------
# Generic fallback: stride != K (not exercised by ResUNet)
# ---------------------------------------------------------------------------
def _taps_kernel(x_ref, w_ref, o_ref):
    # x_ref: (1, Cin, TN)   w_ref: (Cout*K*K, Cin)   o_ref: (1, Cout*K*K, TN)
    o_ref[0] = jnp.dot(w_ref[...], x_ref[0],
                       preferred_element_type=jnp.float32).astype(o_ref.dtype)


def _generic_deconv(x, weight, bias, stride):
    # TODO(synk): stride != kernel fallback keeps the taps-slab kernel + XLA
    # scatter-add (K*K HBM passes); never exercised by ResUNet (stride == K).
    N, Cin, H, W = x.shape
    _, Cout, K, _ = weight.shape
    HW = H * W
    CKK = Cout * K * K
    x_flat = x.reshape(N, Cin, HW)
    w_t = jnp.transpose(weight, (1, 2, 3, 0)).reshape(CKK, Cin).astype(jnp.float32)

    tn = min(_MAX_TN, pl.cdiv(HW, 128) * 128)
    HW_pad = pl.cdiv(HW, tn) * tn
    if HW_pad != HW:
        x_flat = jnp.pad(x_flat, ((0, 0), (0, 0), (0, HW_pad - HW)))

    y = pl.pallas_call(
        _taps_kernel,
        out_shape=jax.ShapeDtypeStruct((N, CKK, HW_pad), jnp.float32),
        grid_spec=pltpu.PrefetchScalarGridSpec(
            num_scalar_prefetch=0,
            grid=(N, HW_pad // tn),
            in_specs=[pl.BlockSpec((1, Cin, tn), lambda n, t: (n, 0, t)),
                      pl.BlockSpec((CKK, Cin), lambda n, t: (0, 0))],
            out_specs=pl.BlockSpec((1, CKK, tn), lambda n, t: (n, 0, t)),
        ),
        compiler_params=pltpu.CompilerParams(
            dimension_semantics=("parallel", "parallel"),
            vmem_limit_bytes=32 * 1024 * 1024,
        ),
    )(x_flat, w_t)
    if HW_pad != HW:
        y = y[:, :, :HW]

    taps = y.reshape(N, Cout, K, K, H, W)
    Hout = (H - 1) * stride + K
    Wout = (W - 1) * stride + K
    out = jnp.zeros((N, Cout, Hout, Wout), jnp.float32)
    for kh in range(K):
        for kw in range(K):
            out = out.at[:, :,
                         kh: kh + (H - 1) * stride + 1: stride,
                         kw: kw + (W - 1) * stride + 1: stride].add(taps[:, :, kh, kw])
    return out + bias[None, :, None, None]


def conv_transpose2d(x, weight, bias, stride):
    """Exact ConvTranspose2d(Cin, Cout, kernel_size=K, stride=stride), padding=0.

    x:      (N, Cin, H, W)     float32, NCHW
    weight: (Cin, Cout, K, K)  float32 (PyTorch ConvTranspose2d layout)
    bias:   (Cout,)            float32
    returns (N, Cout, (H-1)*stride+K, (W-1)*stride+K) float32
    """
    N, Cin, H, W = x.shape
    Cin_w, Cout, K, K2 = weight.shape
    assert Cin == Cin_w and K == K2
    if stride == K:
        return _fused_deconv_stride_eq_k(x, weight, bias)
    return _generic_deconv(x, weight, bias, stride)


class Upsample:
    """JAX/Pallas mirror of the PyTorch Upsample module (deconv mode)."""

    def __init__(self, input_dim, output_dim, kernel, stride,
                 upsample_mode='deconv', key=None):
        assert upsample_mode == 'deconv', \
            "bilinear mode not exercised by the reference forward()"
        # TODO(synk): bilinear nn.Upsample branch not implemented (forward only
        # ever calls self.upsample, which exists only in 'deconv' mode).
        if key is None:
            key = jax.random.PRNGKey(0)
        kw_, kb_ = jax.random.split(key)
        fan_in = output_dim * kernel * kernel  # ConvTranspose2d fan-in convention
        bound = 1.0 / jnp.sqrt(fan_in)
        self.kernel = kernel
        self.stride = stride
        self.weight = jax.random.uniform(
            kw_, (input_dim, output_dim, kernel, kernel),
            minval=-bound, maxval=bound, dtype=jnp.float32)
        self.bias = jax.random.uniform(
            kb_, (output_dim,), minval=-bound, maxval=bound, dtype=jnp.float32)

    def __call__(self, x):
        return conv_transpose2d(x, self.weight, self.bias, self.stride)


if __name__ == "__main__":
    key = jax.random.PRNGKey(0)
    k_x, k_p = jax.random.split(key)

    # Small shapes consistent with a ResUNet up-path stage:
    # batch=2, input channels=4, output channels=4, spatial 16x16, K=2, stride=2.
    N, Cin, Cout, H, W, K, S = 2, 4, 4, 16, 16, 2, 2
    x = jax.random.normal(k_x, (N, Cin, H, W), dtype=jnp.float32)

    up = Upsample(Cin, Cout, K, S, upsample_mode='deconv', key=k_p)
    out = up(x)
    out = jax.block_until_ready(out)

    expected_shape = (N, Cout, (H - 1) * S + K, (W - 1) * S + K)
    assert out.shape == expected_shape, (out.shape, expected_shape)
    assert out.dtype == jnp.float32

    # Pure-JAX reference check of ConvTranspose2d semantics.
    taps_ref = jnp.einsum('nchw,cokl->noklhw', x, up.weight)
    ref = jnp.zeros(expected_shape, jnp.float32)
    for kh in range(K):
        for kw in range(K):
            ref = ref.at[:, :, kh::S, kw::S].add(taps_ref[:, :, kh, kw])
    ref = ref + up.bias[None, :, None, None]
    assert jnp.allclose(out, ref, atol=1e-4, rtol=1e-4), \
        float(jnp.max(jnp.abs(out - ref)))

    print("KERNEL_OK")
</pallas_src>

<mosaic_0001>
module attributes {stable_mosaic.version = 11 : i64} {
  func.func @_fused_deconv_kernel(%arg0: i32, %arg1: i32, %arg2: memref<1x4x16x16xf32, #tpu.memory_space<vmem>>, %arg3: memref<16x4xf32, #tpu.memory_space<vmem>>, %arg4: memref<2x16x32xf32, #tpu.memory_space<vmem>>, %arg5: memref<4x1xf32, #tpu.memory_space<vmem>>, %arg6: memref<1x4x32x32xf32, #tpu.memory_space<vmem>>) attributes {dimension_semantics = [#tpu.dimension_semantics<parallel>, #tpu.dimension_semantics<parallel>], iteration_bounds = array<i64: 2, 1>, scalar_prefetch = 0 : i64, scratch_operands = 0 : i64, tpu.core_type = #tpu.core_type<tc>, window_params = [{transform_indices = @transform_0, window_bounds = array<i64: 1, 4, 16, 16>}, {pipeline_mode = #tpu.pipeline_mode<synchronous>, transform_indices = @transform_1, window_bounds = array<i64: 16, 4>}, {pipeline_mode = #tpu.pipeline_mode<synchronous>, transform_indices = @transform_2, window_bounds = array<i64: 2, 16, 32>}, {pipeline_mode = #tpu.pipeline_mode<synchronous>, transform_indices = @transform_3, window_bounds = array<i64: 4, 1>}, {transform_indices = @transform_4, window_bounds = array<i64: 1, 4, 32, 32>}]} {
    %c0 = arith.constant 0 : index
    %c0_0 = arith.constant 0 : index
    %0 = vector.load %arg3[%c0, %c0_0] : memref<16x4xf32, #tpu.memory_space<vmem>>, vector<16x4xf32>
    %c0_1 = arith.constant 0 : index
    %c0_2 = arith.constant 0 : index
    %1 = vector.load %arg5[%c0_1, %c0_2] : memref<4x1xf32, #tpu.memory_space<vmem>>, vector<4x1xf32>
    %c0_3 = arith.constant 0 : index
    %c0_4 = arith.constant 0 : index
    %c0_5 = arith.constant 0 : index
    %2 = vector.load %arg4[%c0_3, %c0_4, %c0_5] : memref<2x16x32xf32, #tpu.memory_space<vmem>>, vector<1x16x32xf32>
    %3 = vector.shape_cast %2 : vector<1x16x32xf32> to vector<16x32xf32>
    %c1 = arith.constant 1 : index
    %c0_6 = arith.constant 0 : index
    %c0_7 = arith.constant 0 : index
    %4 = vector.load %arg4[%c1, %c0_6, %c0_7] : memref<2x16x32xf32, #tpu.memory_space<vmem>>, vector<1x16x32xf32>
    %5 = vector.shape_cast %4 : vector<1x16x32xf32> to vector<16x32xf32>
    %c0_8 = arith.constant 0 : index
    %c0_9 = arith.constant 0 : index
    %c0_10 = arith.constant 0 : index
    %c0_11 = arith.constant 0 : index
    %6 = vector.load %arg2[%c0_8, %c0_9, %c0_10, %c0_11] : memref<1x4x16x16xf32, #tpu.memory_space<vmem>>, vector<1x4x1x16xf32>
    %7 = vector.shape_cast %6 : vector<1x4x1x16xf32> to vector<4x16xf32>
    %cst = arith.constant dense<0.000000e+00> : vector<16x16xf32>
    %8 = tpu.matmul %0, %7, %cst {dimension_numbers = #tpu.dot_dimension_numbers<[1], [0], [0], [1], [0, 0, 1, 1], [], []>} : vector<16x4xf32>, vector<4x16xf32>, vector<16x16xf32> -> vector<16x16xf32>
    %9 = vector.extract_strided_slice %8 {offsets = [0, 0], sizes = [4, 16], strides = [1, 1]} : vector<16x16xf32> to vector<4x16xf32>
    %cst_12 = arith.constant dense<0.000000e+00> : vector<4x32xf32>
    %10 = tpu.matmul %9, %3, %cst_12 {dimension_numbers = #tpu.dot_dimension_numbers<[1], [0], [0], [1], [0, 0, 1, 1], [], []>} : vector<4x16xf32>, vector<16x32xf32>, vector<4x32xf32> -> vector<4x32xf32>
    %11 = vector.extract_strided_slice %8 {offsets = [4, 0], sizes = [4, 16], strides = [1, 1]} : vector<16x16xf32> to vector<4x16xf32>
    %cst_13 = arith.constant dense<0.000000e+00> : vector<4x32xf32>
    %12 = tpu.matmul %11, %5, %cst_13 {dimension_numbers = #tpu.dot_dimension_numbers<[1], [0], [0], [1], [0, 0, 1, 1], [], []>} : vector<4x16xf32>, vector<16x32xf32>, vector<4x32xf32> -> vector<4x32xf32>
    %13 = arith.addf %10, %12 : vector<4x32xf32>
    %14 = vector.broadcast %1 : vector<4x1xf32> to vector<4x32xf32>
    %15 = arith.addf %13, %14 : vector<4x32xf32>
    %c0_14 = arith.constant 0 : index
    %c0_15 = arith.constant 0 : index
    %c0_16 = arith.constant 0 : index
    %c0_17 = arith.constant 0 : index
    %16 = vector.load %arg6[%c0_14, %c0_15, %c0_16, %c0_17] : memref<1x4x32x32xf32, #tpu.memory_space<vmem>>, vector<1x4x1x32xf32>
    %17 = vector.shape_cast %16 : vector<1x4x1x32xf32> to vector<4x32xf32>
    %18 = vector.shape_cast %15 : vector<4x32xf32> to vector<1x4x1x32xf32>
    tpu.vector_store %arg6[%c0_14, %c0_15, %c0_16, %c0_17], %18 {strides = array<i32>} : memref<1x4x32x32xf32, #tpu.memory_space<vmem>>, vector<1x4x1x32xf32>,
    %19 = vector.extract_strided_slice %8 {offsets = [8, 0], sizes = [4, 16], strides = [1, 1]} : vector<16x16xf32> to vector<4x16xf32>
    %cst_18 = arith.constant dense<0.000000e+00> : vector<4x32xf32>
    %20 = tpu.matmul %19, %3, %cst_18 {dimension_numbers = #tpu.dot_dimension_numbers<[1], [0], [0], [1], [0, 0, 1, 1], [], []>} : vector<4x16xf32>, vector<16x32xf32>, vector<4x32xf32> -> vector<4x32xf32>
    %21 = vector.extract_strided_slice %8 {offsets = [12, 0], sizes = [4, 16], strides = [1, 1]} : vector<16x16xf32> to vector<4x16xf32>
    %cst_19 = arith.constant dense<0.000000e+00> : vector<4x32xf32>
    %22 = tpu.matmul %21, %5, %cst_19 {dimension_numbers = #tpu.dot_dimension_numbers<[1], [0], [0], [1], [0, 0, 1, 1], [], []>} : vector<4x16xf32>, vector<16x32xf32>, vector<4x32xf32> -> vector<4x32xf32>
    %23 = arith.addf %20, %22 : vector<4x32xf32>
    %24 = vector.broadcast %1 : vector<4x1xf32> to vector<4x32xf32>
    %25 = arith.addf %23, %24 : vector<4x32xf32>
    %c0_20 = arith.constant 0 : index
    %c0_21 = arith.constant 0 : index
    %c1_22 = arith.constant 1 : index
    %c0_23 = arith.constant 0 : index
    %26 = vector.load %arg6[%c0_20, %c0_21, %c1_22, %c0_23] : memref<1x4x32x32xf32, #tpu.memory_space<vmem>>, vector<1x4x1x32xf32>
    %27 = vector.shape_cast %26 : vector<1x4x1x32xf32> to vector<4x32xf32>
    %28 = vector.shape_cast %25 : vector<4x32xf32> to vector<1x4x1x32xf32>
    tpu.vector_store %arg6[%c0_20, %c0_21, %c1_22, %c0_23], %28 {strides = array<i32>} : memref<1x4x32x32xf32, #tpu.memory_space<vmem>>, vector<1x4x1x32xf32>,
    %c0_24 = arith.constant 0 : index
    %c0_25 = arith.constant 0 : index
    %c1_26 = arith.constant 1 : index
    %c0_27 = arith.constant 0 : index
    %29 = vector.load %arg2[%c0_24, %c0_25, %c1_26, %c0_27] : memref<1x4x16x16xf32, #tpu.memory_space<vmem>>, vector<1x4x1x16xf32>
    %30 = vector.shape_cast %29 : vector<1x4x1x16xf32> to vector<4x16xf32>
    %cst_28 = arith.constant dense<0.000000e+00> : vector<16x16xf32>
    %31 = tpu.matmul %0, %30, %cst_28 {dimension_numbers = #tpu.dot_dimension_numbers<[1], [0], [0], [1], [0, 0, 1, 1], [], []>} : vector<16x4xf32>, vector<4x16xf32>, vector<16x16xf32> -> vector<16x16xf32>
    %32 = vector.extract_strided_slice %31 {offsets = [0, 0], sizes = [4, 16], strides = [1, 1]} : vector<16x16xf32> to vector<4x16xf32>
    %cst_29 = arith.constant dense<0.000000e+00> : vector<4x32xf32>
    %33 = tpu.matmul %32, %3, %cst_29 {dimension_numbers = #tpu.dot_dimension_numbers<[1], [0], [0], [1], [0, 0, 1, 1], [], []>} : vector<4x16xf32>, vector<16x32xf32>, vector<4x32xf32> -> vector<4x32xf32>
    %34 = vector.extract_strided_slice %31 {offsets = [4, 0], sizes = [4, 16], strides = [1, 1]} : vector<16x16xf32> to vector<4x16xf32>
    %cst_30 = arith.constant dense<0.000000e+00> : vector<4x32xf32>
    %35 = tpu.matmul %34, %5, %cst_30 {dimension_numbers = #tpu.dot_dimension_numbers<[1], [0], [0], [1], [0, 0, 1, 1], [], []>} : vector<4x16xf32>, vector<16x32xf32>, vector<4x32xf32> -> vector<4x32xf32>
    %36 = arith.addf %33, %35 : vector<4x32xf32>
    %37 = vector.broadcast %1 : vector<4x1xf32> to vector<4x32xf32>
    %38 = arith.addf %36, %37 : vector<4x32xf32>
    %c0_31 = arith.constant 0 : index
    %c0_32 = arith.constant 0 : index
    %c2 = arith.constant 2 : index
    %c0_33 = arith.constant 0 : index
    %39 = vector.load %arg6[%c0_31, %c0_32, %c2, %c0_33] : memref<1x4x32x32xf32, #tpu.memory_space<vmem>>, vector<1x4x1x32xf32>
    %40 = vector.shape_cast %39 : vector<1x4x1x32xf32> to vector<4x32xf32>
    %41 = vector.shape_cast %38 : vector<4x32xf32> to vector<1x4x1x32xf32>
    tpu.vector_store %arg6[%c0_31, %c0_32, %c2, %c0_33], %41 {strides = array<i32>} : memref<1x4x32x32xf32, #tpu.memory_space<vmem>>, vector<1x4x1x32xf32>,
    %42 = vector.extract_strided_slice %31 {offsets = [8, 0], sizes = [4, 16], strides = [1, 1]} : vector<16x16xf32> to vector<4x16xf32>
    %cst_34 = arith.constant dense<0.000000e+00> : vector<4x32xf32>
    %43 = tpu.matmul %42, %3, %cst_34 {dimension_numbers = #tpu.dot_dimension_numbers<[1], [0], [0], [1], [0, 0, 1, 1], [], []>} : vector<4x16xf32>, vector<16x32xf32>, vector<4x32xf32> -> vector<4x32xf32>
    %44 = vector.extract_strided_slice %31 {offsets = [12, 0], sizes = [4, 16], strides = [1, 1]} : vector<16x16xf32> to vector<4x16xf32>
    %cst_35 = arith.constant dense<0.000000e+00> : vector<4x32xf32>
    %45 = tpu.matmul %44, %5, %cst_35 {dimension_numbers = #tpu.dot_dimension_numbers<[1], [0], [0], [1], [0, 0, 1, 1], [], []>} : vector<4x16xf32>, vector<16x32xf32>, vector<4x32xf32> -> vector<4x32xf32>
    %46 = arith.addf %43, %45 : vector<4x32xf32>
    %47 = vector.broadcast %1 : vector<4x1xf32> to vector<4x32xf32>
    %48 = arith.addf %46, %47 : vector<4x32xf32>
    %c0_36 = arith.constant 0 : index
    %c0_37 = arith.constant 0 : index
    %c3 = arith.constant 3 : index
    %c0_38 = arith.constant 0 : index
    %49 = vector.load %arg6[%c0_36, %c0_37, %c3, %c0_38] : memref<1x4x32x32xf32, #tpu.memory_space<vmem>>, vector<1x4x1x32xf32>
    %50 = vector.shape_cast %49 : vector<1x4x1x32xf32> to vector<4x32xf32>
    %51 = vector.shape_cast %48 : vector<4x32xf32> to vector<1x4x1x32xf32>
    tpu.vector_store %arg6[%c0_36, %c0_37, %c3, %c0_38], %51 {strides = array<i32>} : memref<1x4x32x32xf32, #tpu.memory_space<vmem>>, vector<1x4x1x32xf32>,
    %c0_39 = arith.constant 0 : index
    %c0_40 = arith.constant 0 : index
    %c2_41 = arith.constant 2 : index
    %c0_42 = arith.constant 0 : index
    %52 = vector.load %arg2[%c0_39, %c0_40, %c2_41, %c0_42] : memref<1x4x16x16xf32, #tpu.memory_space<vmem>>, vector<1x4x1x16xf32>
    %53 = vector.shape_cast %52 : vector<1x4x1x16xf32> to vector<4x16xf32>
    %cst_43 = arith.constant dense<0.000000e+00> : vector<16x16xf32>
    %54 = tpu.matmul %0, %53, %cst_43 {dimension_numbers = #tpu.dot_dimension_numbers<[1], [0], [0], [1], [0, 0, 1, 1], [], []>} : vector<16x4xf32>, vector<4x16xf32>, vector<16x16xf32> -> vector<16x16xf32>
    %55 = vector.extract_strided_slice %54 {offsets = [0, 0], sizes = [4, 16], strides = [1, 1]} : vector<16x16xf32> to vector<4x16xf32>
    %cst_44 = arith.constant dense<0.000000e+00> : vector<4x32xf32>
    %56 = tpu.matmul %55, %3, %cst_44 {dimension_numbers = #tpu.dot_dimension_numbers<[1], [0], [0], [1], [0, 0, 1, 1], [], []>} : vector<4x16xf32>, vector<16x32xf32>, vector<4x32xf32> -> vector<4x32xf32>
    %57 = vector.extract_strided_slice %54 {offsets = [4, 0], sizes = [4, 16], strides = [1, 1]} : vector<16x16xf32> to vector<4x16xf32>
    %cst_45 = arith.constant dense<0.000000e+00> : vector<4x32xf32>
    %58 = tpu.matmul %57, %5, %cst_45 {dimension_numbers = #tpu.dot_dimension_numbers<[1], [0], [0], [1], [0, 0, 1, 1], [], []>} : vector<4x16xf32>, vector<16x32xf32>, vector<4x32xf32> -> vector<4x32xf32>
    %59 = arith.addf %56, %58 : vector<4x32xf32>
    %60 = vector.broadcast %1 : vector<4x1xf32> to vector<4x32xf32>
    %61 = arith.addf %59, %60 : vector<4x32xf32>
    %c0_46 = arith.constant 0 : index
    %c0_47 = arith.constant 0 : index
    %c4 = arith.constant 4 : index
    %c0_48 = arith.constant 0 : index
    %62 = vector.load %arg6[%c0_46, %c0_47, %c4, %c0_48] : memref<1x4x32x32xf32, #tpu.memory_space<vmem>>, vector<1x4x1x32xf32>
    %63 = vector.shape_cast %62 : vector<1x4x1x32xf32> to vector<4x32xf32>
    %64 = vector.shape_cast %61 : vector<4x32xf32> to vector<1x4x1x32xf32>
    tpu.vector_store %arg6[%c0_46, %c0_47, %c4, %c0_48], %64 {strides = array<i32>} : memref<1x4x32x32xf32, #tpu.memory_space<vmem>>, vector<1x4x1x32xf32>,
    %65 = vector.extract_strided_slice %54 {offsets = [8, 0], sizes = [4, 16], strides = [1, 1]} : vector<16x16xf32> to vector<4x16xf32>
    %cst_49 = arith.constant dense<0.000000e+00> : vector<4x32xf32>
    %66 = tpu.matmul %65, %3, %cst_49 {dimension_numbers = #tpu.dot_dimension_numbers<[1], [0], [0], [1], [0, 0, 1, 1], [], []>} : vector<4x16xf32>, vector<16x32xf32>, vector<4x32xf32> -> vector<4x32xf32>
    %67 = vector.extract_strided_slice %54 {offsets = [12, 0], sizes = [4, 16], strides = [1, 1]} : vector<16x16xf32> to vector<4x16xf32>
    %cst_50 = arith.constant dense<0.000000e+00> : vector<4x32xf32>
    %68 = tpu.matmul %67, %5, %cst_50 {dimension_numbers = #tpu.dot_dimension_numbers<[1], [0], [0], [1], [0, 0, 1, 1], [], []>} : vector<4x16xf32>, vector<16x32xf32>, vector<4x32xf32> -> vector<4x32xf32>
    %69 = arith.addf %66, %68 : vector<4x32xf32>
    %70 = vector.broadcast %1 : vector<4x1xf32> to vector<4x32xf32>
    %71 = arith.addf %69, %70 : vector<4x32xf32>
    %c0_51 = arith.constant 0 : index
    %c0_52 = arith.constant 0 : index
    %c5 = arith.constant 5 : index
    %c0_53 = arith.constant 0 : index
    %72 = vector.load %arg6[%c0_51, %c0_52, %c5, %c0_53] : memref<1x4x32x32xf32, #tpu.memory_space<vmem>>, vector<1x4x1x32xf32>
    %73 = vector.shape_cast %72 : vector<1x4x1x32xf32> to vector<4x32xf32>
    %74 = vector.shape_cast %71 : vector<4x32xf32> to vector<1x4x1x32xf32>
    tpu.vector_store %arg6[%c0_51, %c0_52, %c5, %c0_53], %74 {strides = array<i32>} : memref<1x4x32x32xf32, #tpu.memory_space<vmem>>, vector<1x4x1x32xf32>,
    %c0_54 = arith.constant 0 : index
    %c0_55 = arith.constant 0 : index
    %c3_56 = arith.constant 3 : index
    %c0_57 = arith.constant 0 : index
    %75 = vector.load %arg2[%c0_54, %c0_55, %c3_56, %c0_57] : memref<1x4x16x16xf32, #tpu.memory_space<vmem>>, vector<1x4x1x16xf32>
    %76 = vector.shape_cast %75 : vector<1x4x1x16xf32> to vector<4x16xf32>
    %cst_58 = arith.constant dense<0.000000e+00> : vector<16x16xf32>
    %77 = tpu.matmul %0, %76, %cst_58 {dimension_numbers = #tpu.dot_dimension_numbers<[1], [0], [0], [1], [0, 0, 1, 1], [], []>} : vector<16x4xf32>, vector<4x16xf32>, vector<16x16xf32> -> vector<16x16xf32>
    %78 = vector.extract_strided_slice %77 {offsets = [0, 0], sizes = [4, 16], strides = [1, 1]} : vector<16x16xf32> to vector<4x16xf32>
    %cst_59 = arith.constant dense<0.000000e+00> : vector<4x32xf32>
    %79 = tpu.matmul %78, %3, %cst_59 {dimension_numbers = #tpu.dot_dimension_numbers<[1], [0], [0], [1], [0, 0, 1, 1], [], []>} : vector<4x16xf32>, vector<16x32xf32>, vector<4x32xf32> -> vector<4x32xf32>
    %80 = vector.extract_strided_slice %77 {offsets = [4, 0], sizes = [4, 16], strides = [1, 1]} : vector<16x16xf32> to vector<4x16xf32>
    %cst_60 = arith.constant dense<0.000000e+00> : vector<4x32xf32>
    %81 = tpu.matmul %80, %5, %cst_60 {dimension_numbers = #tpu.dot_dimension_numbers<[1], [0], [0], [1], [0, 0, 1, 1], [], []>} : vector<4x16xf32>, vector<16x32xf32>, vector<4x32xf32> -> vector<4x32xf32>
    %82 = arith.addf %79, %81 : vector<4x32xf32>
    %83 = vector.broadcast %1 : vector<4x1xf32> to vector<4x32xf32>
    %84 = arith.addf %82, %83 : vector<4x32xf32>
    %c0_61 = arith.constant 0 : index
    %c0_62 = arith.constant 0 : index
    %c6 = arith.constant 6 : index
    %c0_63 = arith.constant 0 : index
    %85 = vector.load %arg6[%c0_61, %c0_62, %c6, %c0_63] : memref<1x4x32x32xf32, #tpu.memory_space<vmem>>, vector<1x4x1x32xf32>
    %86 = vector.shape_cast %85 : vector<1x4x1x32xf32> to vector<4x32xf32>
    %87 = vector.shape_cast %84 : vector<4x32xf32> to vector<1x4x1x32xf32>
    tpu.vector_store %arg6[%c0_61, %c0_62, %c6, %c0_63], %87 {strides = array<i32>} : memref<1x4x32x32xf32, #tpu.memory_space<vmem>>, vector<1x4x1x32xf32>,
    %88 = vector.extract_strided_slice %77 {offsets = [8, 0], sizes = [4, 16], strides = [1, 1]} : vector<16x16xf32> to vector<4x16xf32>
    %cst_64 = arith.constant dense<0.000000e+00> : vector<4x32xf32>
    %89 = tpu.matmul %88, %3, %cst_64 {dimension_numbers = #tpu.dot_dimension_numbers<[1], [0], [0], [1], [0, 0, 1, 1], [], []>} : vector<4x16xf32>, vector<16x32xf32>, vector<4x32xf32> -> vector<4x32xf32>
    %90 = vector.extract_strided_slice %77 {offsets = [12, 0], sizes = [4, 16], strides = [1, 1]} : vector<16x16xf32> to vector<4x16xf32>
    %cst_65 = arith.constant dense<0.000000e+00> : vector<4x32xf32>
    %91 = tpu.matmul %90, %5, %cst_65 {dimension_numbers = #tpu.dot_dimension_numbers<[1], [0], [0], [1], [0, 0, 1, 1], [], []>} : vector<4x16xf32>, vector<16x32xf32>, vector<4x32xf32> -> vector<4x32xf32>
    %92 = arith.addf %89, %91 : vector<4x32xf32>
    %93 = vector.broadcast %1 : vector<4x1xf32> to vector<4x32xf32>
    %94 = arith.addf %92, %93 : vector<4x32xf32>
    %c0_66 = arith.constant 0 : index
    %c0_67 = arith.constant 0 : index
    %c7 = arith.constant 7 : index
    %c0_68 = arith.constant 0 : index
    %95 = vector.load %arg6[%c0_66, %c0_67, %c7, %c0_68] : memref<1x4x32x32xf32, #tpu.memory_space<vmem>>, vector<1x4x1x32xf32>
    %96 = vector.shape_cast %95 : vector<1x4x1x32xf32> to vector<4x32xf32>
    %97 = vector.shape_cast %94 : vector<4x32xf32> to vector<1x4x1x32xf32>
    tpu.vector_store %arg6[%c0_66, %c0_67, %c7, %c0_68], %97 {strides = array<i32>} : memref<1x4x32x32xf32, #tpu.memory_space<vmem>>, vector<1x4x1x32xf32>,
    %c0_69 = arith.constant 0 : index
    %c0_70 = arith.constant 0 : index
    %c4_71 = arith.constant 4 : index
    %c0_72 = arith.constant 0 : index
    %98 = vector.load %arg2[%c0_69, %c0_70, %c4_71, %c0_72] : memref<1x4x16x16xf32, #tpu.memory_space<vmem>>, vector<1x4x1x16xf32>
    %99 = vector.shape_cast %98 : vector<1x4x1x16xf32> to vector<4x16xf32>
    %cst_73 = arith.constant dense<0.000000e+00> : vector<16x16xf32>
    %100 = tpu.matmul %0, %99, %cst_73 {dimension_numbers = #tpu.dot_dimension_numbers<[1], [0], [0], [1], [0, 0, 1, 1], [], []>} : vector<16x4xf32>, vector<4x16xf32>, vector<16x16xf32> -> vector<16x16xf32>
    %101 = vector.extract_strided_slice %100 {offsets = [0, 0], sizes = [4, 16], strides = [1, 1]} : vector<16x16xf32> to vector<4x16xf32>
    %cst_74 = arith.constant dense<0.000000e+00> : vector<4x32xf32>
    %102 = tpu.matmul %101, %3, %cst_74 {dimension_numbers = #tpu.dot_dimension_numbers<[1], [0], [0], [1], [0, 0, 1, 1], [], []>} : vector<4x16xf32>, vector<16x32xf32>, vector<4x32xf32> -> vector<4x32xf32>
    %103 = vector.extract_strided_slice %100 {offsets = [4, 0], sizes = [4, 16], strides = [1, 1]} : vector<16x16xf32> to vector<4x16xf32>
    %cst_75 = arith.constant dense<0.000000e+00> : vector<4x32xf32>
    %104 = tpu.matmul %103, %5, %cst_75 {dimension_numbers = #tpu.dot_dimension_numbers<[1], [0], [0], [1], [0, 0, 1, 1], [], []>} : vector<4x16xf32>, vector<16x32xf32>, vector<4x32xf32> -> vector<4x32xf32>
    %105 = arith.addf %102, %104 : vector<4x32xf32>
    %106 = vector.broadcast %1 : vector<4x1xf32> to vector<4x32xf32>
    %107 = arith.addf %105, %106 : vector<4x32xf32>
    %c0_76 = arith.constant 0 : index
    %c0_77 = arith.constant 0 : index
    %c8 = arith.constant 8 : index
    %c0_78 = arith.constant 0 : index
    %108 = vector.load %arg6[%c0_76, %c0_77, %c8, %c0_78] : memref<1x4x32x32xf32, #tpu.memory_space<vmem>>, vector<1x4x1x32xf32>
    %109 = vector.shape_cast %108 : vector<1x4x1x32xf32> to vector<4x32xf32>
    %110 = vector.shape_cast %107 : vector<4x32xf32> to vector<1x4x1x32xf32>
    tpu.vector_store %arg6[%c0_76, %c0_77, %c8, %c0_78], %110 {strides = array<i32>} : memref<1x4x32x32xf32, #tpu.memory_space<vmem>>, vector<1x4x1x32xf32>,
    %111 = vector.extract_strided_slice %100 {offsets = [8, 0], sizes = [4, 16], strides = [1, 1]} : vector<16x16xf32> to vector<4x16xf32>
    %cst_79 = arith.constant dense<0.000000e+00> : vector<4x32xf32>
    %112 = tpu.matmul %111, %3, %cst_79 {dimension_numbers = #tpu.dot_dimension_numbers<[1], [0], [0], [1], [0, 0, 1, 1], [], []>} : vector<4x16xf32>, vector<16x32xf32>, vector<4x32xf32> -> vector<4x32xf32>
    %113 = vector.extract_strided_slice %100 {offsets = [12, 0], sizes = [4, 16], strides = [1, 1]} : vector<16x16xf32> to vector<4x16xf32>
    %cst_80 = arith.constant dense<0.000000e+00> : vector<4x32xf32>
    %114 = tpu.matmul %113, %5, %cst_80 {dimension_numbers = #tpu.dot_dimension_numbers<[1], [0], [0], [1], [0, 0, 1, 1], [], []>} : vector<4x16xf32>, vector<16x32xf32>, vector<4x32xf32> -> vector<4x32xf32>
    %115 = arith.addf %112, %114 : vector<4x32xf32>
    %116 = vector.broadcast %1 : vector<4x1xf32> to vector<4x32xf32>
    %117 = arith.addf %115, %116 : vector<4x32xf32>
    %c0_81 = arith.constant 0 : index
    %c0_82 = arith.constant 0 : index
    %c9 = arith.constant 9 : index
    %c0_83 = arith.constant 0 : index
    %118 = vector.load %arg6[%c0_81, %c0_82, %c9, %c0_83] : memref<1x4x32x32xf32, #tpu.memory_space<vmem>>, vector<1x4x1x32xf32>
    %119 = vector.shape_cast %118 : vector<1x4x1x32xf32> to vector<4x32xf32>
    %120 = vector.shape_cast %117 : vector<4x32xf32> to vector<1x4x1x32xf32>
    tpu.vector_store %arg6[%c0_81, %c0_82, %c9, %c0_83], %120 {strides = array<i32>} : memref<1x4x32x32xf32, #tpu.memory_space<vmem>>, vector<1x4x1x32xf32>,
    %c0_84 = arith.constant 0 : index
    %c0_85 = arith.constant 0 : index
    %c5_86 = arith.constant 5 : index
    %c0_87 = arith.constant 0 : index
    %121 = vector.load %arg2[%c0_84, %c0_85, %c5_86, %c0_87] : memref<1x4x16x16xf32, #tpu.memory_space<vmem>>, vector<1x4x1x16xf32>
    %122 = vector.shape_cast %121 : vector<1x4x1x16xf32> to vector<4x16xf32>
    %cst_88 = arith.constant dense<0.000000e+00> : vector<16x16xf32>
    %123 = tpu.matmul %0, %122, %cst_88 {dimension_numbers = #tpu.dot_dimension_numbers<[1], [0], [0], [1], [0, 0, 1, 1], [], []>} : vector<16x4xf32>, vector<4x16xf32>, vector<16x16xf32> -> vector<16x16xf32>
    %124 = vector.extract_strided_slice %123 {offsets = [0, 0], sizes = [4, 16], strides = [1, 1]} : vector<16x16xf32> to vector<4x16xf32>
    %cst_89 = arith.constant dense<0.000000e+00> : vector<4x32xf32>
    %125 = tpu.matmul %124, %3, %cst_89 {dimension_numbers = #tpu.dot_dimension_numbers<[1], [0], [0], [1], [0, 0, 1, 1], [], []>} : vector<4x16xf32>, vector<16x32xf32>, vector<4x32xf32> -> vector<4x32xf32>
    %126 = vector.extract_strided_slice %123 {offsets = [4, 0], sizes = [4, 16], strides = [1, 1]} : vector<16x16xf32> to vector<4x16xf32>
    %cst_90 = arith.constant dense<0.000000e+00> : vector<4x32xf32>
    %127 = tpu.matmul %126, %5, %cst_90 {dimension_numbers = #tpu.dot_dimension_numbers<[1], [0], [0], [1], [0, 0, 1, 1], [], []>} : vector<4x16xf32>, vector<16x32xf32>, vector<4x32xf32> -> vector<4x32xf32>
    %128 = arith.addf %125, %127 : vector<4x32xf32>
    %129 = vector.broadcast %1 : vector<4x1xf32> to vector<4x32xf32>
    %130 = arith.addf %128, %129 : vector<4x32xf32>
    %c0_91 = arith.constant 0 : index
    %c0_92 = arith.constant 0 : index
    %c10 = arith.constant 10 : index
    %c0_93 = arith.constant 0 : index
    %131 = vector.load %arg6[%c0_91, %c0_92, %c10, %c0_93] : memref<1x4x32x32xf32, #tpu.memory_space<vmem>>, vector<1x4x1x32xf32>
    %132 = vector.shape_cast %131 : vector<1x4x1x32xf32> to vector<4x32xf32>
    %133 = vector.shape_cast %130 : vector<4x32xf32> to vector<1x4x1x32xf32>
    tpu.vector_store %arg6[%c0_91, %c0_92, %c10, %c0_93], %133 {strides = array<i32>} : memref<1x4x32x32xf32, #tpu.memory_space<vmem>>, vector<1x4x1x32xf32>,
    %134 = vector.extract_strided_slice %123 {offsets = [8, 0], sizes = [4, 16], strides = [1, 1]} : vector<16x16xf32> to vector<4x16xf32>
    %cst_94 = arith.constant dense<0.000000e+00> : vector<4x32xf32>
    %135 = tpu.matmul %134, %3, %cst_94 {dimension_numbers = #tpu.dot_dimension_numbers<[1], [0], [0], [1], [0, 0, 1, 1], [], []>} : vector<4x16xf32>, vector<16x32xf32>, vector<4x32xf32> -> vector<4x32xf32>
    %136 = vector.extract_strided_slice %123 {offsets = [12, 0], sizes = [4, 16], strides = [1, 1]} : vector<16x16xf32> to vector<4x16xf32>
    %cst_95 = arith.constant dense<0.000000e+00> : vector<4x32xf32>
    %137 = tpu.matmul %136, %5, %cst_95 {dimension_numbers = #tpu.dot_dimension_numbers<[1], [0], [0], [1], [0, 0, 1, 1], [], []>} : vector<4x16xf32>, vector<16x32xf32>, vector<4x32xf32> -> vector<4x32xf32>
    %138 = arith.addf %135, %137 : vector<4x32xf32>
    %139 = vector.broadcast %1 : vector<4x1xf32> to vector<4x32xf32>
    %140 = arith.addf %138, %139 : vector<4x32xf32>
    %c0_96 = arith.constant 0 : index
    %c0_97 = arith.constant 0 : index
    %c11 = arith.constant 11 : index
    %c0_98 = arith.constant 0 : index
    %141 = vector.load %arg6[%c0_96, %c0_97, %c11, %c0_98] : memref<1x4x32x32xf32, #tpu.memory_space<vmem>>, vector<1x4x1x32xf32>
    %142 = vector.shape_cast %141 : vector<1x4x1x32xf32> to vector<4x32xf32>
    %143 = vector.shape_cast %140 : vector<4x32xf32> to vector<1x4x1x32xf32>
    tpu.vector_store %arg6[%c0_96, %c0_97, %c11, %c0_98], %143 {strides = array<i32>} : memref<1x4x32x32xf32, #tpu.memory_space<vmem>>, vector<1x4x1x32xf32>,
    %c0_99 = arith.constant 0 : index
    %c0_100 = arith.constant 0 : index
    %c6_101 = arith.constant 6 : index
    %c0_102 = arith.constant 0 : index
    %144 = vector.load %arg2[%c0_99, %c0_100, %c6_101, %c0_102] : memref<1x4x16x16xf32, #tpu.memory_space<vmem>>, vector<1x4x1x16xf32>
    %145 = vector.shape_cast %144 : vector<1x4x1x16xf32> to vector<4x16xf32>
    %cst_103 = arith.constant dense<0.000000e+00> : vector<16x16xf32>
    %146 = tpu.matmul %0, %145, %cst_103 {dimension_numbers = #tpu.dot_dimension_numbers<[1], [0], [0], [1], [0, 0, 1, 1], [], []>} : vector<16x4xf32>, vector<4x16xf32>, vector<16x16xf32> -> vector<16x16xf32>
    %147 = vector.extract_strided_slice %146 {offsets = [0, 0], sizes = [4, 16], strides = [1, 1]} : vector<16x16xf32> to vector<4x16xf32>
    %cst_104 = arith.constant dense<0.000000e+00> : vector<4x32xf32>
    %148 = tpu.matmul %147, %3, %cst_104 {dimension_numbers = #tpu.dot_dimension_numbers<[1], [0], [0], [1], [0, 0, 1, 1], [], []>} : vector<4x16xf32>, vector<16x32xf32>, vector<4x32xf32> -> vector<4x32xf32>
    %149 = vector.extract_strided_slice %146 {offsets = [4, 0], sizes = [4, 16], strides = [1, 1]} : vector<16x16xf32> to vector<4x16xf32>
    %cst_105 = arith.constant dense<0.000000e+00> : vector<4x32xf32>
    %150 = tpu.matmul %149, %5, %cst_105 {dimension_numbers = #tpu.dot_dimension_numbers<[1], [0], [0], [1], [0, 0, 1, 1], [], []>} : vector<4x16xf32>, vector<16x32xf32>, vector<4x32xf32> -> vector<4x32xf32>
    %151 = arith.addf %148, %150 : vector<4x32xf32>
    %152 = vector.broadcast %1 : vector<4x1xf32> to vector<4x32xf32>
    %153 = arith.addf %151, %152 : vector<4x32xf32>
    %c0_106 = arith.constant 0 : index
    %c0_107 = arith.constant 0 : index
    %c12 = arith.constant 12 : index
    %c0_108 = arith.constant 0 : index
    %154 = vector.load %arg6[%c0_106, %c0_107, %c12, %c0_108] : memref<1x4x32x32xf32, #tpu.memory_space<vmem>>, vector<1x4x1x32xf32>
    %155 = vector.shape_cast %154 : vector<1x4x1x32xf32> to vector<4x32xf32>
    %156 = vector.shape_cast %153 : vector<4x32xf32> to vector<1x4x1x32xf32>
    tpu.vector_store %arg6[%c0_106, %c0_107, %c12, %c0_108], %156 {strides = array<i32>} : memref<1x4x32x32xf32, #tpu.memory_space<vmem>>, vector<1x4x1x32xf32>,
    %157 = vector.extract_strided_slice %146 {offsets = [8, 0], sizes = [4, 16], strides = [1, 1]} : vector<16x16xf32> to vector<4x16xf32>
    %cst_109 = arith.constant dense<0.000000e+00> : vector<4x32xf32>
    %158 = tpu.matmul %157, %3, %cst_109 {dimension_numbers = #tpu.dot_dimension_numbers<[1], [0], [0], [1], [0, 0, 1, 1], [], []>} : vector<4x16xf32>, vector<16x32xf32>, vector<4x32xf32> -> vector<4x32xf32>
    %159 = vector.extract_strided_slice %146 {offsets = [12, 0], sizes = [4, 16], strides = [1, 1]} : vector<16x16xf32> to vector<4x16xf32>
    %cst_110 = arith.constant dense<0.000000e+00> : vector<4x32xf32>
    %160 = tpu.matmul %159, %5, %cst_110 {dimension_numbers = #tpu.dot_dimension_numbers<[1], [0], [0], [1], [0, 0, 1, 1], [], []>} : vector<4x16xf32>, vector<16x32xf32>, vector<4x32xf32> -> vector<4x32xf32>
    %161 = arith.addf %158, %160 : vector<4x32xf32>
    %162 = vector.broadcast %1 : vector<4x1xf32> to vector<4x32xf32>
    %163 = arith.addf %161, %162 : vector<4x32xf32>
    %c0_111 = arith.constant 0 : index
    %c0_112 = arith.constant 0 : index
    %c13 = arith.constant 13 : index
    %c0_113 = arith.constant 0 : index
    %164 = vector.load %arg6[%c0_111, %c0_112, %c13, %c0_113] : memref<1x4x32x32xf32, #tpu.memory_space<vmem>>, vector<1x4x1x32xf32>
    %165 = vector.shape_cast %164 : vector<1x4x1x32xf32> to vector<4x32xf32>
    %166 = vector.shape_cast %163 : vector<4x32xf32> to vector<1x4x1x32xf32>
    tpu.vector_store %arg6[%c0_111, %c0_112, %c13, %c0_113], %166 {strides = array<i32>} : memref<1x4x32x32xf32, #tpu.memory_space<vmem>>, vector<1x4x1x32xf32>,
    %c0_114 = arith.constant 0 : index
    %c0_115 = arith.constant 0 : index
    %c7_116 = arith.constant 7 : index
    %c0_117 = arith.constant 0 : index
    %167 = vector.load %arg2[%c0_114, %c0_115, %c7_116, %c0_117] : memref<1x4x16x16xf32, #tpu.memory_space<vmem>>, vector<1x4x1x16xf32>
    %168 = vector.shape_cast %167 : vector<1x4x1x16xf32> to vector<4x16xf32>
    %cst_118 = arith.constant dense<0.000000e+00> : vector<16x16xf32>
    %169 = tpu.matmul %0, %168, %cst_118 {dimension_numbers = #tpu.dot_dimension_numbers<[1], [0], [0], [1], [0, 0, 1, 1], [], []>} : vector<16x4xf32>, vector<4x16xf32>, vector<16x16xf32> -> vector<16x16xf32>
    %170 = vector.extract_strided_slice %169 {offsets = [0, 0], sizes = [4, 16], strides = [1, 1]} : vector<16x16xf32> to vector<4x16xf32>
    %cst_119 = arith.constant dense<0.000000e+00> : vector<4x32xf32>
    %171 = tpu.matmul %170, %3, %cst_119 {dimension_numbers = #tpu.dot_dimension_numbers<[1], [0], [0], [1], [0, 0, 1, 1], [], []>} : vector<4x16xf32>, vector<16x32xf32>, vector<4x32xf32> -> vector<4x32xf32>
    %172 = vector.extract_strided_slice %169 {offsets = [4, 0], sizes = [4, 16], strides = [1, 1]} : vector<16x16xf32> to vector<4x16xf32>
    %cst_120 = arith.constant dense<0.000000e+00> : vector<4x32xf32>
    %173 = tpu.matmul %172, %5, %cst_120 {dimension_numbers = #tpu.dot_dimension_numbers<[1], [0], [0], [1], [0, 0, 1, 1], [], []>} : vector<4x16xf32>, vector<16x32xf32>, vector<4x32xf32> -> vector<4x32xf32>
    %174 = arith.addf %171, %173 : vector<4x32xf32>
    %175 = vector.broadcast %1 : vector<4x1xf32> to vector<4x32xf32>
    %176 = arith.addf %174, %175 : vector<4x32xf32>
    %c0_121 = arith.constant 0 : index
    %c0_122 = arith.constant 0 : index
    %c14 = arith.constant 14 : index
    %c0_123 = arith.constant 0 : index
    %177 = vector.load %arg6[%c0_121, %c0_122, %c14, %c0_123] : memref<1x4x32x32xf32, #tpu.memory_space<vmem>>, vector<1x4x1x32xf32>
    %178 = vector.shape_cast %177 : vector<1x4x1x32xf32> to vector<4x32xf32>
    %179 = vector.shape_cast %176 : vector<4x32xf32> to vector<1x4x1x32xf32>
    tpu.vector_store %arg6[%c0_121, %c0_122, %c14, %c0_123], %179 {strides = array<i32>} : memref<1x4x32x32xf32, #tpu.memory_space<vmem>>, vector<1x4x1x32xf32>,
    %180 = vector.extract_strided_slice %169 {offsets = [8, 0], sizes = [4, 16], strides = [1, 1]} : vector<16x16xf32> to vector<4x16xf32>
    %cst_124 = arith.constant dense<0.000000e+00> : vector<4x32xf32>
    %181 = tpu.matmul %180, %3, %cst_124 {dimension_numbers = #tpu.dot_dimension_numbers<[1], [0], [0], [1], [0, 0, 1, 1], [], []>} : vector<4x16xf32>, vector<16x32xf32>, vector<4x32xf32> -> vector<4x32xf32>
    %182 = vector.extract_strided_slice %169 {offsets = [12, 0], sizes = [4, 16], strides = [1, 1]} : vector<16x16xf32> to vector<4x16xf32>
    %cst_125 = arith.constant dense<0.000000e+00> : vector<4x32xf32>
    %183 = tpu.matmul %182, %5, %cst_125 {dimension_numbers = #tpu.dot_dimension_numbers<[1], [0], [0], [1], [0, 0, 1, 1], [], []>} : vector<4x16xf32>, vector<16x32xf32>, vector<4x32xf32> -> vector<4x32xf32>
    %184 = arith.addf %181, %183 : vector<4x32xf32>
    %185 = vector.broadcast %1 : vector<4x1xf32> to vector<4x32xf32>
    %186 = arith.addf %184, %185 : vector<4x32xf32>
    %c0_126 = arith.constant 0 : index
    %c0_127 = arith.constant 0 : index
    %c15 = arith.constant 15 : index
    %c0_128 = arith.constant 0 : index
    %187 = vector.load %arg6[%c0_126, %c0_127, %c15, %c0_128] : memref<1x4x32x32xf32, #tpu.memory_space<vmem>>, vector<1x4x1x32xf32>
    %188 = vector.shape_cast %187 : vector<1x4x1x32xf32> to vector<4x32xf32>
    %189 = vector.shape_cast %186 : vector<4x32xf32> to vector<1x4x1x32xf32>
    tpu.vector_store %arg6[%c0_126, %c0_127, %c15, %c0_128], %189 {strides = array<i32>} : memref<1x4x32x32xf32, #tpu.memory_space<vmem>>, vector<1x4x1x32xf32>,
    %c0_129 = arith.constant 0 : index
    %c0_130 = arith.constant 0 : index
    %c8_131 = arith.constant 8 : index
    %c0_132 = arith.constant 0 : index
    %190 = vector.load %arg2[%c0_129, %c0_130, %c8_131, %c0_132] : memref<1x4x16x16xf32, #tpu.memory_space<vmem>>, vector<1x4x1x16xf32>
    %191 = vector.shape_cast %190 : vector<1x4x1x16xf32> to vector<4x16xf32>
    %cst_133 = arith.constant dense<0.000000e+00> : vector<16x16xf32>
    %192 = tpu.matmul %0, %191, %cst_133 {dimension_numbers = #tpu.dot_dimension_numbers<[1], [0], [0], [1], [0, 0, 1, 1], [], []>} : vector<16x4xf32>, vector<4x16xf32>, vector<16x16xf32> -> vector<16x16xf32>
    %193 = vector.extract_strided_slice %192 {offsets = [0, 0], sizes = [4, 16], strides = [1, 1]} : vector<16x16xf32> to vector<4x16xf32>
    %cst_134 = arith.constant dense<0.000000e+00> : vector<4x32xf32>
    %194 = tpu.matmul %193, %3, %cst_134 {dimension_numbers = #tpu.dot_dimension_numbers<[1], [0], [0], [1], [0, 0, 1, 1], [], []>} : vector<4x16xf32>, vector<16x32xf32>, vector<4x32xf32> -> vector<4x32xf32>
    %195 = vector.extract_strided_slice %192 {offsets = [4, 0], sizes = [4, 16], strides = [1, 1]} : vector<16x16xf32> to vector<4x16xf32>
    %cst_135 = arith.constant dense<0.000000e+00> : vector<4x32xf32>
    %196 = tpu.matmul %195, %5, %cst_135 {dimension_numbers = #tpu.dot_dimension_numbers<[1], [0], [0], [1], [0, 0, 1, 1], [], []>} : vector<4x16xf32>, vector<16x32xf32>, vector<4x32xf32> -> vector<4x32xf32>
    %197 = arith.addf %194, %196 : vector<4x32xf32>
    %198 = vector.broadcast %1 : vector<4x1xf32> to vector<4x32xf32>
    %199 = arith.addf %197, %198 : vector<4x32xf32>
    %c0_136 = arith.constant 0 : index
    %c0_137 = arith.constant 0 : index
    %c16 = arith.constant 16 : index
    %c0_138 = arith.constant 0 : index
    %200 = vector.load %arg6[%c0_136, %c0_137, %c16, %c0_138] : memref<1x4x32x32xf32, #tpu.memory_space<vmem>>, vector<1x4x1x32xf32>
    %201 = vector.shape_cast %200 : vector<1x4x1x32xf32> to vector<4x32xf32>
    %202 = vector.shape_cast %199 : vector<4x32xf32> to vector<1x4x1x32xf32>
    tpu.vector_store %arg6[%c0_136, %c0_137, %c16, %c0_138], %202 {strides = array<i32>} : memref<1x4x32x32xf32, #tpu.memory_space<vmem>>, vector<1x4x1x32xf32>,
    %203 = vector.extract_strided_slice %192 {offsets = [8, 0], sizes = [4, 16], strides = [1, 1]} : vector<16x16xf32> to vector<4x16xf32>
    %cst_139 = arith.constant dense<0.000000e+00> : vector<4x32xf32>
    %204 = tpu.matmul %203, %3, %cst_139 {dimension_numbers = #tpu.dot_dimension_numbers<[1], [0], [0], [1], [0, 0, 1, 1], [], []>} : vector<4x16xf32>, vector<16x32xf32>, vector<4x32xf32> -> vector<4x32xf32>
    %205 = vector.extract_strided_slice %192 {offsets = [12, 0], sizes = [4, 16], strides = [1, 1]} : vector<16x16xf32> to vector<4x16xf32>
    %cst_140 = arith.constant dense<0.000000e+00> : vector<4x32xf32>
    %206 = tpu.matmul %205, %5, %cst_140 {dimension_numbers = #tpu.dot_dimension_numbers<[1], [0], [0], [1], [0, 0, 1, 1], [], []>} : vector<4x16xf32>, vector<16x32xf32>, vector<4x32xf32> -> vector<4x32xf32>
    %207 = arith.addf %204, %206 : vector<4x32xf32>
    %208 = vector.broadcast %1 : vector<4x1xf32> to vector<4x32xf32>
    %209 = arith.addf %207, %208 : vector<4x32xf32>
    %c0_141 = arith.constant 0 : index
    %c0_142 = arith.constant 0 : index
    %c17 = arith.constant 17 : index
    %c0_143 = arith.constant 0 : index
    %210 = vector.load %arg6[%c0_141, %c0_142, %c17, %c0_143] : memref<1x4x32x32xf32, #tpu.memory_space<vmem>>, vector<1x4x1x32xf32>
    %211 = vector.shape_cast %210 : vector<1x4x1x32xf32> to vector<4x32xf32>
    %212 = vector.shape_cast %209 : vector<4x32xf32> to vector<1x4x1x32xf32>
    tpu.vector_store %arg6[%c0_141, %c0_142, %c17, %c0_143], %212 {strides = array<i32>} : memref<1x4x32x32xf32, #tpu.memory_space<vmem>>, vector<1x4x1x32xf32>,
    %c0_144 = arith.constant 0 : index
    %c0_145 = arith.constant 0 : index
    %c9_146 = arith.constant 9 : index
    %c0_147 = arith.constant 0 : index
    %213 = vector.load %arg2[%c0_144, %c0_145, %c9_146, %c0_147] : memref<1x4x16x16xf32, #tpu.memory_space<vmem>>, vector<1x4x1x16xf32>
    %214 = vector.shape_cast %213 : vector<1x4x1x16xf32> to vector<4x16xf32>
    %cst_148 = arith.constant dense<0.000000e+00> : vector<16x16xf32>
    %215 = tpu.matmul %0, %214, %cst_148 {dimension_numbers = #tpu.dot_dimension_numbers<[1], [0], [0], [1], [0, 0, 1, 1], [], []>} : vector<16x4xf32>, vector<4x16xf32>, vector<16x16xf32> -> vector<16x16xf32>
    %216 = vector.extract_strided_slice %215 {offsets = [0, 0], sizes = [4, 16], strides = [1, 1]} : vector<16x16xf32> to vector<4x16xf32>
    %cst_149 = arith.constant dense<0.000000e+00> : vector<4x32xf32>
    %217 = tpu.matmul %216, %3, %cst_149 {dimension_numbers = #tpu.dot_dimension_numbers<[1], [0], [0], [1], [0, 0, 1, 1], [], []>} : vector<4x16xf32>, vector<16x32xf32>, vector<4x32xf32> -> vector<4x32xf32>
    %218 = vector.extract_strided_slice %215 {offsets = [4, 0], sizes = [4, 16], strides = [1, 1]} : vector<16x16xf32> to vector<4x16xf32>
    %cst_150 = arith.constant dense<0.000000e+00> : vector<4x32xf32>
    %219 = tpu.matmul %218, %5, %cst_150 {dimension_numbers = #tpu.dot_dimension_numbers<[1], [0], [0], [1], [0, 0, 1, 1], [], []>} : vector<4x16xf32>, vector<16x32xf32>, vector<4x32xf32> -> vector<4x32xf32>
    %220 = arith.addf %217, %219 : vector<4x32xf32>
    %221 = vector.broadcast %1 : vector<4x1xf32> to vector<4x32xf32>
    %222 = arith.addf %220, %221 : vector<4x32xf32>
    %c0_151 = arith.constant 0 : index
    %c0_152 = arith.constant 0 : index
    %c18 = arith.constant 18 : index
    %c0_153 = arith.constant 0 : index
    %223 = vector.load %arg6[%c0_151, %c0_152, %c18, %c0_153] : memref<1x4x32x32xf32, #tpu.memory_space<vmem>>, vector<1x4x1x32xf32>
    %224 = vector.shape_cast %223 : vector<1x4x1x32xf32> to vector<4x32xf32>
    %225 = vector.shape_cast %222 : vector<4x32xf32> to vector<1x4x1x32xf32>
    tpu.vector_store %arg6[%c0_151, %c0_152, %c18, %c0_153], %225 {strides = array<i32>} : memref<1x4x32x32xf32, #tpu.memory_space<vmem>>, vector<1x4x1x32xf32>,
    %226 = vector.extract_strided_slice %215 {offsets = [8, 0], sizes = [4, 16], strides = [1, 1]} : vector<16x16xf32> to vector<4x16xf32>
    %cst_154 = arith.constant dense<0.000000e+00> : vector<4x32xf32>
    %227 = tpu.matmul %226, %3, %cst_154 {dimension_numbers = #tpu.dot_dimension_numbers<[1], [0], [0], [1], [0, 0, 1, 1], [], []>} : vector<4x16xf32>, vector<16x32xf32>, vector<4x32xf32> -> vector<4x32xf32>
    %228 = vector.extract_strided_slice %215 {offsets = [12, 0], sizes = [4, 16], strides = [1, 1]} : vector<16x16xf32> to vector<4x16xf32>
    %cst_155 = arith.constant dense<0.000000e+00> : vector<4x32xf32>
    %229 = tpu.matmul %228, %5, %cst_155 {dimension_numbers = #tpu.dot_dimension_numbers<[1], [0], [0], [1], [0, 0, 1, 1], [], []>} : vector<4x16xf32>, vector<16x32xf32>, vector<4x32xf32> -> vector<4x32xf32>
    %230 = arith.addf %227, %229 : vector<4x32xf32>
    %231 = vector.broadcast %1 : vector<4x1xf32> to vector<4x32xf32>
    %232 = arith.addf %230, %231 : vector<4x32xf32>
    %c0_156 = arith.constant 0 : index
    %c0_157 = arith.constant 0 : index
    %c19 = arith.constant 19 : index
    %c0_158 = arith.constant 0 : index
    %233 = vector.load %arg6[%c0_156, %c0_157, %c19, %c0_158] : memref<1x4x32x32xf32, #tpu.memory_space<vmem>>, vector<1x4x1x32xf32>
    %234 = vector.shape_cast %233 : vector<1x4x1x32xf32> to vector<4x32xf32>
    %235 = vector.shape_cast %232 : vector<4x32xf32> to vector<1x4x1x32xf32>
    tpu.vector_store %arg6[%c0_156, %c0_157, %c19, %c0_158], %235 {strides = array<i32>} : memref<1x4x32x32xf32, #tpu.memory_space<vmem>>, vector<1x4x1x32xf32>,
    %c0_159 = arith.constant 0 : index
    %c0_160 = arith.constant 0 : index
    %c10_161 = arith.constant 10 : index
    %c0_162 = arith.constant 0 : index
    %236 = vector.load %arg2[%c0_159, %c0_160, %c10_161, %c0_162] : memref<1x4x16x16xf32, #tpu.memory_space<vmem>>, vector<1x4x1x16xf32>
    %237 = vector.shape_cast %236 : vector<1x4x1x16xf32> to vector<4x16xf32>
    %cst_163 = arith.constant dense<0.000000e+00> : vector<16x16xf32>
    %238 = tpu.matmul %0, %237, %cst_163 {dimension_numbers = #tpu.dot_dimension_numbers<[1], [0], [0], [1], [0, 0, 1, 1], [], []>} : vector<16x4xf32>, vector<4x16xf32>, vector<16x16xf32> -> vector<16x16xf32>
    %239 = vector.extract_strided_slice %238 {offsets = [0, 0], sizes = [4, 16], strides = [1, 1]} : vector<16x16xf32> to vector<4x16xf32>
    %cst_164 = arith.constant dense<0.000000e+00> : vector<4x32xf32>
    %240 = tpu.matmul %239, %3, %cst_164 {dimension_numbers = #tpu.dot_dimension_numbers<[1], [0], [0], [1], [0, 0, 1, 1], [], []>} : vector<4x16xf32>, vector<16x32xf32>, vector<4x32xf32> -> vector<4x32xf32>
    %241 = vector.extract_strided_slice %238 {offsets = [4, 0], sizes = [4, 16], strides = [1, 1]} : vector<16x16xf32> to vector<4x16xf32>
    %cst_165 = arith.constant dense<0.000000e+00> : vector<4x32xf32>
    %242 = tpu.matmul %241, %5, %cst_165 {dimension_numbers = #tpu.dot_dimension_numbers<[1], [0], [0], [1], [0, 0, 1, 1], [], []>} : vector<4x16xf32>, vector<16x32xf32>, vector<4x32xf32> -> vector<4x32xf32>
    %243 = arith.addf %240, %242 : vector<4x32xf32>
    %244 = vector.broadcast %1 : vector<4x1xf32> to vector<4x32xf32>
    %245 = arith.addf %243, %244 : vector<4x32xf32>
    %c0_166 = arith.constant 0 : index
    %c0_167 = arith.constant 0 : index
    %c20 = arith.constant 20 : index
    %c0_168 = arith.constant 0 : index
    %246 = vector.load %arg6[%c0_166, %c0_167, %c20, %c0_168] : memref<1x4x32x32xf32, #tpu.memory_space<vmem>>, vector<1x4x1x32xf32>
    %247 = vector.shape_cast %246 : vector<1x4x1x32xf32> to vector<4x32xf32>
    %248 = vector.shape_cast %245 : vector<4x32xf32> to vector<1x4x1x32xf32>
    tpu.vector_store %arg6[%c0_166, %c0_167, %c20, %c0_168], %248 {strides = array<i32>} : memref<1x4x32x32xf32, #tpu.memory_space<vmem>>, vector<1x4x1x32xf32>,
    %249 = vector.extract_strided_slice %238 {offsets = [8, 0], sizes = [4, 16], strides = [1, 1]} : vector<16x16xf32> to vector<4x16xf32>
    %cst_169 = arith.constant dense<0.000000e+00> : vector<4x32xf32>
    %250 = tpu.matmul %249, %3, %cst_169 {dimension_numbers = #tpu.dot_dimension_numbers<[1], [0], [0], [1], [0, 0, 1, 1], [], []>} : vector<4x16xf32>, vector<16x32xf32>, vector<4x32xf32> -> vector<4x32xf32>
    %251 = vector.extract_strided_slice %238 {offsets = [12, 0], sizes = [4, 16], strides = [1, 1]} : vector<16x16xf32> to vector<4x16xf32>
    %cst_170 = arith.constant dense<0.000000e+00> : vector<4x32xf32>
    %252 = tpu.matmul %251, %5, %cst_170 {dimension_numbers = #tpu.dot_dimension_numbers<[1], [0], [0], [1], [0, 0, 1, 1], [], []>} : vector<4x16xf32>, vector<16x32xf32>, vector<4x32xf32> -> vector<4x32xf32>
    %253 = arith.addf %250, %252 : vector<4x32xf32>
    %254 = vector.broadcast %1 : vector<4x1xf32> to vector<4x32xf32>
    %255 = arith.addf %253, %254 : vector<4x32xf32>
    %c0_171 = arith.constant 0 : index
    %c0_172 = arith.constant 0 : index
    %c21 = arith.constant 21 : index
    %c0_173 = arith.constant 0 : index
    %256 = vector.load %arg6[%c0_171, %c0_172, %c21, %c0_173] : memref<1x4x32x32xf32, #tpu.memory_space<vmem>>, vector<1x4x1x32xf32>
    %257 = vector.shape_cast %256 : vector<1x4x1x32xf32> to vector<4x32xf32>
    %258 = vector.shape_cast %255 : vector<4x32xf32> to vector<1x4x1x32xf32>
    tpu.vector_store %arg6[%c0_171, %c0_172, %c21, %c0_173], %258 {strides = array<i32>} : memref<1x4x32x32xf32, #tpu.memory_space<vmem>>, vector<1x4x1x32xf32>,
    %c0_174 = arith.constant 0 : index
    %c0_175 = arith.constant 0 : index
    %c11_176 = arith.constant 11 : index
    %c0_177 = arith.constant 0 : index
    %259 = vector.load %arg2[%c0_174, %c0_175, %c11_176, %c0_177] : memref<1x4x16x16xf32, #tpu.memory_space<vmem>>, vector<1x4x1x16xf32>
    %260 = vector.shape_cast %259 : vector<1x4x1x16xf32> to vector<4x16xf32>
    %cst_178 = arith.constant dense<0.000000e+00> : vector<16x16xf32>
    %261 = tpu.matmul %0, %260, %cst_178 {dimension_numbers = #tpu.dot_dimension_numbers<[1], [0], [0], [1], [0, 0, 1, 1], [], []>} : vector<16x4xf32>, vector<4x16xf32>, vector<16x16xf32> -> vector<16x16xf32>
    %262 = vector.extract_strided_slice %261 {offsets = [0, 0], sizes = [4, 16], strides = [1, 1]} : vector<16x16xf32> to vector<4x16xf32>
    %cst_179 = arith.constant dense<0.000000e+00> : vector<4x32xf32>
    %263 = tpu.matmul %262, %3, %cst_179 {dimension_numbers = #tpu.dot_dimension_numbers<[1], [0], [0], [1], [0, 0, 1, 1], [], []>} : vector<4x16xf32>, vector<16x32xf32>, vector<4x32xf32> -> vector<4x32xf32>
    %264 = vector.extract_strided_slice %261 {offsets = [4, 0], sizes = [4, 16], strides = [1, 1]} : vector<16x16xf32> to vector<4x16xf32>
    %cst_180 = arith.constant dense<0.000000e+00> : vector<4x32xf32>
    %265 = tpu.matmul %264, %5, %cst_180 {dimension_numbers = #tpu.dot_dimension_numbers<[1], [0], [0], [1], [0, 0, 1, 1], [], []>} : vector<4x16xf32>, vector<16x32xf32>, vector<4x32xf32> -> vector<4x32xf32>
    %266 = arith.addf %263, %265 : vector<4x32xf32>
    %267 = vector.broadcast %1 : vector<4x1xf32> to vector<4x32xf32>
    %268 = arith.addf %266, %267 : vector<4x32xf32>
    %c0_181 = arith.constant 0 : index
    %c0_182 = arith.constant 0 : index
    %c22 = arith.constant 22 : index
    %c0_183 = arith.constant 0 : index
    %269 = vector.load %arg6[%c0_181, %c0_182, %c22, %c0_183] : memref<1x4x32x32xf32, #tpu.memory_space<vmem>>, vector<1x4x1x32xf32>
    %270 = vector.shape_cast %269 : vector<1x4x1x32xf32> to vector<4x32xf32>
    %271 = vector.shape_cast %268 : vector<4x32xf32> to vector<1x4x1x32xf32>
    tpu.vector_store %arg6[%c0_181, %c0_182, %c22, %c0_183], %271 {strides = array<i32>} : memref<1x4x32x32xf32, #tpu.memory_space<vmem>>, vector<1x4x1x32xf32>,
    %272 = vector.extract_strided_slice %261 {offsets = [8, 0], sizes = [4, 16], strides = [1, 1]} : vector<16x16xf32> to vector<4x16xf32>
    %cst_184 = arith.constant dense<0.000000e+00> : vector<4x32xf32>
    %273 = tpu.matmul %272, %3, %cst_184 {dimension_numbers = #tpu.dot_dimension_numbers<[1], [0], [0], [1], [0, 0, 1, 1], [], []>} : vector<4x16xf32>, vector<16x32xf32>, vector<4x32xf32> -> vector<4x32xf32>
    %274 = vector.extract_strided_slice %261 {offsets = [12, 0], sizes = [4, 16], strides = [1, 1]} : vector<16x16xf32> to vector<4x16xf32>
    %cst_185 = arith.constant dense<0.000000e+00> : vector<4x32xf32>
    %275 = tpu.matmul %274, %5, %cst_185 {dimension_numbers = #tpu.dot_dimension_numbers<[1], [0], [0], [1], [0, 0, 1, 1], [], []>} : vector<4x16xf32>, vector<16x32xf32>, vector<4x32xf32> -> vector<4x32xf32>
    %276 = arith.addf %273, %275 : vector<4x32xf32>
    %277 = vector.broadcast %1 : vector<4x1xf32> to vector<4x32xf32>
    %278 = arith.addf %276, %277 : vector<4x32xf32>
    %c0_186 = arith.constant 0 : index
    %c0_187 = arith.constant 0 : index
    %c23 = arith.constant 23 : index
    %c0_188 = arith.constant 0 : index
    %279 = vector.load %arg6[%c0_186, %c0_187, %c23, %c0_188] : memref<1x4x32x32xf32, #tpu.memory_space<vmem>>, vector<1x4x1x32xf32>
    %280 = vector.shape_cast %279 : vector<1x4x1x32xf32> to vector<4x32xf32>
    %281 = vector.shape_cast %278 : vector<4x32xf32> to vector<1x4x1x32xf32>
    tpu.vector_store %arg6[%c0_186, %c0_187, %c23, %c0_188], %281 {strides = array<i32>} : memref<1x4x32x32xf32, #tpu.memory_space<vmem>>, vector<1x4x1x32xf32>,
    %c0_189 = arith.constant 0 : index
    %c0_190 = arith.constant 0 : index
    %c12_191 = arith.constant 12 : index
    %c0_192 = arith.constant 0 : index
    %282 = vector.load %arg2[%c0_189, %c0_190, %c12_191, %c0_192] : memref<1x4x16x16xf32, #tpu.memory_space<vmem>>, vector<1x4x1x16xf32>
    %283 = vector.shape_cast %282 : vector<1x4x1x16xf32> to vector<4x16xf32>
    %cst_193 = arith.constant dense<0.000000e+00> : vector<16x16xf32>
    %284 = tpu.matmul %0, %283, %cst_193 {dimension_numbers = #tpu.dot_dimension_numbers<[1], [0], [0], [1], [0, 0, 1, 1], [], []>} : vector<16x4xf32>, vector<4x16xf32>, vector<16x16xf32> -> vector<16x16xf32>
    %285 = vector.extract_strided_slice %284 {offsets = [0, 0], sizes = [4, 16], strides = [1, 1]} : vector<16x16xf32> to vector<4x16xf32>
    %cst_194 = arith.constant dense<0.000000e+00> : vector<4x32xf32>
    %286 = tpu.matmul %285, %3, %cst_194 {dimension_numbers = #tpu.dot_dimension_numbers<[1], [0], [0], [1], [0, 0, 1, 1], [], []>} : vector<4x16xf32>, vector<16x32xf32>, vector<4x32xf32> -> vector<4x32xf32>
    %287 = vector.extract_strided_slice %284 {offsets = [4, 0], sizes = [4, 16], strides = [1, 1]} : vector<16x16xf32> to vector<4x16xf32>
    %cst_195 = arith.constant dense<0.000000e+00> : vector<4x32xf32>
    %288 = tpu.matmul %287, %5, %cst_195 {dimension_numbers = #tpu.dot_dimension_numbers<[1], [0], [0], [1], [0, 0, 1, 1], [], []>} : vector<4x16xf32>, vector<16x32xf32>, vector<4x32xf32> -> vector<4x32xf32>
    %289 = arith.addf %286, %288 : vector<4x32xf32>
    %290 = vector.broadcast %1 : vector<4x1xf32> to vector<4x32xf32>
    %291 = arith.addf %289, %290 : vector<4x32xf32>
    %c0_196 = arith.constant 0 : index
    %c0_197 = arith.constant 0 : index
    %c24 = arith.constant 24 : index
    %c0_198 = arith.constant 0 : index
    %292 = vector.load %arg6[%c0_196, %c0_197, %c24, %c0_198] : memref<1x4x32x32xf32, #tpu.memory_space<vmem>>, vector<1x4x1x32xf32>
    %293 = vector.shape_cast %292 : vector<1x4x1x32xf32> to vector<4x32xf32>
    %294 = vector.shape_cast %291 : vector<4x32xf32> to vector<1x4x1x32xf32>
    tpu.vector_store %arg6[%c0_196, %c0_197, %c24, %c0_198], %294 {strides = array<i32>} : memref<1x4x32x32xf32, #tpu.memory_space<vmem>>, vector<1x4x1x32xf32>,
    %295 = vector.extract_strided_slice %284 {offsets = [8, 0], sizes = [4, 16], strides = [1, 1]} : vector<16x16xf32> to vector<4x16xf32>
    %cst_199 = arith.constant dense<0.000000e+00> : vector<4x32xf32>
    %296 = tpu.matmul %295, %3, %cst_199 {dimension_numbers = #tpu.dot_dimension_numbers<[1], [0], [0], [1], [0, 0, 1, 1], [], []>} : vector<4x16xf32>, vector<16x32xf32>, vector<4x32xf32> -> vector<4x32xf32>
    %297 = vector.extract_strided_slice %284 {offsets = [12, 0], sizes = [4, 16], strides = [1, 1]} : vector<16x16xf32> to vector<4x16xf32>
    %cst_200 = arith.constant dense<0.000000e+00> : vector<4x32xf32>
    %298 = tpu.matmul %297, %5, %cst_200 {dimension_numbers = #tpu.dot_dimension_numbers<[1], [0], [0], [1], [0, 0, 1, 1], [], []>} : vector<4x16xf32>, vector<16x32xf32>, vector<4x32xf32> -> vector<4x32xf32>
    %299 = arith.addf %296, %298 : vector<4x32xf32>
    %300 = vector.broadcast %1 : vector<4x1xf32> to vector<4x32xf32>
    %301 = arith.addf %299, %300 : vector<4x32xf32>
    %c0_201 = arith.constant 0 : index
    %c0_202 = arith.constant 0 : index
    %c25 = arith.constant 25 : index
    %c0_203 = arith.constant 0 : index
    %302 = vector.load %arg6[%c0_201, %c0_202, %c25, %c0_203] : memref<1x4x32x32xf32, #tpu.memory_space<vmem>>, vector<1x4x1x32xf32>
    %303 = vector.shape_cast %302 : vector<1x4x1x32xf32> to vector<4x32xf32>
    %304 = vector.shape_cast %301 : vector<4x32xf32> to vector<1x4x1x32xf32>
    tpu.vector_store %arg6[%c0_201, %c0_202, %c25, %c0_203], %304 {strides = array<i32>} : memref<1x4x32x32xf32, #tpu.memory_space<vmem>>, vector<1x4x1x32xf32>,
    %c0_204 = arith.constant 0 : index
    %c0_205 = arith.constant 0 : index
    %c13_206 = arith.constant 13 : index
    %c0_207 = arith.constant 0 : index
    %305 = vector.load %arg2[%c0_204, %c0_205, %c13_206, %c0_207] : memref<1x4x16x16xf32, #tpu.memory_space<vmem>>, vector<1x4x1x16xf32>
    %306 = vector.shape_cast %305 : vector<1x4x1x16xf32> to vector<4x16xf32>
    %cst_208 = arith.constant dense<0.000000e+00> : vector<16x16xf32>
    %307 = tpu.matmul %0, %306, %cst_208 {dimension_numbers = #tpu.dot_dimension_numbers<[1], [0], [0], [1], [0, 0, 1, 1], [], []>} : vector<16x4xf32>, vector<4x16xf32>, vector<16x16xf32> -> vector<16x16xf32>
    %308 = vector.extract_strided_slice %307 {offsets = [0, 0], sizes = [4, 16], strides = [1, 1]} : vector<16x16xf32> to vector<4x16xf32>
    %cst_209 = arith.constant dense<0.000000e+00> : vector<4x32xf32>
    %309 = tpu.matmul %308, %3, %cst_209 {dimension_numbers = #tpu.dot_dimension_numbers<[1], [0], [0], [1], [0, 0, 1, 1], [], []>} : vector<4x16xf32>, vector<16x32xf32>, vector<4x32xf32> -> vector<4x32xf32>
    %310 = vector.extract_strided_slice %307 {offsets = [4, 0], sizes = [4, 16], strides = [1, 1]} : vector<16x16xf32> to vector<4x16xf32>
    %cst_210 = arith.constant dense<0.000000e+00> : vector<4x32xf32>
    %311 = tpu.matmul %310, %5, %cst_210 {dimension_numbers = #tpu.dot_dimension_numbers<[1], [0], [0], [1], [0, 0, 1, 1], [], []>} : vector<4x16xf32>, vector<16x32xf32>, vector<4x32xf32> -> vector<4x32xf32>
    %312 = arith.addf %309, %311 : vector<4x32xf32>
    %313 = vector.broadcast %1 : vector<4x1xf32> to vector<4x32xf32>
    %314 = arith.addf %312, %313 : vector<4x32xf32>
    %c0_211 = arith.constant 0 : index
    %c0_212 = arith.constant 0 : index
    %c26 = arith.constant 26 : index
    %c0_213 = arith.constant 0 : index
    %315 = vector.load %arg6[%c0_211, %c0_212, %c26, %c0_213] : memref<1x4x32x32xf32, #tpu.memory_space<vmem>>, vector<1x4x1x32xf32>
    %316 = vector.shape_cast %315 : vector<1x4x1x32xf32> to vector<4x32xf32>
    %317 = vector.shape_cast %314 : vector<4x32xf32> to vector<1x4x1x32xf32>
    tpu.vector_store %arg6[%c0_211, %c0_212, %c26, %c0_213], %317 {strides = array<i32>} : memref<1x4x32x32xf32, #tpu.memory_space<vmem>>, vector<1x4x1x32xf32>,
    %318 = vector.extract_strided_slice %307 {offsets = [8, 0], sizes = [4, 16], strides = [1, 1]} : vector<16x16xf32> to vector<4x16xf32>
    %cst_214 = arith.constant dense<0.000000e+00> : vector<4x32xf32>
    %319 = tpu.matmul %318, %3, %cst_214 {dimension_numbers = #tpu.dot_dimension_numbers<[1], [0], [0], [1], [0, 0, 1, 1], [], []>} : vector<4x16xf32>, vector<16x32xf32>, vector<4x32xf32> -> vector<4x32xf32>
    %320 = vector.extract_strided_slice %307 {offsets = [12, 0], sizes = [4, 16], strides = [1, 1]} : vector<16x16xf32> to vector<4x16xf32>
    %cst_215 = arith.constant dense<0.000000e+00> : vector<4x32xf32>
    %321 = tpu.matmul %320, %5, %cst_215 {dimension_numbers = #tpu.dot_dimension_numbers<[1], [0], [0], [1], [0, 0, 1, 1], [], []>} : vector<4x16xf32>, vector<16x32xf32>, vector<4x32xf32> -> vector<4x32xf32>
    %322 = arith.addf %319, %321 : vector<4x32xf32>
    %323 = vector.broadcast %1 : vector<4x1xf32> to vector<4x32xf32>
    %324 = arith.addf %322, %323 : vector<4x32xf32>
    %c0_216 = arith.constant 0 : index
    %c0_217 = arith.constant 0 : index
    %c27 = arith.constant 27 : index
    %c0_218 = arith.constant 0 : index
    %325 = vector.load %arg6[%c0_216, %c0_217, %c27, %c0_218] : memref<1x4x32x32xf32, #tpu.memory_space<vmem>>, vector<1x4x1x32xf32>
    %326 = vector.shape_cast %325 : vector<1x4x1x32xf32> to vector<4x32xf32>
    %327 = vector.shape_cast %324 : vector<4x32xf32> to vector<1x4x1x32xf32>
    tpu.vector_store %arg6[%c0_216, %c0_217, %c27, %c0_218], %327 {strides = array<i32>} : memref<1x4x32x32xf32, #tpu.memory_space<vmem>>, vector<1x4x1x32xf32>,
    %c0_219 = arith.constant 0 : index
    %c0_220 = arith.constant 0 : index
    %c14_221 = arith.constant 14 : index
    %c0_222 = arith.constant 0 : index
    %328 = vector.load %arg2[%c0_219, %c0_220, %c14_221, %c0_222] : memref<1x4x16x16xf32, #tpu.memory_space<vmem>>, vector<1x4x1x16xf32>
    %329 = vector.shape_cast %328 : vector<1x4x1x16xf32> to vector<4x16xf32>
    %cst_223 = arith.constant dense<0.000000e+00> : vector<16x16xf32>
    %330 = tpu.matmul %0, %329, %cst_223 {dimension_numbers = #tpu.dot_dimension_numbers<[1], [0], [0], [1], [0, 0, 1, 1], [], []>} : vector<16x4xf32>, vector<4x16xf32>, vector<16x16xf32> -> vector<16x16xf32>
    %331 = vector.extract_strided_slice %330 {offsets = [0, 0], sizes = [4, 16], strides = [1, 1]} : vector<16x16xf32> to vector<4x16xf32>
    %cst_224 = arith.constant dense<0.000000e+00> : vector<4x32xf32>
    %332 = tpu.matmul %331, %3, %cst_224 {dimension_numbers = #tpu.dot_dimension_numbers<[1], [0], [0], [1], [0, 0, 1, 1], [], []>} : vector<4x16xf32>, vector<16x32xf32>, vector<4x32xf32> -> vector<4x32xf32>
    %333 = vector.extract_strided_slice %330 {offsets = [4, 0], sizes = [4, 16], strides = [1, 1]} : vector<16x16xf32> to vector<4x16xf32>
    %cst_225 = arith.constant dense<0.000000e+00> : vector<4x32xf32>
    %334 = tpu.matmul %333, %5, %cst_225 {dimension_numbers = #tpu.dot_dimension_numbers<[1], [0], [0], [1], [0, 0, 1, 1], [], []>} : vector<4x16xf32>, vector<16x32xf32>, vector<4x32xf32> -> vector<4x32xf32>
    %335 = arith.addf %332, %334 : vector<4x32xf32>
    %336 = vector.broadcast %1 : vector<4x1xf32> to vector<4x32xf32>
    %337 = arith.addf %335, %336 : vector<4x32xf32>
    %c0_226 = arith.constant 0 : index
    %c0_227 = arith.constant 0 : index
    %c28 = arith.constant 28 : index
    %c0_228 = arith.constant 0 : index
    %338 = vector.load %arg6[%c0_226, %c0_227, %c28, %c0_228] : memref<1x4x32x32xf32, #tpu.memory_space<vmem>>, vector<1x4x1x32xf32>
    %339 = vector.shape_cast %338 : vector<1x4x1x32xf32> to vector<4x32xf32>
    %340 = vector.shape_cast %337 : vector<4x32xf32> to vector<1x4x1x32xf32>
    tpu.vector_store %arg6[%c0_226, %c0_227, %c28, %c0_228], %340 {strides = array<i32>} : memref<1x4x32x32xf32, #tpu.memory_space<vmem>>, vector<1x4x1x32xf32>,
    %341 = vector.extract_strided_slice %330 {offsets = [8, 0], sizes = [4, 16], strides = [1, 1]} : vector<16x16xf32> to vector<4x16xf32>
    %cst_229 = arith.constant dense<0.000000e+00> : vector<4x32xf32>
    %342 = tpu.matmul %341, %3, %cst_229 {dimension_numbers = #tpu.dot_dimension_numbers<[1], [0], [0], [1], [0, 0, 1, 1], [], []>} : vector<4x16xf32>, vector<16x32xf32>, vector<4x32xf32> -> vector<4x32xf32>
    %343 = vector.extract_strided_slice %330 {offsets = [12, 0], sizes = [4, 16], strides = [1, 1]} : vector<16x16xf32> to vector<4x16xf32>
    %cst_230 = arith.constant dense<0.000000e+00> : vector<4x32xf32>
    %344 = tpu.matmul %343, %5, %cst_230 {dimension_numbers = #tpu.dot_dimension_numbers<[1], [0], [0], [1], [0, 0, 1, 1], [], []>} : vector<4x16xf32>, vector<16x32xf32>, vector<4x32xf32> -> vector<4x32xf32>
    %345 = arith.addf %342, %344 : vector<4x32xf32>
    %346 = vector.broadcast %1 : vector<4x1xf32> to vector<4x32xf32>
    %347 = arith.addf %345, %346 : vector<4x32xf32>
    %c0_231 = arith.constant 0 : index
    %c0_232 = arith.constant 0 : index
    %c29 = arith.constant 29 : index
    %c0_233 = arith.constant 0 : index
    %348 = vector.load %arg6[%c0_231, %c0_232, %c29, %c0_233] : memref<1x4x32x32xf32, #tpu.memory_space<vmem>>, vector<1x4x1x32xf32>
    %349 = vector.shape_cast %348 : vector<1x4x1x32xf32> to vector<4x32xf32>
    %350 = vector.shape_cast %347 : vector<4x32xf32> to vector<1x4x1x32xf32>
    tpu.vector_store %arg6[%c0_231, %c0_232, %c29, %c0_233], %350 {strides = array<i32>} : memref<1x4x32x32xf32, #tpu.memory_space<vmem>>, vector<1x4x1x32xf32>,
    %c0_234 = arith.constant 0 : index
    %c0_235 = arith.constant 0 : index
    %c15_236 = arith.constant 15 : index
    %c0_237 = arith.constant 0 : index
    %351 = vector.load %arg2[%c0_234, %c0_235, %c15_236, %c0_237] : memref<1x4x16x16xf32, #tpu.memory_space<vmem>>, vector<1x4x1x16xf32>
    %352 = vector.shape_cast %351 : vector<1x4x1x16xf32> to vector<4x16xf32>
    %cst_238 = arith.constant dense<0.000000e+00> : vector<16x16xf32>
    %353 = tpu.matmul %0, %352, %cst_238 {dimension_numbers = #tpu.dot_dimension_numbers<[1], [0], [0], [1], [0, 0, 1, 1], [], []>} : vector<16x4xf32>, vector<4x16xf32>, vector<16x16xf32> -> vector<16x16xf32>
    %354 = vector.extract_strided_slice %353 {offsets = [0, 0], sizes = [4, 16], strides = [1, 1]} : vector<16x16xf32> to vector<4x16xf32>
    %cst_239 = arith.constant dense<0.000000e+00> : vector<4x32xf32>
    %355 = tpu.matmul %354, %3, %cst_239 {dimension_numbers = #tpu.dot_dimension_numbers<[1], [0], [0], [1], [0, 0, 1, 1], [], []>} : vector<4x16xf32>, vector<16x32xf32>, vector<4x32xf32> -> vector<4x32xf32>
    %356 = vector.extract_strided_slice %353 {offsets = [4, 0], sizes = [4, 16], strides = [1, 1]} : vector<16x16xf32> to vector<4x16xf32>
    %cst_240 = arith.constant dense<0.000000e+00> : vector<4x32xf32>
    %357 = tpu.matmul %356, %5, %cst_240 {dimension_numbers = #tpu.dot_dimension_numbers<[1], [0], [0], [1], [0, 0, 1, 1], [], []>} : vector<4x16xf32>, vector<16x32xf32>, vector<4x32xf32> -> vector<4x32xf32>
    %358 = arith.addf %355, %357 : vector<4x32xf32>
    %359 = vector.broadcast %1 : vector<4x1xf32> to vector<4x32xf32>
    %360 = arith.addf %358, %359 : vector<4x32xf32>
    %c0_241 = arith.constant 0 : index
    %c0_242 = arith.constant 0 : index
    %c30 = arith.constant 30 : index
    %c0_243 = arith.constant 0 : index
    %361 = vector.load %arg6[%c0_241, %c0_242, %c30, %c0_243] : memref<1x4x32x32xf32, #tpu.memory_space<vmem>>, vector<1x4x1x32xf32>
    %362 = vector.shape_cast %361 : vector<1x4x1x32xf32> to vector<4x32xf32>
    %363 = vector.shape_cast %360 : vector<4x32xf32> to vector<1x4x1x32xf32>
    tpu.vector_store %arg6[%c0_241, %c0_242, %c30, %c0_243], %363 {strides = array<i32>} : memref<1x4x32x32xf32, #tpu.memory_space<vmem>>, vector<1x4x1x32xf32>,
    %364 = vector.extract_strided_slice %353 {offsets = [8, 0], sizes = [4, 16], strides = [1, 1]} : vector<16x16xf32> to vector<4x16xf32>
    %cst_244 = arith.constant dense<0.000000e+00> : vector<4x32xf32>
    %365 = tpu.matmul %364, %3, %cst_244 {dimension_numbers = #tpu.dot_dimension_numbers<[1], [0], [0], [1], [0, 0, 1, 1], [], []>} : vector<4x16xf32>, vector<16x32xf32>, vector<4x32xf32> -> vector<4x32xf32>
    %366 = vector.extract_strided_slice %353 {offsets = [12, 0], sizes = [4, 16], strides = [1, 1]} : vector<16x16xf32> to vector<4x16xf32>
    %cst_245 = arith.constant dense<0.000000e+00> : vector<4x32xf32>
    %367 = tpu.matmul %366, %5, %cst_245 {dimension_numbers = #tpu.dot_dimension_numbers<[1], [0], [0], [1], [0, 0, 1, 1], [], []>} : vector<4x16xf32>, vector<16x32xf32>, vector<4x32xf32> -> vector<4x32xf32>
    %368 = arith.addf %365, %367 : vector<4x32xf32>
    %369 = vector.broadcast %1 : vector<4x1xf32> to vector<4x32xf32>
    %370 = arith.addf %368, %369 : vector<4x32xf32>
    %c0_246 = arith.constant 0 : index
    %c0_247 = arith.constant 0 : index
    %c31 = arith.constant 31 : index
    %c0_248 = arith.constant 0 : index
    %371 = vector.load %arg6[%c0_246, %c0_247, %c31, %c0_248] : memref<1x4x32x32xf32, #tpu.memory_space<vmem>>, vector<1x4x1x32xf32>
    %372 = vector.shape_cast %371 : vector<1x4x1x32xf32> to vector<4x32xf32>
    %373 = vector.shape_cast %370 : vector<4x32xf32> to vector<1x4x1x32xf32>
    tpu.vector_store %arg6[%c0_246, %c0_247, %c31, %c0_248], %373 {strides = array<i32>} : memref<1x4x32x32xf32, #tpu.memory_space<vmem>>, vector<1x4x1x32xf32>,
    return
  }
  func.func @transform_0(%arg0: i32, %arg1: i32) -> (i32, i32, i32, i32) {
    %c0_i32 = arith.constant 0 : i32
    %c0_i32_0 = arith.constant 0 : i32
    %c0_i32_1 = arith.constant 0 : i32
    return %arg0, %c0_i32, %arg1, %c0_i32_0 : i32, i32, i32, i32
  }
  func.func @transform_1(%arg0: i32, %arg1: i32) -> (i32, i32) {
    %c0_i32 = arith.constant 0 : i32
    %c0_i32_0 = arith.constant 0 : i32
    %c0_i32_1 = arith.constant 0 : i32
    return %c0_i32, %c0_i32_0 : i32, i32
  }
  func.func @transform_2(%arg0: i32, %arg1: i32) -> (i32, i32, i32) {
    %c0_i32 = arith.constant 0 : i32
    %c0_i32_0 = arith.constant 0 : i32
    %c0_i32_1 = arith.constant 0 : i32
    %c0_i32_2 = arith.constant 0 : i32
    return %c0_i32, %c0_i32_0, %c0_i32_1 : i32, i32, i32
  }
  func.func @transform_3(%arg0: i32, %arg1: i32) -> (i32, i32) {
    %c0_i32 = arith.constant 0 : i32
    %c0_i32_0 = arith.constant 0 : i32
    %c0_i32_1 = arith.constant 0 : i32
    return %c0_i32, %c0_i32_0 : i32, i32
  }
  func.func @transform_4(%arg0: i32, %arg1: i32) -> (i32, i32, i32, i32) {
    %c0_i32 = arith.constant 0 : i32
    %c0_i32_0 = arith.constant 0 : i32
    %c0_i32_1 = arith.constant 0 : i32
    return %arg0, %c0_i32, %arg1, %c0_i32_0 : i32, i32, i32, i32
  }
}

</mosaic_0001>

<bundles_post_ra>
// kernel: tpu_custom_call.1
= control target key start
LH: loop header
LB: loop body
LE: loop exit
PB: predicated region body
PF: predicated region fallthrough
CT: control target
= control target key end

     0   :  { %9 = vsyncpa [#allocation3], 0  ;;  %s10032_s0 = inlined_call_operand.hbm [shape: f32[2,4,16,16], index: 0, kind: input, shape index: {}]   ;;  %s10033_s1 = inlined_call_operand.vmem [shape: f32[16,4], index: 1, kind: input, shape index: {}]   ;;  %s10034_s2 = inlined_call_operand.vmem [shape: f32[2,16,32], index: 2, kind: input, shape index: {}]   ;;  %s10035_s3 = inlined_call_operand.vmem [shape: f32[4,1], index: 3, kind: input, shape index: {}]   ;;  %s10036_s4 = inlined_call_operand.hbm [shape: f32[2,4,32,32], index: 4, kind: output, shape index: {}]  }
   0x1   :  { %11 = vsyncpa [#allocation3 + $0x1], 0 }
   0x2   :  { %12 = vsyncpa [#allocation4], 0 }
   0x3   :  { %14 = vsyncpa [#allocation4 + $0x1], 0  ;;  %s8896_s15 = smov 0   ;;  %s8898_s16 = smov 0  }
   0x4   :  { %s8900_s17 = smov 0   ;;  %s8902_s18 = smov 0  }
   0x5   :  { %s8904_s19 = smov 0   ;;  %s8906_s20 = smov 0  }
   0x6 LB: > { %s7581_s21 = sadd.s32 4294967295, %s8858_s20   ;;  %s7582_s22 = sadd.s32 4294967294, %s8858_s20   ;;  %s8858_s20 = sphi %s8906_s20, %s20_s20   ;;  %s8854_s19 = sphi %s8904_s19, %s10051_s19   ;;  %s8850_s18 = sphi %s8902_s18, %s10050_s18   ;;  %s8846_s17 = sphi %s8900_s17, %s10049_s17   ;;  %s8842_s16 = sphi %s8898_s16, %s10048_s16   ;;  %s8838_s15 = sphi %s8896_s15, %s10047_s15  }
   0x7   : > { %s32_s23 = sadd.s32 1, %s8854_s19  ;;  %s41_s24 = sadd.s32 1, %s8846_s17 }
   0x8   : > { %p34_p0 = scmp.ge.s32.totalorder %s32_s23, 2  ;;  %p48_p1 = scmp.ne.s32.totalorder %s8846_s17, %s8842_s16 }
   0x9   : > { %p49_p2 = scmp.eq.s32.totalorder %s8858_s20, 0  ;;  %p54_p3 = scmp.ne.s32.totalorder %s8842_s16, %s8838_s15 }
   0xa   : > { %s10053_s23 = smov (%p34_p0, %s32_s23), 0  ;;  %p55_p5 = scmp.eq.s32.totalorder %s7581_s21, 0 }
   0xb   : > { %p8937_p4 = por %p49_p2, %p48_p1  ;;  %s36_s26 = ssub.s32 %s8854_s19, %s10053_s23 }
   0xc   : > { %p143_p6 = scmp.eq.s32.totalorder %s7581_s21, 1  ;;  %p39_p7 = scmp.eq.s32.totalorder %s36_s26, 0 }
   0xd   : > { %p8943_p8 = por %p55_p5, %p54_p3  ;;  %p149_p10 = scmp.eq.s32.totalorder %s7582_s22, 1 }
   0xe   : > { %p8947_p9 = por %p143_p6, %p48_p1  ;;  %p8684_p13 = scmp.lt.s32.totalorder %s8858_s20, 2 }
   0xf   : > { %s8952_s29 = scalar_select %p39_p7, %s8846_s17, %s41_s24  }
  0x10   : > { %s10040_s28 = scalar_select %p8947_p9, 1, 0 }
  0x11   : > { %p8954_p11 = por %p149_p10, %p54_p3  ;;  %s178_s5 = sand.u32 1, %s8846_s17  }
  0x12   : > { %s7585_s6 = sshll.u32 %s178_s5, 6  ;;  %s7710_s7 = sshll.u32 %s8854_s19, 10 }
  0x13   : > { %s10041_s30 = scalar_select %p8954_p11, 1, 0 }
  0x14   : > { %s8965_s10 = scalar_lea.hbm %s10032_s0, %s7710_s7  ;;  %s182_s11 = scalar_lea.vmem [#allocation2], %s7585_s6 }
  0x15   : > { %s191_s12 = sshll.u32 %s182_s11, 4  ;;  %p8971_p0 = pnand %p8684_p13, %p8937_p4  ;;  %s8967_s12 = int_to_ptr.vmem [resolvable:$true] %s191_s12 }
  0x16   : > { %s8976_s14 = scalar_lea.sflag [#allocation3], %s178_s5  ;;  %s8746_s21 = scalar_lea.hbm %s8965_s10, 1024 }
  0x17   : > { %p8747_p2 = scmp.ne.s32.totalorder %s8965_s10, %s8746_s21  ;;  %p8748_p3 = pneg %p8971_p0 }
  0x18   : > { %s8751_s25 = scalar_lea.hbm %s10032_s0, 2048  ;;  %p8752_p4 = scmp.lt.u32.totalorder %s8965_s10, %s10032_s0 }
  0x19   : > { %p8749_p5 = pnand %p8748_p3, %p8747_p2  ;;  %p8753_p7 = scmp.lt.u32.totalorder %s8751_s25, %s8746_s21 }
  0x1a   : > { %p8755_p13 = scmp.lt.u32.totalorder %s8746_s21, %s8965_s10 }
  0x1b   : > { %p8750_p6 = pneg %p8749_p5  ;;  %p8754_p10 = por %p8753_p7, %p8752_p4 }
  0x1d   : > { %p8756_p12 = por %p8755_p13, %p8754_p10 }
  0x1f   : > { %p8757_p1 = pnand %p8756_p12, %p8750_p6 }
  0x21   : > { %8760 = shalt.err (!%p8757_p1)
}
  0x22   : > { %s8761_s5 = scalar_lea.vmem %s8967_s12, 1024  ;;  %s8860_s7 = smov [#allocation2]  }
  0x23   : > { %p8762_p2 = scmp.ne.s32.totalorder %s8967_s12, %s8761_s5  ;;  %s8766_s8 = sshll.u32 %s8860_s7, 4  ;;  %s8767_s8 = int_to_ptr.vmem [resolvable:$false] %s8766_s8 }
  0x24   : > { %s8768_s9 = scalar_lea.vmem %s8767_s8, 2048  ;;  %p8769_p9 = scmp.lt.s32.totalorder %s8967_s12, %s8767_s8 }
  0x25   : > { %p8764_p5 = pnand %p8762_p2, %p8748_p3  ;;  %p8770_p4 = scmp.lt.s32.totalorder %s8768_s9, %s8761_s5 }
  0x27   : > { %p8765_p11 = pneg %p8764_p5  ;;  %p8771_p7 = por %p8770_p4, %p8769_p9 }
  0x29   : > { %p8772_p10 = pnand %p8771_p7, %p8765_p11 }
  0x2b   : > { %8775 = shalt.err (!%p8772_p10)
}
  0x2c   : > { %s8861_s11 = smov 128   ;;  %s8862_s21 = smov 8  }
  0x2d   : > { %8679 = dma.hbm_to_vmem [thread:$0]  (!%p8971_p0), %s8965_s10, 1024, %s8967_s12, %s8976_s14, %s8861_s11, %s8861_s11, %s8862_s21  }
  0x2e   : > { %p199_p12 = scmp.lt.s32.totalorder %s8858_s20, 3  ;;  %p10043_p1 = scmp.ge.s32.totalorder %s8858_s20, 1 }
  0x30   : > { %p200_p3 = pnand %p10043_p1, %p199_p12 }
  0x31   : > { %s9008_s22 = sand.u32 (!%p200_p3), 1, %s8842_s16  }
  0x32   : > { %203 = sbr.rel (%p200_p3) target bundleno = 3870 (0xf1e), region = 36  ;;  %s7589_s24 = sshll.u32 (!%p200_p3), %s9008_s22, 6 }
  0x33   : > { %s206_s25 = scalar_lea.sflag (!%p200_p3), [#allocation3], %s9008_s22  ;;  %s9012_s26 = scalar_lea.vmem (!%p200_p3), [#allocation2], %s7589_s24 }
  0x39   : > { %8829 = dma.done.wait (%p8943_p8), %s206_s25, 1024  }
  0x3a   : > { %8831 = vsyncadd (%p8943_p8), %s206_s25, 4294966272  ;;  %v8863_v0 = vmov 0.0|0.0   ;;  %vm253_vm0 = vcmask 1041409   ;;  %vm261_vm1 = vcmask 31744   ;;  %v244_v1 = vld [vmem:[%s9012_s26] sm:$0x1]  ;;  %v503_v38 = vlaneseq }
  0x3b   : > { %8480 = vmatprep.subr.bf16.mxu1 %v8863_v0  ;;  %v245_v2 = vld [vmem:[%s9012_s26 + $0x10] sm:$0x1]  ;;  %v246_v3 = vld [vmem:[%s9012_s26 + $0x20] sm:$0x1]  ;;  %vm256_vm2 = vcmask 1042434   ;;  %vm259_vm3 = vcmask 1043459  }
  0x3c   : > { %v247_v4 = vld [vmem:[%s9012_s26 + $0x30] sm:$0x1]  ;;  %v252_v5 = vrot.slane %v245_v2, 7  ;;  %v255_v6 = vrot.slane %v246_v3, 6  ;;  %v9026_v7 = vld [vmem:[%s10033_s1] sm:$0xff]  ;;  %v240_v10 = vld [vmem:[%s10034_s2 + $0x8] sm:$0xff] }
  0x3d   : > { %v258_v8 = vrot.slane %v247_v4, 5  ;;  %7954 = vmatprep.mubr.msk.f32.mxu0 %vm261_vm1, %v9026_v7  ;;  %v239_v9 = vld [vmem:[%s10034_s2] sm:$0xff]  ;;  %vm268_vm4 = vcmask 1043456   ;;  %v9042_v14 = vld [vmem:[%s10033_s1 + $0x8] sm:$0xff]  ;;  %v7591_v16 = vld [vmem:[%s10034_s2 + $0x10] sm:$0xff]  ;;  %vm8864_vm5 = vmmov 0  }
  0x3e   : > { %v254_v11 = vsel %vm253_vm0, %v252_v5, %v244_v1  ;;  %v9044_v15 = vpack.c.bf16 %v240_v10, %v239_v9  ;;  %v7592_v17 = vld [vmem:[%s10034_s2 + $0x18] sm:$0xff]  ;;  %v8865_v19 = vmov 0.0   ;;  %v238_v20 = vld [vmem:[%s10035_s3] sm:$0xf]  ;;  %v8866_v21 = vmov 0   ;;  %s7590_s10 = sshll.u32 %s9008_s22, 7 }
  0x3f   : > { %v257_v12 = vsel %vm256_vm2, %v255_v6, %v254_v11  ;;  %v9059_v18 = vpack.c.bf16 %v7592_v17, %v7591_v16  ;;  %7961 = vmatprep.mubr.msk.f32.mxu1 %vm8864_vm5, %v8865_v19  ;;  %8743 = vset.pattern.permute.xlu0 %v8866_v21  ;;  %v714_v22 = vld [vmem:[%s9012_s26 + $0x11] sm:$0x1]  ;;  %v715_v23 = vld [vmem:[%s9012_s26 + $0x21] sm:$0x1]  ;;  %vm348_vm6 = vcmask 130048   ;;  %v504_v40 = vshrl.u32 %v503_v38, 7 }
  0x40   : > { %v260_v13 = vsel %vm259_vm3, %v258_v8, %v257_v12  ;;  %495 = vperm.xlu0 %8743, %v238_v20   ;;  %v721_v24 = vrot.slane %v714_v22, 7  ;;  %v713_v25 = vld [vmem:[%s9012_s26 + $0x1] sm:$0x1]  ;;  %v716_v26 = vld [vmem:[%s9012_s26 + $0x31] sm:$0x1]  ;;  %v723_v27 = vrot.slane %v715_v23, 6 }
  0x41   : > { %7952 = vmatprep.subr.msk.mxu0 %vm268_vm4, %v260_v13  ;;  %8482 = vmatpush3.bf16.msra.mxu1 %v9059_v18  ;;  %v725_v29 = vrot.slane %v716_v26, 5  ;;  %v8867_v36 = vmov 1966171168   ;;  %v1165_v41 = vld [vmem:[%s9012_s26 + $0x12] sm:$0x1]  ;;  %vm528_vm7 = vcmask 253952  }
  0x42   : > { %7953 = vmatpush3.msk.msra.mxu0 %vm268_vm4, %v260_v13  ;;  %8486 = vmatprep.subr.bf16.mxu1 %v8863_v0  ;;  %v722_v28 = vsel %vm253_vm0, %v721_v24, %v713_v25  ;;  %v501_v37 = vunpack.c.l.s4 %v8867_v36  ;;  %v1166_v46 = vld [vmem:[%s9012_s26 + $0x22] sm:$0x1]  ;;  %v1172_v47 = vrot.slane %v1165_v41, 7  ;;  %v1167_v55 = vld [vmem:[%s9012_s26 + $0x32] sm:$0x1]  ;;  %s9119_s12 = scalar_lea.vmem [#allocation5], %s7590_s10 }
  0x43   : > { %7955 = vmatmul.mubr.msk.f32.vlgmr.msra.gmra.mrb[0].mxu0 %vm261_vm1, %v9042_v14  ;;  %8483 = vmatprep.subr.bf16.mxu0 %v8863_v0  ;;  %v724_v31 = vsel %vm256_vm2, %v723_v27, %v722_v28  ;;  %v1164_v51 = vld [vmem:[%s9012_s26 + $0x2] sm:$0x1]  ;;  %v1174_v56 = vrot.slane %v1166_v46, 6  ;;  %v1176_v62 = vrot.slane %v1167_v55, 5  ;;  %v1616_v23 = vld [vmem:[%s9012_s26 + $0x13] sm:$0x1] }
  0x44   : > { %8485 = vmatpush3.bf16.msra.mxu0 %v9044_v15  ;;  %7968 = vmatprep.mubr.msk.f32.mxu0 %vm8864_vm5, %v8865_v19  ;;  %v726_v34 = vsel %vm259_vm3, %v725_v29, %v724_v31  ;;  %v502_v39 = vunpack.c.0.s8 %v501_v37  ;;  %v1173_v58 = vsel %vm253_vm0, %v1172_v47, %v1164_v51  ;;  %v1617_v27 = vld [vmem:[%s9012_s26 + $0x23] sm:$0x1]  ;;  %v1623_v28 = vrot.slane %v1616_v23, 7  ;;  %s7494_s5 = sshll.u32 %s9119_s12, 4  ;;  %p10044_p9 = scmp.ne.s32.totalorder %s10040_s28, 0  ;;  %s9977_s5 = int_to_ptr.vmem [resolvable:$true] %s7494_s5 }
  0x45   : > { %8489 = vmatprep.subr.bf16.mxu0 %v8863_v0  ;;  %v1175_v3 = vsel %vm256_vm2, %v1174_v56, %v1173_v58  ;;  %v1615_v31 = vld [vmem:[%s9012_s26 + $0x3] sm:$0x1]  ;;  %v1625_v36 = vrot.slane %v1617_v27, 6  ;;  %s8776_s11 = scalar_lea.vmem %s9977_s5, 2048  ;;  %s8868_s21 = smov [#allocation5]  }
  0x46   : > { %v9107_v50 = vsub.s32 %v502_v39, %v504_v40  ;;  %v1177_v11 = vsel %vm259_vm3, %v1176_v62, %v1175_v3  ;;  %v1624_v38 = vsel %vm253_vm0, %v1623_v28, %v1615_v31  ;;  %p8777_p8 = scmp.ne.s32.totalorder %s9977_s5, %s8776_s11  ;;  %s8780_s24 = sshll.u32 %s8868_s21, 4  ;;  %s8781_s24 = int_to_ptr.vmem [resolvable:$false] %s8780_s24 }
  0x47   : > { %v1626_v47 = vsel %vm256_vm2, %v1625_v36, %v1624_v38  ;;  %s8782_s25 = scalar_lea.vmem %s8781_s24, 4096  ;;  %p8783_p6 = scmp.lt.s32.totalorder %s9977_s5, %s8781_s24 }
  0x48   : > { %p8778_p11 = pnand %p8777_p8, %p10044_p9  ;;  %p8784_p13 = scmp.lt.s32.totalorder %s8782_s25, %s8776_s11 }
  0x4a   : > { %p8779_p0 = pneg %p8778_p11  ;;  %p8785_p2 = por %p8784_p13, %p8783_p6 }
  0x4c   : > { %p8786_p5 = pnand %p8785_p2, %p8779_p0 }
  0xbf   : > { %v9104_v45 = vpop.permute.xlu0 %495 }
 0x116   : > { %v7956_v30 = vpop.f32.mrb[0].mxu0 }
 0x117   : > { %v337_v32 = vpop.f32.mrb[1].mxu0  ;;  %v534_v35 = vrot.slane %v7956_v30, 4 }
 0x118   : > { %v347_v33 = vrot.slane %v337_v32, 4  ;;  %7969 = vmatmul.mubr.msk.f32.vlgmr.msra.gmra.mrb[2].mxu0 %vm348_vm6, %v337_v32 }
 0x119   : > { %8491 = vmatpush3.bf16.msra.mxu0 %v9044_v15  ;;  %7982 = vmatprep.mubr.msk.f32.mxu0 %vm8864_vm5, %v8865_v19 }
 0x11a   : > { %7962 = vmatmul.mubr.msk.f32.vlgmr.msra.gmra.mrb[0].mxu1 %vm348_vm6, %v347_v33  ;;  %8492 = vmatprep.subr.bf16.mxu0 %v8863_v0 }
 0x11b   : > { %8488 = vmatpush3.bf16.msra.mxu1 %v9059_v18  ;;  %7975 = vmatprep.mubr.msk.f32.mxu1 %vm8864_vm5, %v8865_v19 }
 0x11c   : > { %7983 = vmatmul.mubr.msk.f32.vlgmr.msra.gmra.mrb[4].mxu0 %vm348_vm6, %v7956_v30  ;;  %7985 = vmatprep.subr.msk.mxu1 %vm268_vm4, %v726_v34 }
 0x11d   : > { %8494 = vmatpush3.bf16.msra.mxu0 %v9059_v18  ;;  %7994 = vmatprep.mubr.msk.f32.mxu0 %vm8864_vm5, %v8865_v19 }
 0x11e   : > { %7976 = vmatmul.mubr.msk.f32.vlgmr.msra.gmra.mrb[2].mxu1 %vm348_vm6, %v534_v35  ;;  %8498 = vmatprep.subr.bf16.mxu0 %v8863_v0  ;;  %v1618_v35 = vld [vmem:[%s9012_s26 + $0x33] sm:$0x1] }
 0x11f   : > { %7986 = vmatpush3.msk.msra.mxu1 %vm268_vm4, %v726_v34  ;;  %7987 = vmatprep.mubr.msk.f32.mxu1 %vm261_vm1, %v9026_v7 }
 0x120   : > { %8495 = vmatprep.subr.bf16.mxu1 %v8863_v0 }
 0x122   : > { %7988 = vmatmul.mubr.msk.f32.vlgmr.msra.gmra.mrb[4].mxu1 %vm261_vm1, %v9042_v14 }
 0x123   : > { %8497 = vmatpush3.bf16.msra.mxu1 %v9044_v15  ;;  %8001 = vmatprep.mubr.msk.f32.mxu1 %vm8864_vm5, %v8865_v19 }
 0x124   : > { %8501 = vmatprep.subr.bf16.mxu1 %v8863_v0 }
 0x1eb   : > { %v489_v42 = vpop.f32.mrb[2].mxu0 }
 0x1ec   : > { %v7970_v43 = vpop.f32.mrb[3].mxu0 }
 0x1ed   : > { %v417_v44 = vpop.f32.mrb[0].mxu1 }
 0x1ee   : > { %v490_v48 = vadd.f32 %v489_v42, %v417_v44  ;;  %v7963_v49 = vpop.f32.mrb[1].mxu1  ;;  %v1627_v42 = vrot.slane %v1618_v35, 5 }
 0x1ef   : > { %v675_v52 = vpop.f32.mrb[4].mxu0 }
 0x1f0   : > { %v498_v53 = vadd.f32 %v9104_v45, %v490_v48  ;;  %v7984_v54 = vpop.f32.mrb[5].mxu0  ;;  %v1628_v55 = vsel %vm259_vm3, %v1627_v42, %v1626_v47 }
 0x1f1   : > { %v603_v57 = vpop.f32.mrb[2].mxu1 }
 0x1f2   : > { %v506_v59 = vrot.slane %v498_v53, %v9107_v50  ;;  %v676_v60 = vadd.f32 %v675_v52, %v603_v57  ;;  %v7977_v61 = vpop.f32.mrb[3].mxu1 }
 0x1f4   : > { %v507_v63 = vcombine.high %v506_v59, %v506_v59  ;;  %v514_v1 = vrot.slane %v506_v59, %v9107_v50  ;;  %v679_v2 = vadd.f32 %v676_v60, %v9104_v45 }
 0x1f5   : > { %v7989_v4 = vpop.f32.mrb[4].mxu1 }
 0x1f6   : > { %v521_v5 = vrot.slane %v507_v63, %v9107_v50  ;;  %v522_v6 = vcombine.high %v514_v1, %v514_v1  ;;  %529 = vst.msk [vmem:[%s9119_s12] sm:$0x1] %vm528_vm7, %v514_v1  ;;  %v687_v8 = vrot.slane %v679_v2, %v9107_v50  ;;  %v795_v9 = vpop.f32.mrb[5].mxu1  ;;  %v985_v21 = vrot.slane %v7989_v4, 4  ;;  %v2067_v63 = vld [vmem:[%s9012_s26 + $0x14] sm:$0x1] }
 0x1f7   : > { %v805_v10 = vrot.slane %v795_v9, 4  ;;  %8002 = vmatmul.mubr.msk.f32.vlgmr.msra.gmra.mrb[6].mxu1 %vm348_vm6, %v795_v9  ;;  %v2066_v9 = vld [vmem:[%s9012_s26 + $0x4] sm:$0x1] }
 0x1f8   : > { %v523_v12 = vcombine.high %v521_v5, %v521_v5  ;;  %530 = vst.msk [vmem:[%s9119_s12 + $0x20] sm:$0x1] %vm528_vm7, %v521_v5  ;;  %531 = vst.msk [vmem:[%s9119_s12 + $0x40] sm:$0x1] %vm528_vm7, %v522_v6  ;;  %v688_v13 = vcombine.high %v687_v8, %v687_v8  ;;  %v695_v16 = vrot.slane %v687_v8, %v9107_v50  ;;  %8503 = vmatpush3.bf16.msra.mxu1 %v9044_v15 }
 0x1f9   : > { %8015 = vmatprep.mubr.msk.f32.mxu1 %vm8864_vm5, %v8865_v19  ;;  %7995 = vmatmul.mubr.msk.f32.vlgmr.msra.gmra.mrb[6].mxu0 %vm348_vm6, %v805_v10  ;;  %v2074_v5 = vrot.slane %v2067_v63, 7 }
 0x1fa   : > { %8504 = vmatprep.subr.bf16.mxu1 %v8863_v0  ;;  %532 = vst.msk [vmem:[%s9119_s12 + $0x60] sm:$0x1] %vm528_vm7, %v523_v12  ;;  %v702_v17 = vrot.slane %v688_v13, %v9107_v50  ;;  %v703_v20 = vcombine.high %v695_v16, %v695_v16  ;;  %709 = vst.msk [vmem:[%s9119_s12 + $0x1] sm:$0x1] %vm528_vm7, %v695_v16  ;;  %8500 = vmatpush3.bf16.msra.mxu0 %v9059_v18  ;;  %v2069_v13 = vld [vmem:[%s9012_s26 + $0x34] sm:$0x1] }
 0x1fb   : > { %8008 = vmatprep.mubr.msk.f32.mxu0 %vm8864_vm5, %v8865_v19  ;;  %8016 = vmatmul.mubr.msk.f32.vlgmr.msra.gmra.mrb[8].mxu1 %vm348_vm6, %v7989_v4  ;;  %v2068_v4 = vld [vmem:[%s9012_s26 + $0x24] sm:$0x1] }
 0x1fc   : > { %8018 = vmatprep.subr.msk.mxu0 %vm268_vm4, %v1177_v11  ;;  %v704_v22 = vcombine.high %v702_v17, %v702_v17  ;;  %710 = vst.msk [vmem:[%s9119_s12 + $0x21] sm:$0x1] %vm528_vm7, %v702_v17  ;;  %711 = vst.msk [vmem:[%s9119_s12 + $0x41] sm:$0x1] %vm528_vm7, %v703_v20  ;;  %8506 = vmatpush3.bf16.msra.mxu1 %v9059_v18  ;;  %v2076_v16 = vrot.slane %v2068_v4, 6  ;;  %v2075_v20 = vsel %vm253_vm0, %v2074_v5, %v2066_v9 }
 0x1fd   : > { %8027 = vmatprep.mubr.msk.f32.mxu1 %vm8864_vm5, %v8865_v19  ;;  %8009 = vmatmul.mubr.msk.f32.vlgmr.msra.gmra.mrb[8].mxu0 %vm348_vm6, %v985_v21 }
 0x1fe   : > { %8510 = vmatprep.subr.bf16.mxu1 %v8863_v0  ;;  %712 = vst.msk [vmem:[%s9119_s12 + $0x61] sm:$0x1] %vm528_vm7, %v704_v22  ;;  %8019 = vmatpush3.msk.msra.mxu0 %vm268_vm4, %v1177_v11  ;;  %v2077_v28 = vsel %vm256_vm2, %v2076_v16, %v2075_v20 }
 0x1ff   : > { %8020 = vmatprep.mubr.msk.f32.mxu0 %vm261_vm1, %v9026_v7  ;;  %8507 = vmatprep.subr.bf16.mxu0 %v8863_v0 }
 0x201   : > { %8021 = vmatmul.mubr.msk.f32.vlgmr.msra.gmra.mrb[10].mxu0 %vm261_vm1, %v9042_v14 }
 0x202   : > { %8509 = vmatpush3.bf16.msra.mxu0 %v9044_v15  ;;  %8034 = vmatprep.mubr.msk.f32.mxu0 %vm8864_vm5, %v8865_v19 }
 0x203   : > { %8513 = vmatprep.subr.bf16.mxu0 %v8863_v0 }
 0x2ca   : > { %v946_v24 = vpop.f32.mrb[6].mxu1 }
 0x2cb   : > { %v8003_v25 = vpop.f32.mrb[7].mxu1 }
 0x2cc   : > { %v874_v26 = vpop.f32.mrb[6].mxu0 }
 0x2cd   : > { %v947_v29 = vadd.f32 %v946_v24, %v874_v26  ;;  %v7996_v30 = vpop.f32.mrb[7].mxu0  ;;  %v2078_v24 = vrot.slane %v2069_v13, 5 }
 0x2ce   : > { %v1126_v32 = vpop.f32.mrb[8].mxu1 }
 0x2cf   : > { %v950_v33 = vadd.f32 %v947_v29, %v9104_v45  ;;  %v8017_v34 = vpop.f32.mrb[9].mxu1  ;;  %v2079_v35 = vsel %vm259_vm3, %v2078_v24, %v2077_v28 }
 0x2d0   : > { %v1054_v37 = vpop.f32.mrb[8].mxu0 }
 0x2d1   : > { %v958_v39 = vrot.slane %v950_v33, %v9107_v50  ;;  %v1127_v40 = vadd.f32 %v1126_v32, %v1054_v37  ;;  %v8010_v41 = vpop.f32.mrb[9].mxu0 }
 0x2d3   : > { %v959_v43 = vcombine.high %v958_v39, %v958_v39  ;;  %v966_v44 = vrot.slane %v958_v39, %v9107_v50  ;;  %v1130_v46 = vadd.f32 %v1127_v40, %v9104_v45 }
 0x2d4   : > { %v8022_v48 = vpop.f32.mrb[10].mxu0 }
 0x2d5   : > { %v973_v49 = vrot.slane %v959_v43, %v9107_v50  ;;  %v974_v51 = vcombine.high %v966_v44, %v966_v44  ;;  %980 = vst.msk [vmem:[%s9119_s12 + $0x2] sm:$0x1] %vm528_vm7, %v966_v44  ;;  %v1138_v52 = vrot.slane %v1130_v46, %v9107_v50  ;;  %v1246_v53 = vpop.f32.mrb[11].mxu0  ;;  %v1436_v61 = vrot.slane %v8022_v48, 4  ;;  %v2518_v43 = vld [vmem:[%s9012_s26 + $0x15] sm:$0x1] }
 0x2d6   : > { %v1256_v54 = vrot.slane %v1246_v53, 4  ;;  %8035 = vmatmul.mubr.msk.f32.vlgmr.msra.gmra.mrb[12].mxu0 %vm348_vm6, %v1246_v53  ;;  %v2517_v53 = vld [vmem:[%s9012_s26 + $0x5] sm:$0x1] }
 0x2d7   : > { %v975_v56 = vcombine.high %v973_v49, %v973_v49  ;;  %981 = vst.msk [vmem:[%s9119_s12 + $0x22] sm:$0x1] %vm528_vm7, %v973_v49  ;;  %982 = vst.msk [vmem:[%s9119_s12 + $0x42] sm:$0x1] %vm528_vm7, %v974_v51  ;;  %v1139_v57 = vcombine.high %v1138_v52, %v1138_v52  ;;  %v1146_v58 = vrot.slane %v1138_v52, %v9107_v50  ;;  %8515 = vmatpush3.bf16.msra.mxu0 %v9044_v15 }
 0x2d8   : > { %8048 = vmatprep.mubr.msk.f32.mxu0 %vm8864_vm5, %v8865_v19  ;;  %8028 = vmatmul.mubr.msk.f32.vlgmr.msra.gmra.mrb[10].mxu1 %vm348_vm6, %v1256_v54  ;;  %v2525_v49 = vrot.slane %v2518_v43, 7 }
 0x2d9   : > { %8516 = vmatprep.subr.bf16.mxu0 %v8863_v0  ;;  %983 = vst.msk [vmem:[%s9119_s12 + $0x62] sm:$0x1] %vm528_vm7, %v975_v56  ;;  %v1153_v59 = vrot.slane %v1139_v57, %v9107_v50  ;;  %v1154_v60 = vcombine.high %v1146_v58, %v1146_v58  ;;  %1160 = vst.msk [vmem:[%s9119_s12 + $0x3] sm:$0x1] %vm528_vm7, %v1146_v58  ;;  %8512 = vmatpush3.bf16.msra.mxu1 %v9059_v18  ;;  %v2520_v57 = vld [vmem:[%s9012_s26 + $0x35] sm:$0x1] }
 0x2da   : > { %8041 = vmatprep.mubr.msk.f32.mxu1 %vm8864_vm5, %v8865_v19  ;;  %8049 = vmatmul.mubr.msk.f32.vlgmr.msra.gmra.mrb[14].mxu0 %vm348_vm6, %v8022_v48  ;;  %v2519_v48 = vld [vmem:[%s9012_s26 + $0x25] sm:$0x1] }
 0x2db   : > { %8051 = vmatprep.subr.msk.mxu1 %vm268_vm4, %v1628_v55  ;;  %v1155_v62 = vcombine.high %v1153_v59, %v1153_v59  ;;  %1161 = vst.msk [vmem:[%s9119_s12 + $0x23] sm:$0x1] %vm528_vm7, %v1153_v59  ;;  %1162 = vst.msk [vmem:[%s9119_s12 + $0x43] sm:$0x1] %vm528_vm7, %v1154_v60  ;;  %8518 = vmatpush3.bf16.msra.mxu0 %v9059_v18  ;;  %v2527_v58 = vrot.slane %v2519_v48, 6  ;;  %v2526_v60 = vsel %vm253_vm0, %v2525_v49, %v2517_v53 }
 0x2dc   : > { %8060 = vmatprep.mubr.msk.f32.mxu0 %vm8864_vm5, %v8865_v19  ;;  %8042 = vmatmul.mubr.msk.f32.vlgmr.msra.gmra.mrb[12].mxu1 %vm348_vm6, %v1436_v61 }
 0x2dd   : > { %8522 = vmatprep.subr.bf16.mxu0 %v8863_v0  ;;  %1163 = vst.msk [vmem:[%s9119_s12 + $0x63] sm:$0x1] %vm528_vm7, %v1155_v62  ;;  %8052 = vmatpush3.msk.msra.mxu1 %vm268_vm4, %v1628_v55  ;;  %v2528_v5 = vsel %vm256_vm2, %v2527_v58, %v2526_v60 }
 0x2de   : > { %8053 = vmatprep.mubr.msk.f32.mxu1 %vm261_vm1, %v9026_v7  ;;  %8519 = vmatprep.subr.bf16.mxu1 %v8863_v0 }
 0x2e0   : > { %8054 = vmatmul.mubr.msk.f32.vlgmr.msra.gmra.mrb[14].mxu1 %vm261_vm1, %v9042_v14 }
 0x2e1   : > { %8521 = vmatpush3.bf16.msra.mxu1 %v9044_v15  ;;  %8067 = vmatprep.mubr.msk.f32.mxu1 %vm8864_vm5, %v8865_v19 }
 0x2e2   : > { %8525 = vmatprep.subr.bf16.mxu1 %v8863_v0 }
 0x3a9   : > { %v1397_v1 = vpop.f32.mrb[12].mxu0 }
 0x3aa   : > { %v8036_v2 = vpop.f32.mrb[13].mxu0 }
 0x3ab   : > { %v1325_v3 = vpop.f32.mrb[10].mxu1 }
 0x3ac   : > { %v1398_v6 = vadd.f32 %v1397_v1, %v1325_v3  ;;  %v8029_v8 = vpop.f32.mrb[11].mxu1  ;;  %v2529_v1 = vrot.slane %v2520_v57, 5 }
 0x3ad   : > { %v1577_v10 = vpop.f32.mrb[14].mxu0 }
 0x3ae   : > { %v1401_v11 = vadd.f32 %v1398_v6, %v9104_v45  ;;  %v8050_v12 = vpop.f32.mrb[15].mxu0  ;;  %v2530_v13 = vsel %vm259_vm3, %v2529_v1, %v2528_v5 }
 0x3af   : > { %v1505_v17 = vpop.f32.mrb[12].mxu1 }
 0x3b0   : > { %v1409_v21 = vrot.slane %v1401_v11, %v9107_v50  ;;  %v1578_v22 = vadd.f32 %v1577_v10, %v1505_v17  ;;  %v8043_v23 = vpop.f32.mrb[13].mxu1 }
 0x3b2   : > { %v1410_v25 = vcombine.high %v1409_v21, %v1409_v21  ;;  %v1417_v26 = vrot.slane %v1409_v21, %v9107_v50  ;;  %v1581_v27 = vadd.f32 %v1578_v22, %v9104_v45 }
 0x3b3   : > { %v8055_v29 = vpop.f32.mrb[14].mxu1 }
 0x3b4   : > { %v1424_v30 = vrot.slane %v1410_v25, %v9107_v50  ;;  %v1425_v31 = vcombine.high %v1417_v26, %v1417_v26  ;;  %1431 = vst.msk [vmem:[%s9119_s12 + $0x4] sm:$0x1] %vm528_vm7, %v1417_v26  ;;  %v1589_v32 = vrot.slane %v1581_v27, %v9107_v50  ;;  %v1697_v33 = vpop.f32.mrb[15].mxu1  ;;  %v1887_v41 = vrot.slane %v8055_v29, 4  ;;  %v2969_v25 = vld [vmem:[%s9012_s26 + $0x16] sm:$0x1] }
 0x3b5   : > { %v1707_v34 = vrot.slane %v1697_v33, 4  ;;  %8068 = vmatmul.mubr.msk.f32.vlgmr.msra.gmra.mrb[16].mxu1 %vm348_vm6, %v1697_v33  ;;  %v2968_v33 = vld [vmem:[%s9012_s26 + $0x6] sm:$0x1] }
 0x3b6   : > { %v1426_v36 = vcombine.high %v1424_v30, %v1424_v30  ;;  %1432 = vst.msk [vmem:[%s9119_s12 + $0x24] sm:$0x1] %vm528_vm7, %v1424_v30  ;;  %1433 = vst.msk [vmem:[%s9119_s12 + $0x44] sm:$0x1] %vm528_vm7, %v1425_v31  ;;  %v1590_v37 = vcombine.high %v1589_v32, %v1589_v32  ;;  %v1597_v38 = vrot.slane %v1589_v32, %v9107_v50  ;;  %8527 = vmatpush3.bf16.msra.mxu1 %v9044_v15 }
 0x3b7   : > { %8081 = vmatprep.mubr.msk.f32.mxu1 %vm8864_vm5, %v8865_v19  ;;  %8061 = vmatmul.mubr.msk.f32.vlgmr.msra.gmra.mrb[16].mxu0 %vm348_vm6, %v1707_v34  ;;  %v2976_v30 = vrot.slane %v2969_v25, 7 }
 0x3b8   : > { %8528 = vmatprep.subr.bf16.mxu1 %v8863_v0  ;;  %1434 = vst.msk [vmem:[%s9119_s12 + $0x64] sm:$0x1] %vm528_vm7, %v1426_v36  ;;  %v1604_v39 = vrot.slane %v1590_v37, %v9107_v50  ;;  %v1605_v40 = vcombine.high %v1597_v38, %v1597_v38  ;;  %1611 = vst.msk [vmem:[%s9119_s12 + $0x5] sm:$0x1] %vm528_vm7, %v1597_v38  ;;  %8524 = vmatpush3.bf16.msra.mxu0 %v9059_v18  ;;  %v2971_v37 = vld [vmem:[%s9012_s26 + $0x36] sm:$0x1] }
 0x3b9   : > { %8074 = vmatprep.mubr.msk.f32.mxu0 %vm8864_vm5, %v8865_v19  ;;  %8082 = vmatmul.mubr.msk.f32.vlgmr.msra.gmra.mrb[18].mxu1 %vm348_vm6, %v8055_v29  ;;  %v2970_v29 = vld [vmem:[%s9012_s26 + $0x26] sm:$0x1] }
 0x3ba   : > { %8084 = vmatprep.subr.msk.mxu0 %vm268_vm4, %v2079_v35  ;;  %v1606_v42 = vcombine.high %v1604_v39, %v1604_v39  ;;  %1612 = vst.msk [vmem:[%s9119_s12 + $0x25] sm:$0x1] %vm528_vm7, %v1604_v39  ;;  %1613 = vst.msk [vmem:[%s9119_s12 + $0x45] sm:$0x1] %vm528_vm7, %v1605_v40  ;;  %8530 = vmatpush3.bf16.msra.mxu1 %v9059_v18  ;;  %v2978_v38 = vrot.slane %v2970_v29, 6  ;;  %v2977_v40 = vsel %vm253_vm0, %v2976_v30, %v2968_v33 }
 0x3bb   : > { %8093 = vmatprep.mubr.msk.f32.mxu1 %vm8864_vm5, %v8865_v19  ;;  %8075 = vmatmul.mubr.msk.f32.vlgmr.msra.gmra.mrb[18].mxu0 %vm348_vm6, %v1887_v41 }
 0x3bc   : > { %8534 = vmatprep.subr.bf16.mxu1 %v8863_v0  ;;  %1614 = vst.msk [vmem:[%s9119_s12 + $0x65] sm:$0x1] %vm528_vm7, %v1606_v42  ;;  %8085 = vmatpush3.msk.msra.mxu0 %vm268_vm4, %v2079_v35  ;;  %v2979_v49 = vsel %vm256_vm2, %v2978_v38, %v2977_v40 }
 0x3bd   : > { %8086 = vmatprep.mubr.msk.f32.mxu0 %vm261_vm1, %v9026_v7  ;;  %8531 = vmatprep.subr.bf16.mxu0 %v8863_v0 }
 0x3bf   : > { %8087 = vmatmul.mubr.msk.f32.vlgmr.msra.gmra.mrb[20].mxu0 %vm261_vm1, %v9042_v14 }
 0x3c0   : > { %8533 = vmatpush3.bf16.msra.mxu0 %v9044_v15  ;;  %8100 = vmatprep.mubr.msk.f32.mxu0 %vm8864_vm5, %v8865_v19 }
 0x3c1   : > { %8537 = vmatprep.subr.bf16.mxu0 %v8863_v0 }
 0x488   : > { %v1848_v44 = vpop.f32.mrb[16].mxu1 }
 0x489   : > { %v8069_v46 = vpop.f32.mrb[17].mxu1 }
 0x48a   : > { %v1776_v47 = vpop.f32.mrb[16].mxu0 }
 0x48b   : > { %v1849_v51 = vadd.f32 %v1848_v44, %v1776_v47  ;;  %v8062_v52 = vpop.f32.mrb[17].mxu0  ;;  %v2980_v44 = vrot.slane %v2971_v37, 5 }
 0x48c   : > { %v2028_v54 = vpop.f32.mrb[18].mxu1 }
 0x48d   : > { %v1852_v55 = vadd.f32 %v1849_v51, %v9104_v45  ;;  %v8083_v56 = vpop.f32.mrb[19].mxu1  ;;  %v2981_v57 = vsel %vm259_vm3, %v2980_v44, %v2979_v49 }
 0x48e   : > { %v1956_v59 = vpop.f32.mrb[18].mxu0 }
 0x48f   : > { %v1860_v61 = vrot.slane %v1852_v55, %v9107_v50  ;;  %v2029_v62 = vadd.f32 %v2028_v54, %v1956_v59  ;;  %v8076_v63 = vpop.f32.mrb[19].mxu0 }
 0x491   : > { %v1861_v2 = vcombine.high %v1860_v61, %v1860_v61  ;;  %v1868_v3 = vrot.slane %v1860_v61, %v9107_v50  ;;  %v2032_v4 = vadd.f32 %v2029_v62, %v9104_v45 }
 0x492   : > { %v8088_v6 = vpop.f32.mrb[20].mxu0 }
 0x493   : > { %v1875_v8 = vrot.slane %v1861_v2, %v9107_v50  ;;  %v1876_v9 = vcombine.high %v1868_v3, %v1868_v3  ;;  %1882 = vst.msk [vmem:[%s9119_s12 + $0x6] sm:$0x1] %vm528_vm7, %v1868_v3  ;;  %v2040_v10 = vrot.slane %v2032_v4, %v9107_v50  ;;  %v2148_v11 = vpop.f32.mrb[21].mxu0  ;;  %v2338_v23 = vrot.slane %v8088_v6, 4  ;;  %v3420_v2 = vld [vmem:[%s9012_s26 + $0x17] sm:$0x1] }
 0x494   : > { %v2158_v12 = vrot.slane %v2148_v11, 4  ;;  %8101 = vmatmul.mubr.msk.f32.vlgmr.msra.gmra.mrb[22].mxu0 %vm348_vm6, %v2148_v11  ;;  %v3419_v11 = vld [vmem:[%s9012_s26 + $0x7] sm:$0x1] }
 0x495   : > { %v1877_v16 = vcombine.high %v1875_v8, %v1875_v8  ;;  %1883 = vst.msk [vmem:[%s9119_s12 + $0x26] sm:$0x1] %vm528_vm7, %v1875_v8  ;;  %1884 = vst.msk [vmem:[%s9119_s12 + $0x46] sm:$0x1] %vm528_vm7, %v1876_v9  ;;  %v2041_v17 = vcombine.high %v2040_v10, %v2040_v10  ;;  %v2048_v20 = vrot.slane %v2040_v10, %v9107_v50  ;;  %8539 = vmatpush3.bf16.msra.mxu0 %v9044_v15 }
 0x496   : > { %8114 = vmatprep.mubr.msk.f32.mxu0 %vm8864_vm5, %v8865_v19  ;;  %8094 = vmatmul.mubr.msk.f32.vlgmr.msra.gmra.mrb[20].mxu1 %vm348_vm6, %v2158_v12  ;;  %v3427_v8 = vrot.slane %v3420_v2, 7 }
 0x497   : > { %8540 = vmatprep.subr.bf16.mxu0 %v8863_v0  ;;  %1885 = vst.msk [vmem:[%s9119_s12 + $0x66] sm:$0x1] %vm528_vm7, %v1877_v16  ;;  %v2055_v21 = vrot.slane %v2041_v17, %v9107_v50  ;;  %v2056_v22 = vcombine.high %v2048_v20, %v2048_v20  ;;  %2062 = vst.msk [vmem:[%s9119_s12 + $0x7] sm:$0x1] %vm528_vm7, %v2048_v20  ;;  %8536 = vmatpush3.bf16.msra.mxu1 %v9059_v18  ;;  %v3422_v17 = vld [vmem:[%s9012_s26 + $0x37] sm:$0x1] }
 0x498   : > { %8107 = vmatprep.mubr.msk.f32.mxu1 %vm8864_vm5, %v8865_v19  ;;  %8115 = vmatmul.mubr.msk.f32.vlgmr.msra.gmra.mrb[24].mxu0 %vm348_vm6, %v8088_v6  ;;  %v3421_v6 = vld [vmem:[%s9012_s26 + $0x27] sm:$0x1] }
 0x499   : > { %8117 = vmatprep.subr.msk.mxu1 %vm268_vm4, %v2530_v13  ;;  %v2057_v24 = vcombine.high %v2055_v21, %v2055_v21  ;;  %2063 = vst.msk [vmem:[%s9119_s12 + $0x27] sm:$0x1] %vm528_vm7, %v2055_v21  ;;  %2064 = vst.msk [vmem:[%s9119_s12 + $0x47] sm:$0x1] %vm528_vm7, %v2056_v22  ;;  %8542 = vmatpush3.bf16.msra.mxu0 %v9059_v18  ;;  %v3429_v20 = vrot.slane %v3421_v6, 6  ;;  %v3428_v22 = vsel %vm253_vm0, %v3427_v8, %v3419_v11 }
 0x49a   : > { %8126 = vmatprep.mubr.msk.f32.mxu0 %vm8864_vm5, %v8865_v19  ;;  %8108 = vmatmul.mubr.msk.f32.vlgmr.msra.gmra.mrb[22].mxu1 %vm348_vm6, %v2338_v23 }
 0x49b   : > { %8546 = vmatprep.subr.bf16.mxu0 %v8863_v0  ;;  %2065 = vst.msk [vmem:[%s9119_s12 + $0x67] sm:$0x1] %vm528_vm7, %v2057_v24  ;;  %8118 = vmatpush3.msk.msra.mxu1 %vm268_vm4, %v2530_v13  ;;  %v3430_v30 = vsel %vm256_vm2, %v3429_v20, %v3428_v22 }
 0x49c   : > { %8119 = vmatprep.mubr.msk.f32.mxu1 %vm261_vm1, %v9026_v7  ;;  %8543 = vmatprep.subr.bf16.mxu1 %v8863_v0 }
 0x49e   : > { %8120 = vmatmul.mubr.msk.f32.vlgmr.msra.gmra.mrb[24].mxu1 %vm261_vm1, %v9042_v14 }
 0x49f   : > { %8545 = vmatpush3.bf16.msra.mxu1 %v9044_v15  ;;  %8133 = vmatprep.mubr.msk.f32.mxu1 %vm8864_vm5, %v8865_v19 }
 0x4a0   : > { %8549 = vmatprep.subr.bf16.mxu1 %v8863_v0 }
 0x567   : > { %v2299_v26 = vpop.f32.mrb[22].mxu0 }
 0x568   : > { %v8102_v27 = vpop.f32.mrb[23].mxu0 }
 0x569   : > { %v2227_v28 = vpop.f32.mrb[20].mxu1 }
 0x56a   : > { %v2300_v31 = vadd.f32 %v2299_v26, %v2227_v28  ;;  %v8095_v32 = vpop.f32.mrb[21].mxu1  ;;  %v3431_v26 = vrot.slane %v3422_v17, 5 }
 0x56b   : > { %v2479_v34 = vpop.f32.mrb[24].mxu0 }
 0x56c   : > { %v2303_v35 = vadd.f32 %v2300_v31, %v9104_v45  ;;  %v8116_v36 = vpop.f32.mrb[25].mxu0  ;;  %v3432_v37 = vsel %vm259_vm3, %v3431_v26, %v3430_v30  ;;  %v9511_v26 = vld [vmem:[%s10033_s1 + $0x8] sm:$0xff] }
 0x56d   : > { %v2407_v39 = vpop.f32.mrb[22].mxu1 }
 0x56e   : > { %v2311_v41 = vrot.slane %v2303_v35, %v9107_v50  ;;  %v2480_v42 = vadd.f32 %v2479_v34, %v2407_v39  ;;  %v8109_v43 = vpop.f32.mrb[23].mxu1 }
 0x570   : > { %v2312_v46 = vcombine.high %v2311_v41, %v2311_v41  ;;  %v2319_v47 = vrot.slane %v2311_v41, %v9107_v50  ;;  %v2483_v48 = vadd.f32 %v2480_v42, %v9104_v45 }
 0x571   : > { %v8121_v51 = vpop.f32.mrb[24].mxu1 }
 0x572   : > { %v2326_v52 = vrot.slane %v2312_v46, %v9107_v50  ;;  %v2327_v53 = vcombine.high %v2319_v47, %v2319_v47  ;;  %2333 = vst.msk [vmem:[%s9119_s12 + $0x8] sm:$0x1] %vm528_vm7, %v2319_v47  ;;  %v2491_v54 = vrot.slane %v2483_v48, %v9107_v50  ;;  %v2599_v55 = vpop.f32.mrb[25].mxu1  ;;  %v2789_v63 = vrot.slane %v8121_v51, 4  ;;  %v3871_v46 = vld [vmem:[%s9012_s26 + $0x18] sm:$0x1] }
 0x573   : > { %v2609_v56 = vrot.slane %v2599_v55, 4  ;;  %8134 = vmatmul.mubr.msk.f32.vlgmr.msra.gmra.mrb[26].mxu1 %vm348_vm6, %v2599_v55 }
 0x574   : > { %v2328_v58 = vcombine.high %v2326_v52, %v2326_v52  ;;  %2334 = vst.msk [vmem:[%s9119_s12 + $0x28] sm:$0x1] %vm528_vm7, %v2326_v52  ;;  %2335 = vst.msk [vmem:[%s9119_s12 + $0x48] sm:$0x1] %vm528_vm7, %v2327_v53  ;;  %v2492_v59 = vcombine.high %v2491_v54, %v2491_v54  ;;  %v2499_v60 = vrot.slane %v2491_v54, %v9107_v50  ;;  %8551 = vmatpush3.bf16.msra.mxu1 %v9044_v15  ;;  %v3870_v54 = vld [vmem:[%s9012_s26 + $0x8] sm:$0x1] }
 0x575   : > { %8147 = vmatprep.mubr.msk.f32.mxu1 %vm8864_vm5, %v8865_v19  ;;  %8127 = vmatmul.mubr.msk.f32.vlgmr.msra.gmra.mrb[26].mxu0 %vm348_vm6, %v2609_v56  ;;  %v3878_v52 = vrot.slane %v3871_v46, 7 }
 0x576   : > { %8552 = vmatprep.subr.bf16.mxu1 %v8863_v0  ;;  %2336 = vst.msk [vmem:[%s9119_s12 + $0x68] sm:$0x1] %vm528_vm7, %v2328_v58  ;;  %v2506_v61 = vrot.slane %v2492_v59, %v9107_v50  ;;  %v2507_v62 = vcombine.high %v2499_v60, %v2499_v60  ;;  %2513 = vst.msk [vmem:[%s9119_s12 + $0x9] sm:$0x1] %vm528_vm7, %v2499_v60  ;;  %8548 = vmatpush3.bf16.msra.mxu0 %v9059_v18 }
 0x577   : > { %8140 = vmatprep.mubr.msk.f32.mxu0 %vm8864_vm5, %v8865_v19  ;;  %8148 = vmatmul.mubr.msk.f32.vlgmr.msra.gmra.mrb[28].mxu1 %vm348_vm6, %v8121_v51  ;;  %v3872_v51 = vld [vmem:[%s9012_s26 + $0x28] sm:$0x1]  ;;  %v3879_v60 = vsel %vm253_vm0, %v3878_v52, %v3870_v54 }
 0x578   : > { %8150 = vmatprep.subr.msk.mxu0 %vm268_vm4, %v2981_v57  ;;  %v2508_v1 = vcombine.high %v2506_v61, %v2506_v61  ;;  %2514 = vst.msk [vmem:[%s9119_s12 + $0x29] sm:$0x1] %vm528_vm7, %v2506_v61  ;;  %2515 = vst.msk [vmem:[%s9119_s12 + $0x49] sm:$0x1] %vm528_vm7, %v2507_v62  ;;  %8554 = vmatpush3.bf16.msra.mxu1 %v9059_v18  ;;  %v3880_v58 = vrot.slane %v3872_v51, 6 }
 0x579   : > { %8159 = vmatprep.mubr.msk.f32.mxu1 %vm8864_vm5, %v8865_v19  ;;  %8141 = vmatmul.mubr.msk.f32.vlgmr.msra.gmra.mrb[28].mxu0 %vm348_vm6, %v2789_v63 }
 0x57a   : > { %8558 = vmatprep.subr.bf16.mxu1 %v8863_v0  ;;  %2516 = vst.msk [vmem:[%s9119_s12 + $0x69] sm:$0x1] %vm528_vm7, %v2508_v1  ;;  %8151 = vmatpush3.msk.msra.mxu0 %vm268_vm4, %v2981_v57  ;;  %v3873_v57 = vld [vmem:[%s9012_s26 + $0x38] sm:$0x1] }
 0x57b   : > { %8152 = vmatprep.mubr.msk.f32.mxu0 %vm261_vm1, %v9026_v7  ;;  %8555 = vmatprep.subr.bf16.mxu0 %v8863_v0  ;;  %v3882_v1 = vrot.slane %v3873_v57, 5 }
 0x57d   : > { %8153 = vmatmul.mubr.msk.f32.vlgmr.msra.gmra.mrb[30].mxu0 %vm261_vm1, %v9042_v14 }
 0x57e   : > { %8557 = vmatpush3.bf16.msra.mxu0 %v9044_v15  ;;  %8166 = vmatprep.mubr.msk.f32.mxu0 %vm8864_vm5, %v8865_v19 }
 0x57f   : > { %8561 = vmatprep.subr.bf16.mxu0 %v8863_v0 }
 0x646   : > { %v2750_v3 = vpop.f32.mrb[26].mxu1 }
 0x647   : > { %v8135_v4 = vpop.f32.mrb[27].mxu1 }
 0x648   : > { %v2678_v5 = vpop.f32.mrb[26].mxu0 }
 0x649   : > { %v2751_v9 = vadd.f32 %v2750_v3, %v2678_v5  ;;  %v8128_v10 = vpop.f32.mrb[27].mxu0  ;;  %v3881_v5 = vsel %vm256_vm2, %v3880_v58, %v3879_v60 }
 0x64a   : > { %v2930_v12 = vpop.f32.mrb[28].mxu1 }
 0x64b   : > { %v2754_v13 = vadd.f32 %v2751_v9, %v9104_v45  ;;  %v8149_v16 = vpop.f32.mrb[29].mxu1 }
 0x64c   : > { %v2858_v21 = vpop.f32.mrb[28].mxu0 }
 0x64d   : > { %v2762_v23 = vrot.slane %v2754_v13, %v9107_v50  ;;  %v2931_v24 = vadd.f32 %v2930_v12, %v2858_v21  ;;  %v8142_v25 = vpop.f32.mrb[29].mxu0  ;;  %v3883_v13 = vsel %vm259_vm3, %v3882_v1, %v3881_v5 }
 0x64e   : > { %v9503_v25 = vld [vmem:[%s10033_s1] sm:$0xff] }
 0x64f   : > { %v2763_v27 = vcombine.high %v2762_v23, %v2762_v23  ;;  %v2770_v28 = vrot.slane %v2762_v23, %v9107_v50  ;;  %v2934_v29 = vadd.f32 %v2931_v24, %v9104_v45 }
 0x650   : > { %v8154_v31 = vpop.f32.mrb[30].mxu0 }
 0x651   : > { %v2777_v32 = vrot.slane %v2763_v27, %v9107_v50  ;;  %v2778_v33 = vcombine.high %v2770_v28, %v2770_v28  ;;  %2784 = vst.msk [vmem:[%s9119_s12 + $0xa] sm:$0x1] %vm528_vm7, %v2770_v28  ;;  %v2942_v34 = vrot.slane %v2934_v29, %v9107_v50  ;;  %v3050_v35 = vpop.f32.mrb[31].mxu0  ;;  %v3240_v43 = vrot.slane %v8154_v31, 4  ;;  %v4322_v27 = vld [vmem:[%s9012_s26 + $0x19] sm:$0x1] }
 0x652   : > { %v3060_v36 = vrot.slane %v3050_v35, 4  ;;  %8167 = vmatmul.mubr.msk.f32.vlgmr.msra.gmra.mrb[32].mxu0 %vm348_vm6, %v3050_v35  ;;  %v4321_v35 = vld [vmem:[%s9012_s26 + $0x9] sm:$0x1] }
 0x653   : > { %v2779_v38 = vcombine.high %v2777_v32, %v2777_v32  ;;  %2785 = vst.msk [vmem:[%s9119_s12 + $0x2a] sm:$0x1] %vm528_vm7, %v2777_v32  ;;  %2786 = vst.msk [vmem:[%s9119_s12 + $0x4a] sm:$0x1] %vm528_vm7, %v2778_v33  ;;  %v2943_v39 = vcombine.high %v2942_v34, %v2942_v34  ;;  %v2950_v40 = vrot.slane %v2942_v34, %v9107_v50  ;;  %8563 = vmatpush3.bf16.msra.mxu0 %v9044_v15 }
 0x654   : > { %8180 = vmatprep.mubr.msk.f32.mxu0 %vm8864_vm5, %v8865_v19  ;;  %8160 = vmatmul.mubr.msk.f32.vlgmr.msra.gmra.mrb[30].mxu1 %vm348_vm6, %v3060_v36  ;;  %v4329_v32 = vrot.slane %v4322_v27, 7 }
 0x655   : > { %8564 = vmatprep.subr.bf16.mxu0 %v8863_v0  ;;  %2787 = vst.msk [vmem:[%s9119_s12 + $0x6a] sm:$0x1] %vm528_vm7, %v2779_v38  ;;  %v2957_v41 = vrot.slane %v2943_v39, %v9107_v50  ;;  %v2958_v42 = vcombine.high %v2950_v40, %v2950_v40  ;;  %2964 = vst.msk [vmem:[%s9119_s12 + $0xb] sm:$0x1] %vm528_vm7, %v2950_v40  ;;  %8560 = vmatpush3.bf16.msra.mxu1 %v9059_v18  ;;  %v4324_v39 = vld [vmem:[%s9012_s26 + $0x39] sm:$0x1] }
 0x656   : > { %8173 = vmatprep.mubr.msk.f32.mxu1 %vm8864_vm5, %v8865_v19  ;;  %8181 = vmatmul.mubr.msk.f32.vlgmr.msra.gmra.mrb[34].mxu0 %vm348_vm6, %v8154_v31  ;;  %v4323_v31 = vld [vmem:[%s9012_s26 + $0x29] sm:$0x1] }
 0x657   : > { %8183 = vmatprep.subr.msk.mxu1 %vm268_vm4, %v3432_v37  ;;  %v2959_v44 = vcombine.high %v2957_v41, %v2957_v41  ;;  %2965 = vst.msk [vmem:[%s9119_s12 + $0x2b] sm:$0x1] %vm528_vm7, %v2957_v41  ;;  %2966 = vst.msk [vmem:[%s9119_s12 + $0x4b] sm:$0x1] %vm528_vm7, %v2958_v42  ;;  %8566 = vmatpush3.bf16.msra.mxu0 %v9059_v18  ;;  %v4331_v40 = vrot.slane %v4323_v31, 6  ;;  %v4330_v42 = vsel %vm253_vm0, %v4329_v32, %v4321_v35 }
 0x658   : > { %8192 = vmatprep.mubr.msk.f32.mxu0 %vm8864_vm5, %v8865_v19  ;;  %8174 = vmatmul.mubr.msk.f32.vlgmr.msra.gmra.mrb[32].mxu1 %vm348_vm6, %v3240_v43 }
 0x659   : > { %8570 = vmatprep.subr.bf16.mxu0 %v8863_v0  ;;  %2967 = vst.msk [vmem:[%s9119_s12 + $0x6b] sm:$0x1] %vm528_vm7, %v2959_v44  ;;  %8184 = vmatpush3.msk.msra.mxu1 %vm268_vm4, %v3432_v37  ;;  %v4332_v52 = vsel %vm256_vm2, %v4331_v40, %v4330_v42 }
 0x65a   : > { %8185 = vmatprep.mubr.msk.f32.mxu1 %vm261_vm1, %v9026_v7  ;;  %8567 = vmatprep.subr.bf16.mxu1 %v8863_v0 }
 0x65c   : > { %8186 = vmatmul.mubr.msk.f32.vlgmr.msra.gmra.mrb[34].mxu1 %vm261_vm1, %v9042_v14 }
 0x65d   : > { %8569 = vmatpush3.bf16.msra.mxu1 %v9044_v15  ;;  %8199 = vmatprep.mubr.msk.f32.mxu1 %vm8864_vm5, %v8865_v19 }
 0x65e   : > { %8573 = vmatprep.subr.bf16.mxu1 %v8863_v0 }
 0x725   : > { %v3201_v47 = vpop.f32.mrb[32].mxu0 }
 0x726   : > { %v8168_v48 = vpop.f32.mrb[33].mxu0 }
 0x727   : > { %v3129_v49 = vpop.f32.mrb[30].mxu1 }
 0x728   : > { %v3202_v7 = vadd.f32 %v3201_v47, %v3129_v49  ;;  %v8161_v53 = vpop.f32.mrb[31].mxu1  ;;  %v4333_v47 = vrot.slane %v4324_v39, 5 }
 0x729   : > { %v3381_v55 = vpop.f32.mrb[34].mxu0 }
 0x72a   : > { %v3205_v14 = vadd.f32 %v3202_v7, %v9104_v45  ;;  %v8182_v56 = vpop.f32.mrb[35].mxu0  ;;  %v4334_v57 = vsel %vm259_vm3, %v4333_v47, %v4332_v52 }
 0x72b   : > { %v3309_v59 = vpop.f32.mrb[32].mxu1 }
 0x72c   : > { %v3213_v61 = vrot.slane %v3205_v14, %v9107_v50  ;;  %v3382_v62 = vadd.f32 %v3381_v55, %v3309_v59  ;;  %v8175_v63 = vpop.f32.mrb[33].mxu1 }
 0x72e   : > { %v3214_v2 = vcombine.high %v3213_v61, %v3213_v61  ;;  %v3221_v3 = vrot.slane %v3213_v61, %v9107_v50  ;;  %v3385_v4 = vadd.f32 %v3382_v62, %v9104_v45 }
 0x72f   : > { %v8187_v6 = vpop.f32.mrb[34].mxu1 }
 0x730   : > { %v3228_v8 = vrot.slane %v3214_v2, %v9107_v50  ;;  %v3229_v9 = vcombine.high %v3221_v3, %v3221_v3  ;;  %3235 = vst.msk [vmem:[%s9119_s12 + $0xc] sm:$0x1] %vm528_vm7, %v3221_v3  ;;  %v3393_v10 = vrot.slane %v3385_v4, %v9107_v50  ;;  %v3501_v11 = vpop.f32.mrb[35].mxu1  ;;  %v3691_v23 = vrot.slane %v8187_v6, 4  ;;  %v4773_v2 = vld [vmem:[%s9012_s26 + $0x1a] sm:$0x1] }
 0x731   : > { %v3511_v12 = vrot.slane %v3501_v11, 4  ;;  %8200 = vmatmul.mubr.msk.f32.vlgmr.msra.gmra.mrb[36].mxu1 %vm348_vm6, %v3501_v11  ;;  %v4772_v11 = vld [vmem:[%s9012_s26 + $0xa] sm:$0x1] }
 0x732   : > { %v3230_v16 = vcombine.high %v3228_v8, %v3228_v8  ;;  %3236 = vst.msk [vmem:[%s9119_s12 + $0x2c] sm:$0x1] %vm528_vm7, %v3228_v8  ;;  %3237 = vst.msk [vmem:[%s9119_s12 + $0x4c] sm:$0x1] %vm528_vm7, %v3229_v9  ;;  %v3394_v17 = vcombine.high %v3393_v10, %v3393_v10  ;;  %v3401_v20 = vrot.slane %v3393_v10, %v9107_v50  ;;  %8575 = vmatpush3.bf16.msra.mxu1 %v9044_v15 }
 0x733   : > { %8213 = vmatprep.mubr.msk.f32.mxu1 %vm8864_vm5, %v8865_v19  ;;  %8193 = vmatmul.mubr.msk.f32.vlgmr.msra.gmra.mrb[36].mxu0 %vm348_vm6, %v3511_v12  ;;  %v4780_v8 = vrot.slane %v4773_v2, 7 }
 0x734   : > { %8576 = vmatprep.subr.bf16.mxu1 %v8863_v0  ;;  %3238 = vst.msk [vmem:[%s9119_s12 + $0x6c] sm:$0x1] %vm528_vm7, %v3230_v16  ;;  %v3408_v21 = vrot.slane %v3394_v17, %v9107_v50  ;;  %v3409_v22 = vcombine.high %v3401_v20, %v3401_v20  ;;  %3415 = vst.msk [vmem:[%s9119_s12 + $0xd] sm:$0x1] %vm528_vm7, %v3401_v20  ;;  %8572 = vmatpush3.bf16.msra.mxu0 %v9059_v18  ;;  %v4775_v17 = vld [vmem:[%s9012_s26 + $0x3a] sm:$0x1] }
 0x735   : > { %8206 = vmatprep.mubr.msk.f32.mxu0 %vm8864_vm5, %v8865_v19  ;;  %8214 = vmatmul.mubr.msk.f32.vlgmr.msra.gmra.mrb[38].mxu1 %vm348_vm6, %v8187_v6  ;;  %v4774_v6 = vld [vmem:[%s9012_s26 + $0x2a] sm:$0x1] }
 0x736   : > { %8216 = vmatprep.subr.msk.mxu0 %vm268_vm4, %v3883_v13  ;;  %v3410_v24 = vcombine.high %v3408_v21, %v3408_v21  ;;  %3416 = vst.msk [vmem:[%s9119_s12 + $0x2d] sm:$0x1] %vm528_vm7, %v3408_v21  ;;  %3417 = vst.msk [vmem:[%s9119_s12 + $0x4d] sm:$0x1] %vm528_vm7, %v3409_v22  ;;  %8578 = vmatpush3.bf16.msra.mxu1 %v9059_v18  ;;  %v4782_v20 = vrot.slane %v4774_v6, 6  ;;  %v4781_v22 = vsel %vm253_vm0, %v4780_v8, %v4772_v11 }
 0x737   : > { %8225 = vmatprep.mubr.msk.f32.mxu1 %vm8864_vm5, %v8865_v19  ;;  %8207 = vmatmul.mubr.msk.f32.vlgmr.msra.gmra.mrb[38].mxu0 %vm348_vm6, %v3691_v23 }
 0x738   : > { %8582 = vmatprep.subr.bf16.mxu1 %v8863_v0  ;;  %3418 = vst.msk [vmem:[%s9119_s12 + $0x6d] sm:$0x1] %vm528_vm7, %v3410_v24  ;;  %8217 = vmatpush3.msk.msra.mxu0 %vm268_vm4, %v3883_v13  ;;  %v4783_v32 = vsel %vm256_vm2, %v4782_v20, %v4781_v22 }
 0x739   : > { %8218 = vmatprep.mubr.msk.f32.mxu0 %vm261_vm1, %v9503_v25  ;;  %8579 = vmatprep.subr.bf16.mxu0 %v8863_v0 }
 0x73b   : > { %8219 = vmatmul.mubr.msk.f32.vlgmr.msra.gmra.mrb[40].mxu0 %vm261_vm1, %v9511_v26 }
 0x73c   : > { %8581 = vmatpush3.bf16.msra.mxu0 %v9044_v15  ;;  %8232 = vmatprep.mubr.msk.f32.mxu0 %vm8864_vm5, %v8865_v19 }
 0x73d   : > { %8585 = vmatprep.subr.bf16.mxu0 %v8863_v0 }
 0x804   : > { %v3652_v28 = vpop.f32.mrb[36].mxu1 }
 0x805   : > { %v8201_v29 = vpop.f32.mrb[37].mxu1 }
 0x806   : > { %v3580_v30 = vpop.f32.mrb[36].mxu0 }
 0x807   : > { %v3653_v33 = vadd.f32 %v3652_v28, %v3580_v30  ;;  %v8194_v34 = vpop.f32.mrb[37].mxu0  ;;  %v4784_v28 = vrot.slane %v4775_v17, 5 }
 0x808   : > { %v3832_v36 = vpop.f32.mrb[38].mxu1 }
 0x809   : > { %v3656_v37 = vadd.f32 %v3653_v33, %v9104_v45  ;;  %v8215_v38 = vpop.f32.mrb[39].mxu1  ;;  %v4785_v39 = vsel %vm259_vm3, %v4784_v28, %v4783_v32 }
 0x80a   : > { %v3760_v41 = vpop.f32.mrb[38].mxu0 }
 0x80b   : > { %v3664_v43 = vrot.slane %v3656_v37, %v9107_v50  ;;  %v3833_v44 = vadd.f32 %v3832_v36, %v3760_v41  ;;  %v8208_v46 = vpop.f32.mrb[39].mxu0 }
 0x80d   : > { %v3665_v48 = vcombine.high %v3664_v43, %v3664_v43  ;;  %v3672_v49 = vrot.slane %v3664_v43, %v9107_v50  ;;  %v3836_v51 = vadd.f32 %v3833_v44, %v9104_v45 }
 0x80e   : > { %v8220_v7 = vpop.f32.mrb[40].mxu0 }
 0x80f   : > { %v3679_v53 = vrot.slane %v3665_v48, %v9107_v50  ;;  %v3680_v54 = vcombine.high %v3672_v49, %v3672_v49  ;;  %3686 = vst.msk [vmem:[%s9119_s12 + $0xe] sm:$0x1] %vm528_vm7, %v3672_v49  ;;  %v3844_v55 = vrot.slane %v3836_v51, %v9107_v50  ;;  %v3952_v14 = vpop.f32.mrb[41].mxu0  ;;  %v4142_v63 = vrot.slane %v8220_v7, 4  ;;  %v5224_v48 = vld [vmem:[%s9012_s26 + $0x1b] sm:$0x1] }
 0x810   : > { %v3962_v56 = vrot.slane %v3952_v14, 4  ;;  %8233 = vmatmul.mubr.msk.f32.vlgmr.msra.gmra.mrb[42].mxu0 %vm348_vm6, %v3952_v14  ;;  %v5223_v14 = vld [vmem:[%s9012_s26 + $0xb] sm:$0x1] }
 0x811   : > { %v3681_v58 = vcombine.high %v3679_v53, %v3679_v53  ;;  %3687 = vst.msk [vmem:[%s9119_s12 + $0x2e] sm:$0x1] %vm528_vm7, %v3679_v53  ;;  %3688 = vst.msk [vmem:[%s9119_s12 + $0x4e] sm:$0x1] %vm528_vm7, %v3680_v54  ;;  %v3845_v59 = vcombine.high %v3844_v55, %v3844_v55  ;;  %v3852_v60 = vrot.slane %v3844_v55, %v9107_v50  ;;  %8587 = vmatpush3.bf16.msra.mxu0 %v9044_v15 }
 0x812   : > { %8246 = vmatprep.mubr.msk.f32.mxu0 %vm8864_vm5, %v8865_v19  ;;  %8226 = vmatmul.mubr.msk.f32.vlgmr.msra.gmra.mrb[40].mxu1 %vm348_vm6, %v3962_v56  ;;  %v5231_v53 = vrot.slane %v5224_v48, 7 }
 0x813   : > { %8588 = vmatprep.subr.bf16.mxu0 %v8863_v0  ;;  %3689 = vst.msk [vmem:[%s9119_s12 + $0x6e] sm:$0x1] %vm528_vm7, %v3681_v58  ;;  %v3859_v61 = vrot.slane %v3845_v59, %v9107_v50  ;;  %v3860_v62 = vcombine.high %v3852_v60, %v3852_v60  ;;  %3866 = vst.msk [vmem:[%s9119_s12 + $0xf] sm:$0x1] %vm528_vm7, %v3852_v60  ;;  %8584 = vmatpush3.bf16.msra.mxu1 %v9059_v18  ;;  %v5226_v59 = vld [vmem:[%s9012_s26 + $0x3b] sm:$0x1] }
 0x814   : > { %8239 = vmatprep.mubr.msk.f32.mxu1 %vm8864_vm5, %v8865_v19  ;;  %8247 = vmatmul.mubr.msk.f32.vlgmr.msra.gmra.mrb[44].mxu0 %vm348_vm6, %v8220_v7  ;;  %v5225_v7 = vld [vmem:[%s9012_s26 + $0x2b] sm:$0x1] }
 0x815   : > { %8249 = vmatprep.subr.msk.mxu1 %vm268_vm4, %v4334_v57  ;;  %v3861_v1 = vcombine.high %v3859_v61, %v3859_v61  ;;  %3867 = vst.msk [vmem:[%s9119_s12 + $0x2f] sm:$0x1] %vm528_vm7, %v3859_v61  ;;  %3868 = vst.msk [vmem:[%s9119_s12 + $0x4f] sm:$0x1] %vm528_vm7, %v3860_v62  ;;  %8590 = vmatpush3.bf16.msra.mxu0 %v9059_v18  ;;  %v5233_v60 = vrot.slane %v5225_v7, 6  ;;  %v5232_v62 = vsel %vm253_vm0, %v5231_v53, %v5223_v14 }
 0x816   : > { %8258 = vmatprep.mubr.msk.f32.mxu0 %vm8864_vm5, %v8865_v19  ;;  %8240 = vmatmul.mubr.msk.f32.vlgmr.msra.gmra.mrb[42].mxu1 %vm348_vm6, %v4142_v63 }
 0x817   : > { %8594 = vmatprep.subr.bf16.mxu0 %v8863_v0  ;;  %3869 = vst.msk [vmem:[%s9119_s12 + $0x6f] sm:$0x1] %vm528_vm7, %v3861_v1  ;;  %8250 = vmatpush3.msk.msra.mxu1 %vm268_vm4, %v4334_v57  ;;  %v5234_v8 = vsel %vm256_vm2, %v5233_v60, %v5232_v62 }
 0x818   : > { %8251 = vmatprep.mubr.msk.f32.mxu1 %vm261_vm1, %v9503_v25  ;;  %8591 = vmatprep.subr.bf16.mxu1 %v8863_v0 }
 0x81a   : > { %8252 = vmatmul.mubr.msk.f32.vlgmr.msra.gmra.mrb[44].mxu1 %vm261_vm1, %v9511_v26 }
 0x81b   : > { %8593 = vmatpush3.bf16.msra.mxu1 %v9044_v15  ;;  %8265 = vmatprep.mubr.msk.f32.mxu1 %vm8864_vm5, %v8865_v19 }
 0x81c   : > { %8597 = vmatprep.subr.bf16.mxu1 %v8863_v0 }
 0x8e3   : > { %v4103_v3 = vpop.f32.mrb[42].mxu0 }
 0x8e4   : > { %v8234_v4 = vpop.f32.mrb[43].mxu0 }
 0x8e5   : > { %v4031_v5 = vpop.f32.mrb[40].mxu1 }
 0x8e6   : > { %v4104_v9 = vadd.f32 %v4103_v3, %v4031_v5  ;;  %v8227_v10 = vpop.f32.mrb[41].mxu1  ;;  %v5235_v3 = vrot.slane %v5226_v59, 5 }
 0x8e7   : > { %v4283_v12 = vpop.f32.mrb[44].mxu0 }
 0x8e8   : > { %v4107_v13 = vadd.f32 %v4104_v9, %v9104_v45  ;;  %v8248_v16 = vpop.f32.mrb[45].mxu0  ;;  %v5236_v17 = vsel %vm259_vm3, %v5235_v3, %v5234_v8 }
 0x8e9   : > { %v4211_v21 = vpop.f32.mrb[42].mxu1 }
 0x8ea   : > { %v4115_v23 = vrot.slane %v4107_v13, %v9107_v50  ;;  %v4284_v24 = vadd.f32 %v4283_v12, %v4211_v21  ;;  %v8241_v27 = vpop.f32.mrb[43].mxu1 }
 0x8ec   : > { %v4116_v29 = vcombine.high %v4115_v23, %v4115_v23  ;;  %v4123_v30 = vrot.slane %v4115_v23, %v9107_v50  ;;  %v4287_v31 = vadd.f32 %v4284_v24, %v9104_v45 }
 0x8ed   : > { %v8253_v33 = vpop.f32.mrb[44].mxu1 }
 0x8ee   : > { %v4130_v34 = vrot.slane %v4116_v29, %v9107_v50  ;;  %v4131_v35 = vcombine.high %v4123_v30, %v4123_v30  ;;  %4137 = vst.msk [vmem:[%s9119_s12 + $0x10] sm:$0x1] %vm528_vm7, %v4123_v30  ;;  %v4295_v36 = vrot.slane %v4287_v31, %v9107_v50  ;;  %v4403_v37 = vpop.f32.mrb[45].mxu1  ;;  %v4593_v46 = vrot.slane %v8253_v33, 4  ;;  %v5675_v29 = vld [vmem:[%s9012_s26 + $0x1c] sm:$0x1] }
 0x8ef   : > { %v4413_v38 = vrot.slane %v4403_v37, 4  ;;  %8266 = vmatmul.mubr.msk.f32.vlgmr.msra.gmra.mrb[46].mxu1 %vm348_vm6, %v4403_v37  ;;  %v5674_v37 = vld [vmem:[%s9012_s26 + $0xc] sm:$0x1] }
 0x8f0   : > { %v4132_v40 = vcombine.high %v4130_v34, %v4130_v34  ;;  %4138 = vst.msk [vmem:[%s9119_s12 + $0x30] sm:$0x1] %vm528_vm7, %v4130_v34  ;;  %4139 = vst.msk [vmem:[%s9119_s12 + $0x50] sm:$0x1] %vm528_vm7, %v4131_v35  ;;  %v4296_v41 = vcombine.high %v4295_v36, %v4295_v36  ;;  %v4303_v42 = vrot.slane %v4295_v36, %v9107_v50  ;;  %8599 = vmatpush3.bf16.msra.mxu1 %v9044_v15 }
 0x8f1   : > { %8279 = vmatprep.mubr.msk.f32.mxu1 %vm8864_vm5, %v8865_v19  ;;  %8259 = vmatmul.mubr.msk.f32.vlgmr.msra.gmra.mrb[46].mxu0 %vm348_vm6, %v4413_v38  ;;  %v5682_v34 = vrot.slane %v5675_v29, 7 }
 0x8f2   : > { %8600 = vmatprep.subr.bf16.mxu1 %v8863_v0  ;;  %4140 = vst.msk [vmem:[%s9119_s12 + $0x70] sm:$0x1] %vm528_vm7, %v4132_v40  ;;  %v4310_v43 = vrot.slane %v4296_v41, %v9107_v50  ;;  %v4311_v44 = vcombine.high %v4303_v42, %v4303_v42  ;;  %4317 = vst.msk [vmem:[%s9119_s12 + $0x11] sm:$0x1] %vm528_vm7, %v4303_v42  ;;  %8596 = vmatpush3.bf16.msra.mxu0 %v9059_v18  ;;  %v5677_v41 = vld [vmem:[%s9012_s26 + $0x3c] sm:$0x1] }
 0x8f3   : > { %8272 = vmatprep.mubr.msk.f32.mxu0 %vm8864_vm5, %v8865_v19  ;;  %8280 = vmatmul.mubr.msk.f32.vlgmr.msra.gmra.mrb[48].mxu1 %vm348_vm6, %v8253_v33  ;;  %v5676_v33 = vld [vmem:[%s9012_s26 + $0x2c] sm:$0x1] }
 0x8f4   : > { %8282 = vmatprep.subr.msk.mxu0 %vm268_vm4, %v4785_v39  ;;  %v4312_v47 = vcombine.high %v4310_v43, %v4310_v43  ;;  %4318 = vst.msk [vmem:[%s9119_s12 + $0x31] sm:$0x1] %vm528_vm7, %v4310_v43  ;;  %4319 = vst.msk [vmem:[%s9119_s12 + $0x51] sm:$0x1] %vm528_vm7, %v4311_v44  ;;  %8602 = vmatpush3.bf16.msra.mxu1 %v9059_v18  ;;  %v5684_v42 = vrot.slane %v5676_v33, 6  ;;  %v5683_v44 = vsel %vm253_vm0, %v5682_v34, %v5674_v37 }
 0x8f5   : > { %8291 = vmatprep.mubr.msk.f32.mxu1 %vm8864_vm5, %v8865_v19  ;;  %8273 = vmatmul.mubr.msk.f32.vlgmr.msra.gmra.mrb[48].mxu0 %vm348_vm6, %v4593_v46 }
 0x8f6   : > { %8606 = vmatprep.subr.bf16.mxu1 %v8863_v0  ;;  %4320 = vst.msk [vmem:[%s9119_s12 + $0x71] sm:$0x1] %vm528_vm7, %v4312_v47  ;;  %8283 = vmatpush3.msk.msra.mxu0 %vm268_vm4, %v4785_v39  ;;  %v5685_v53 = vsel %vm256_vm2, %v5684_v42, %v5683_v44 }
 0x8f7   : > { %8284 = vmatprep.mubr.msk.f32.mxu0 %vm261_vm1, %v9503_v25  ;;  %8603 = vmatprep.subr.bf16.mxu0 %v8863_v0 }
 0x8f9   : > { %8285 = vmatmul.mubr.msk.f32.vlgmr.msra.gmra.mrb[50].mxu0 %vm261_vm1, %v9511_v26 }
 0x8fa   : > { %8605 = vmatpush3.bf16.msra.mxu0 %v9044_v15  ;;  %8298 = vmatprep.mubr.msk.f32.mxu0 %vm8864_vm5, %v8865_v19 }
 0x8fb   : > { %8609 = vmatprep.subr.bf16.mxu0 %v8863_v0 }
 0x9c2   : > { %v4554_v49 = vpop.f32.mrb[46].mxu1 }
 0x9c3   : > { %v8267_v51 = vpop.f32.mrb[47].mxu1 }
 0x9c4   : > { %v4482_v52 = vpop.f32.mrb[46].mxu0 }
 0x9c5   : > { %v4555_v54 = vadd.f32 %v4554_v49, %v4482_v52  ;;  %v8260_v55 = vpop.f32.mrb[47].mxu0  ;;  %v5686_v49 = vrot.slane %v5677_v41, 5 }
 0x9c6   : > { %v4734_v56 = vpop.f32.mrb[48].mxu1 }
 0x9c7   : > { %v4558_v57 = vadd.f32 %v4555_v54, %v9104_v45  ;;  %v8281_v58 = vpop.f32.mrb[49].mxu1  ;;  %v5687_v59 = vsel %vm259_vm3, %v5686_v49, %v5685_v53 }
 0x9c8   : > { %v4662_v61 = vpop.f32.mrb[48].mxu0 }
 0x9c9   : > { %v4566_v63 = vrot.slane %v4558_v57, %v9107_v50  ;;  %v4735_v1 = vadd.f32 %v4734_v56, %v4662_v61  ;;  %v8274_v2 = vpop.f32.mrb[49].mxu0 }
 0x9cb   : > { %v4567_v4 = vcombine.high %v4566_v63, %v4566_v63  ;;  %v4574_v5 = vrot.slane %v4566_v63, %v9107_v50  ;;  %v4738_v6 = vadd.f32 %v4735_v1, %v9104_v45 }
 0x9cc   : > { %v8286_v9 = vpop.f32.mrb[50].mxu0 }
 0x9cd   : > { %v4581_v10 = vrot.slane %v4567_v4, %v9107_v50  ;;  %v4582_v11 = vcombine.high %v4574_v5, %v4574_v5  ;;  %4588 = vst.msk [vmem:[%s9119_s12 + $0x12] sm:$0x1] %vm528_vm7, %v4574_v5  ;;  %v4746_v12 = vrot.slane %v4738_v6, %v9107_v50  ;;  %v4854_v13 = vpop.f32.mrb[51].mxu0  ;;  %v5044_v27 = vrot.slane %v8286_v9, 4  ;;  %v6126_v4 = vld [vmem:[%s9012_s26 + $0x1d] sm:$0x1] }
 0x9ce   : > { %v4864_v16 = vrot.slane %v4854_v13, 4  ;;  %8299 = vmatmul.mubr.msk.f32.vlgmr.msra.gmra.mrb[52].mxu0 %vm348_vm6, %v4854_v13  ;;  %v6125_v13 = vld [vmem:[%s9012_s26 + $0xd] sm:$0x1] }
 0x9cf   : > { %v4583_v20 = vcombine.high %v4581_v10, %v4581_v10  ;;  %4589 = vst.msk [vmem:[%s9119_s12 + $0x32] sm:$0x1] %vm528_vm7, %v4581_v10  ;;  %4590 = vst.msk [vmem:[%s9119_s12 + $0x52] sm:$0x1] %vm528_vm7, %v4582_v11  ;;  %v4747_v21 = vcombine.high %v4746_v12, %v4746_v12  ;;  %v4754_v22 = vrot.slane %v4746_v12, %v9107_v50  ;;  %8611 = vmatpush3.bf16.msra.mxu0 %v9044_v15 }
 0x9d0   : > { %8312 = vmatprep.mubr.msk.f32.mxu0 %vm8864_vm5, %v8865_v19  ;;  %8292 = vmatmul.mubr.msk.f32.vlgmr.msra.gmra.mrb[50].mxu1 %vm348_vm6, %v4864_v16  ;;  %v6133_v10 = vrot.slane %v6126_v4, 7 }
 0x9d1   : > { %8612 = vmatprep.subr.bf16.mxu0 %v8863_v0  ;;  %4591 = vst.msk [vmem:[%s9119_s12 + $0x72] sm:$0x1] %vm528_vm7, %v4583_v20  ;;  %v4761_v23 = vrot.slane %v4747_v21, %v9107_v50  ;;  %v4762_v24 = vcombine.high %v4754_v22, %v4754_v22  ;;  %4768 = vst.msk [vmem:[%s9119_s12 + $0x13] sm:$0x1] %vm528_vm7, %v4754_v22  ;;  %8608 = vmatpush3.bf16.msra.mxu1 %v9059_v18  ;;  %v6128_v21 = vld [vmem:[%s9012_s26 + $0x3d] sm:$0x1] }
 0x9d2   : > { %8305 = vmatprep.mubr.msk.f32.mxu1 %vm8864_vm5, %v8865_v19  ;;  %8313 = vmatmul.mubr.msk.f32.vlgmr.msra.gmra.mrb[54].mxu0 %vm348_vm6, %v8286_v9  ;;  %v6127_v9 = vld [vmem:[%s9012_s26 + $0x2d] sm:$0x1] }
 0x9d3   : > { %8315 = vmatprep.subr.msk.mxu1 %vm268_vm4, %v5236_v17  ;;  %v4763_v28 = vcombine.high %v4761_v23, %v4761_v23  ;;  %4769 = vst.msk [vmem:[%s9119_s12 + $0x33] sm:$0x1] %vm528_vm7, %v4761_v23  ;;  %4770 = vst.msk [vmem:[%s9119_s12 + $0x53] sm:$0x1] %vm528_vm7, %v4762_v24  ;;  %8614 = vmatpush3.bf16.msra.mxu0 %v9059_v18  ;;  %v6135_v22 = vrot.slane %v6127_v9, 6  ;;  %v6134_v24 = vsel %vm253_vm0, %v6133_v10, %v6125_v13 }
 0x9d4   : > { %8324 = vmatprep.mubr.msk.f32.mxu0 %vm8864_vm5, %v8865_v19  ;;  %8306 = vmatmul.mubr.msk.f32.vlgmr.msra.gmra.mrb[52].mxu1 %vm348_vm6, %v5044_v27 }
 0x9d5   : > { %8618 = vmatprep.subr.bf16.mxu0 %v8863_v0  ;;  %4771 = vst.msk [vmem:[%s9119_s12 + $0x73] sm:$0x1] %vm528_vm7, %v4763_v28  ;;  %8316 = vmatpush3.msk.msra.mxu1 %vm268_vm4, %v5236_v17  ;;  %v6136_v34 = vsel %vm256_vm2, %v6135_v22, %v6134_v24 }
 0x9d6   : > { %8317 = vmatprep.mubr.msk.f32.mxu1 %vm261_vm1, %v9503_v25  ;;  %8615 = vmatprep.subr.bf16.mxu1 %v8863_v0 }
 0x9d8   : > { %8318 = vmatmul.mubr.msk.f32.vlgmr.msra.gmra.mrb[54].mxu1 %vm261_vm1, %v9511_v26 }
 0x9d9   : > { %8617 = vmatpush3.bf16.msra.mxu1 %v9044_v15  ;;  %8331 = vmatprep.mubr.msk.f32.mxu1 %vm8864_vm5, %v8865_v19 }
 0x9da   : > { %8621 = vmatprep.subr.bf16.mxu1 %v8863_v0 }
 0xaa1   : > { %v5005_v30 = vpop.f32.mrb[52].mxu0 }
 0xaa2   : > { %v8300_v31 = vpop.f32.mrb[53].mxu0 }
 0xaa3   : > { %v4933_v32 = vpop.f32.mrb[50].mxu1 }
 0xaa4   : > { %v5006_v35 = vadd.f32 %v5005_v30, %v4933_v32  ;;  %v8293_v36 = vpop.f32.mrb[51].mxu1  ;;  %v6137_v30 = vrot.slane %v6128_v21, 5 }
 0xaa5   : > { %v5185_v38 = vpop.f32.mrb[54].mxu0 }
 0xaa6   : > { %v5009_v39 = vadd.f32 %v5006_v35, %v9104_v45  ;;  %v8314_v40 = vpop.f32.mrb[55].mxu0  ;;  %v6138_v41 = vsel %vm259_vm3, %v6137_v30, %v6136_v34 }
 0xaa7   : > { %v5113_v43 = vpop.f32.mrb[52].mxu1 }
 0xaa8   : > { %v5017_v46 = vrot.slane %v5009_v39, %v9107_v50  ;;  %v5186_v47 = vadd.f32 %v5185_v38, %v5113_v43  ;;  %v8307_v48 = vpop.f32.mrb[53].mxu1 }
 0xaaa   : > { %v5018_v51 = vcombine.high %v5017_v46, %v5017_v46  ;;  %v5025_v52 = vrot.slane %v5017_v46, %v9107_v50  ;;  %v5189_v7 = vadd.f32 %v5186_v47, %v9104_v45 }
 0xaab   : > { %v8319_v54 = vpop.f32.mrb[54].mxu1 }
 0xaac   : > { %v5032_v55 = vrot.slane %v5018_v51, %v9107_v50  ;;  %v5033_v14 = vcombine.high %v5025_v52, %v5025_v52  ;;  %5039 = vst.msk [vmem:[%s9119_s12 + $0x14] sm:$0x1] %vm528_vm7, %v5025_v52  ;;  %v5197_v56 = vrot.slane %v5189_v7, %v9107_v50  ;;  %v5305_v57 = vpop.f32.mrb[55].mxu1  ;;  %v5495_v2 = vrot.slane %v8319_v54, 4  ;;  %v6577_v51 = vld [vmem:[%s9012_s26 + $0x1e] sm:$0x1] }
 0xaad   : > { %v5315_v58 = vrot.slane %v5305_v57, 4  ;;  %8332 = vmatmul.mubr.msk.f32.vlgmr.msra.gmra.mrb[56].mxu1 %vm348_vm6, %v5305_v57  ;;  %v6576_v57 = vld [vmem:[%s9012_s26 + $0xe] sm:$0x1] }
 0xaae   : > { %v5034_v60 = vcombine.high %v5032_v55, %v5032_v55  ;;  %5040 = vst.msk [vmem:[%s9119_s12 + $0x34] sm:$0x1] %vm528_vm7, %v5032_v55  ;;  %5041 = vst.msk [vmem:[%s9119_s12 + $0x54] sm:$0x1] %vm528_vm7, %v5033_v14  ;;  %v5198_v61 = vcombine.high %v5197_v56, %v5197_v56  ;;  %v5205_v62 = vrot.slane %v5197_v56, %v9107_v50  ;;  %8623 = vmatpush3.bf16.msra.mxu1 %v9044_v15 }
 0xaaf   : > { %8345 = vmatprep.mubr.msk.f32.mxu1 %vm8864_vm5, %v8865_v19  ;;  %8325 = vmatmul.mubr.msk.f32.vlgmr.msra.gmra.mrb[56].mxu0 %vm348_vm6, %v5315_v58  ;;  %v6584_v55 = vrot.slane %v6577_v51, 7 }
 0xab0   : > { %8624 = vmatprep.subr.bf16.mxu1 %v8863_v0  ;;  %5042 = vst.msk [vmem:[%s9119_s12 + $0x74] sm:$0x1] %vm528_vm7, %v5034_v60  ;;  %v5212_v63 = vrot.slane %v5198_v61, %v9107_v50  ;;  %v5213_v1 = vcombine.high %v5205_v62, %v5205_v62  ;;  %5219 = vst.msk [vmem:[%s9119_s12 + $0x15] sm:$0x1] %vm528_vm7, %v5205_v62  ;;  %8620 = vmatpush3.bf16.msra.mxu0 %v9059_v18  ;;  %v6579_v61 = vld [vmem:[%s9012_s26 + $0x3e] sm:$0x1] }
 0xab1   : > { %8338 = vmatprep.mubr.msk.f32.mxu0 %vm8864_vm5, %v8865_v19  ;;  %8346 = vmatmul.mubr.msk.f32.vlgmr.msra.gmra.mrb[58].mxu1 %vm348_vm6, %v8319_v54  ;;  %v6578_v54 = vld [vmem:[%s9012_s26 + $0x2e] sm:$0x1] }
 0xab2   : > { %8348 = vmatprep.subr.msk.mxu0 %vm268_vm4, %v5687_v59  ;;  %v5214_v3 = vcombine.high %v5212_v63, %v5212_v63  ;;  %5220 = vst.msk [vmem:[%s9119_s12 + $0x35] sm:$0x1] %vm528_vm7, %v5212_v63  ;;  %5221 = vst.msk [vmem:[%s9119_s12 + $0x55] sm:$0x1] %vm528_vm7, %v5213_v1  ;;  %8626 = vmatpush3.bf16.msra.mxu1 %v9059_v18  ;;  %v6586_v62 = vrot.slane %v6578_v54, 6  ;;  %v6585_v1 = vsel %vm253_vm0, %v6584_v55, %v6576_v57 }
 0xab3   : > { %8357 = vmatprep.mubr.msk.f32.mxu1 %vm8864_vm5, %v8865_v19  ;;  %8339 = vmatmul.mubr.msk.f32.vlgmr.msra.gmra.mrb[58].mxu0 %vm348_vm6, %v5495_v2 }
 0xab4   : > { %8630 = vmatprep.subr.bf16.mxu1 %v8863_v0  ;;  %5222 = vst.msk [vmem:[%s9119_s12 + $0x75] sm:$0x1] %vm528_vm7, %v5214_v3  ;;  %8349 = vmatpush3.msk.msra.mxu0 %vm268_vm4, %v5687_v59  ;;  %v6587_v10 = vsel %vm256_vm2, %v6586_v62, %v6585_v1 }
 0xab5   : > { %8350 = vmatprep.mubr.msk.f32.mxu0 %vm261_vm1, %v9503_v25  ;;  %8627 = vmatprep.subr.bf16.mxu0 %v8863_v0 }
 0xab7   : > { %8351 = vmatmul.mubr.msk.f32.vlgmr.msra.gmra.mrb[60].mxu0 %vm261_vm1, %v9511_v26 }
 0xab8   : > { %8629 = vmatpush3.bf16.msra.mxu0 %v9044_v15  ;;  %8364 = vmatprep.mubr.msk.f32.mxu0 %vm8864_vm5, %v8865_v19 }
 0xab9   : > { %8633 = vmatprep.subr.bf16.mxu0 %v8863_v0 }
 0xb80   : > { %v5456_v5 = vpop.f32.mrb[56].mxu1 }
 0xb81   : > { %v8333_v6 = vpop.f32.mrb[57].mxu1 }
 0xb82   : > { %v5384_v8 = vpop.f32.mrb[56].mxu0 }
 0xb83   : > { %v5457_v11 = vadd.f32 %v5456_v5, %v5384_v8  ;;  %v8326_v12 = vpop.f32.mrb[57].mxu0  ;;  %v6588_v5 = vrot.slane %v6579_v61, 5 }
 0xb84   : > { %v5636_v16 = vpop.f32.mrb[58].mxu1 }
 0xb85   : > { %v5460_v17 = vadd.f32 %v5457_v11, %v9104_v45  ;;  %v8347_v20 = vpop.f32.mrb[59].mxu1  ;;  %v6589_v21 = vsel %vm259_vm3, %v6588_v5, %v6587_v10 }
 0xb86   : > { %v5564_v23 = vpop.f32.mrb[58].mxu0 }
 0xb87   : > { %v5468_v27 = vrot.slane %v5460_v17, %v9107_v50  ;;  %v5637_v28 = vadd.f32 %v5636_v16, %v5564_v23  ;;  %v8340_v29 = vpop.f32.mrb[59].mxu0 }
 0xb89   : > { %v5469_v31 = vcombine.high %v5468_v27, %v5468_v27  ;;  %v5476_v32 = vrot.slane %v5468_v27, %v9107_v50  ;;  %v5640_v33 = vadd.f32 %v5637_v28, %v9104_v45 }
 0xb8a   : > { %v8352_v35 = vpop.f32.mrb[60].mxu0 }
 0xb8b   : > { %v5483_v36 = vrot.slane %v5469_v31, %v9107_v50  ;;  %v5484_v37 = vcombine.high %v5476_v32, %v5476_v32  ;;  %5490 = vst.msk [vmem:[%s9119_s12 + $0x16] sm:$0x1] %vm528_vm7, %v5476_v32  ;;  %v5648_v38 = vrot.slane %v5640_v33, %v9107_v50  ;;  %v5756_v39 = vpop.f32.mrb[61].mxu0  ;;  %v5946_v48 = vrot.slane %v8352_v35, 4  ;;  %v7028_v31 = vld [vmem:[%s9012_s26 + $0x1f] sm:$0x1] }
 0xb8c   : > { %v5766_v40 = vrot.slane %v5756_v39, 4  ;;  %8365 = vmatmul.mubr.msk.f32.vlgmr.msra.gmra.mrb[62].mxu0 %vm348_vm6, %v5756_v39  ;;  %v7027_v39 = vld [vmem:[%s9012_s26 + $0xf] sm:$0x1] }
 0xb8d   : > { %v5485_v42 = vcombine.high %v5483_v36, %v5483_v36  ;;  %5491 = vst.msk [vmem:[%s9119_s12 + $0x36] sm:$0x1] %vm528_vm7, %v5483_v36  ;;  %5492 = vst.msk [vmem:[%s9119_s12 + $0x56] sm:$0x1] %vm528_vm7, %v5484_v37  ;;  %v5649_v43 = vcombine.high %v5648_v38, %v5648_v38  ;;  %v5656_v44 = vrot.slane %v5648_v38, %v9107_v50  ;;  %8635 = vmatpush3.bf16.msra.mxu0 %v9044_v15 }
 0xb8e   : > { %8378 = vmatprep.mubr.msk.f32.mxu0 %vm8864_vm5, %v8865_v19  ;;  %8358 = vmatmul.mubr.msk.f32.vlgmr.msra.gmra.mrb[60].mxu1 %vm348_vm6, %v5766_v40  ;;  %v7035_v36 = vrot.slane %v7028_v31, 7 }
 0xb8f   : > { %8636 = vmatprep.subr.bf16.mxu0 %v8863_v0  ;;  %5493 = vst.msk [vmem:[%s9119_s12 + $0x76] sm:$0x1] %vm528_vm7, %v5485_v42  ;;  %v5663_v46 = vrot.slane %v5649_v43, %v9107_v50  ;;  %v5664_v47 = vcombine.high %v5656_v44, %v5656_v44  ;;  %5670 = vst.msk [vmem:[%s9119_s12 + $0x17] sm:$0x1] %vm528_vm7, %v5656_v44  ;;  %8632 = vmatpush3.bf16.msra.mxu1 %v9059_v18  ;;  %v7030_v43 = vld [vmem:[%s9012_s26 + $0x3f] sm:$0x1] }
 0xb90   : > { %8371 = vmatprep.mubr.msk.f32.mxu1 %vm8864_vm5, %v8865_v19  ;;  %8379 = vmatmul.mubr.msk.f32.vlgmr.msra.gmra.mrb[64].mxu0 %vm348_vm6, %v8352_v35  ;;  %v7029_v35 = vld [vmem:[%s9012_s26 + $0x2f] sm:$0x1]  ;;  %s7711_s26 = sshll.u32 %s8850_s18, 11  ;;  %s7479_s18 = scalar_lea.sflag [#allocation4], %s9008_s22 }
 0xb91   : > { %8381 = vmatprep.subr.msk.mxu1 %vm268_vm4, %v6138_v41  ;;  %v5665_v49 = vcombine.high %v5663_v46, %v5663_v46  ;;  %5671 = vst.msk [vmem:[%s9119_s12 + $0x37] sm:$0x1] %vm528_vm7, %v5663_v46  ;;  %5672 = vst.msk [vmem:[%s9119_s12 + $0x57] sm:$0x1] %vm528_vm7, %v5664_v47  ;;  %8638 = vmatpush3.bf16.msra.mxu0 %v9059_v18  ;;  %v7037_v44 = vrot.slane %v7029_v35, 6  ;;  %v7036_v47 = vsel %vm253_vm0, %v7035_v36, %v7027_v39  ;;  %s9975_s9 = scalar_lea.hbm %s10036_s4, %s7711_s26 }
 0xb92   : > { %8390 = vmatprep.mubr.msk.f32.mxu0 %vm8864_vm5, %v8865_v19  ;;  %8372 = vmatmul.mubr.msk.f32.vlgmr.msra.gmra.mrb[62].mxu1 %vm348_vm6, %v5946_v48 }
 0xb93   : > { %8642 = vmatprep.subr.bf16.mxu0 %v8863_v0  ;;  %5673 = vst.msk [vmem:[%s9119_s12 + $0x77] sm:$0x1] %vm528_vm7, %v5665_v49  ;;  %8382 = vmatpush3.msk.msra.mxu1 %vm268_vm4, %v6138_v41  ;;  %v7038_v55 = vsel %vm256_vm2, %v7037_v44, %v7036_v47 }
 0xb94   : > { %8383 = vmatprep.mubr.msk.f32.mxu1 %vm261_vm1, %v9503_v25  ;;  %8639 = vmatprep.subr.bf16.mxu1 %v8863_v0 }
 0xb96   : > { %8384 = vmatmul.mubr.msk.f32.vlgmr.msra.gmra.mrb[64].mxu1 %vm261_vm1, %v9511_v26 }
 0xb97   : > { %8641 = vmatpush3.bf16.msra.mxu1 %v9044_v15  ;;  %8397 = vmatprep.mubr.msk.f32.mxu1 %vm8864_vm5, %v8865_v19 }
 0xb98   : > { %8645 = vmatprep.subr.bf16.mxu1 %v8863_v0 }
 0xc5f   : > { %v5907_v52 = vpop.f32.mrb[62].mxu0 }
 0xc60   : > { %v8366_v7 = vpop.f32.mrb[63].mxu0 }
 0xc61   : > { %v5835_v53 = vpop.f32.mrb[60].mxu1 }
 0xc62   : > { %v5908_v14 = vadd.f32 %v5907_v52, %v5835_v53  ;;  %v8359_v56 = vpop.f32.mrb[61].mxu1  ;;  %v7039_v52 = vrot.slane %v7030_v43, 5 }
 0xc63   : > { %v6087_v58 = vpop.f32.mrb[64].mxu0 }
 0xc64   : > { %v5911_v59 = vadd.f32 %v5908_v14, %v9104_v45  ;;  %v8380_v60 = vpop.f32.mrb[65].mxu0  ;;  %v7040_v61 = vsel %vm259_vm3, %v7039_v52, %v7038_v55 }
 0xc65   : > { %v6015_v63 = vpop.f32.mrb[62].mxu1 }
 0xc66   : > { %v5919_v2 = vrot.slane %v5911_v59, %v9107_v50  ;;  %v6088_v3 = vadd.f32 %v6087_v58, %v6015_v63  ;;  %v8373_v4 = vpop.f32.mrb[63].mxu1 }
 0xc68   : > { %v5920_v6 = vcombine.high %v5919_v2, %v5919_v2  ;;  %v5927_v8 = vrot.slane %v5919_v2, %v9107_v50  ;;  %v6091_v9 = vadd.f32 %v6088_v3, %v9104_v45 }
 0xc69   : > { %v8385_v11 = vpop.f32.mrb[64].mxu1 }
 0xc6a   : > { %v5934_v12 = vrot.slane %v5920_v6, %v9107_v50  ;;  %v5935_v13 = vcombine.high %v5927_v8, %v5927_v8  ;;  %5941 = vst.msk [vmem:[%s9119_s12 + $0x18] sm:$0x1] %vm528_vm7, %v5927_v8  ;;  %v6099_v16 = vrot.slane %v6091_v9, %v9107_v50  ;;  %v6207_v17 = vpop.f32.mrb[65].mxu1  ;;  %v6397_v29 = vrot.slane %v8385_v11, 4 }
 0xc6b   : > { %v6217_v20 = vrot.slane %v6207_v17, 4  ;;  %8398 = vmatmul.mubr.msk.f32.vlgmr.msra.gmra.mrb[66].mxu1 %vm348_vm6, %v6207_v17 }
 0xc6c   : > { %v5936_v22 = vcombine.high %v5934_v12, %v5934_v12  ;;  %5942 = vst.msk [vmem:[%s9119_s12 + $0x38] sm:$0x1] %vm528_vm7, %v5934_v12  ;;  %5943 = vst.msk [vmem:[%s9119_s12 + $0x58] sm:$0x1] %vm528_vm7, %v5935_v13  ;;  %v6100_v23 = vcombine.high %v6099_v16, %v6099_v16  ;;  %v6107_v24 = vrot.slane %v6099_v16, %v9107_v50  ;;  %8647 = vmatpush3.bf16.msra.mxu1 %v9044_v15 }
 0xc6d   : > { %8411 = vmatprep.mubr.msk.f32.mxu1 %vm8864_vm5, %v8865_v19  ;;  %8391 = vmatmul.mubr.msk.f32.vlgmr.msra.gmra.mrb[66].mxu0 %vm348_vm6, %v6217_v20 }
 0xc6e   : > { %8648 = vmatprep.subr.bf16.mxu1 %v8863_v0  ;;  %5944 = vst.msk [vmem:[%s9119_s12 + $0x78] sm:$0x1] %vm528_vm7, %v5936_v22  ;;  %v6114_v27 = vrot.slane %v6100_v23, %v9107_v50  ;;  %v6115_v28 = vcombine.high %v6107_v24, %v6107_v24  ;;  %6121 = vst.msk [vmem:[%s9119_s12 + $0x19] sm:$0x1] %vm528_vm7, %v6107_v24  ;;  %8644 = vmatpush3.bf16.msra.mxu0 %v9059_v18 }
 0xc6f   : > { %8404 = vmatprep.mubr.msk.f32.mxu0 %vm8864_vm5, %v8865_v19  ;;  %8412 = vmatmul.mubr.msk.f32.vlgmr.msra.gmra.mrb[68].mxu1 %vm348_vm6, %v8385_v11 }
 0xc70   : > { %8414 = vmatprep.subr.msk.mxu0 %vm268_vm4, %v6589_v21  ;;  %v6116_v30 = vcombine.high %v6114_v27, %v6114_v27  ;;  %6122 = vst.msk [vmem:[%s9119_s12 + $0x39] sm:$0x1] %vm528_vm7, %v6114_v27  ;;  %6123 = vst.msk [vmem:[%s9119_s12 + $0x59] sm:$0x1] %vm528_vm7, %v6115_v28  ;;  %8650 = vmatpush3.bf16.msra.mxu1 %v9059_v18 }
 0xc71   : > { %8423 = vmatprep.mubr.msk.f32.mxu1 %vm8864_vm5, %v8865_v19  ;;  %8405 = vmatmul.mubr.msk.f32.vlgmr.msra.gmra.mrb[68].mxu0 %vm348_vm6, %v6397_v29 }
 0xc72   : > { %8654 = vmatprep.subr.bf16.mxu1 %v8863_v0  ;;  %6124 = vst.msk [vmem:[%s9119_s12 + $0x79] sm:$0x1] %vm528_vm7, %v6116_v30  ;;  %8415 = vmatpush3.msk.msra.mxu0 %vm268_vm4, %v6589_v21 }
 0xc73   : > { %8416 = vmatprep.mubr.msk.f32.mxu0 %vm261_vm1, %v9503_v25  ;;  %8651 = vmatprep.subr.bf16.mxu0 %v8863_v0 }
 0xc75   : > { %8417 = vmatmul.mubr.msk.f32.vlgmr.msra.gmra.mrb[70].mxu0 %vm261_vm1, %v9511_v26 }
 0xc76   : > { %8653 = vmatpush3.bf16.msra.mxu0 %v9044_v15  ;;  %8430 = vmatprep.mubr.msk.f32.mxu0 %vm8864_vm5, %v8865_v19 }
 0xc77   : > { %8657 = vmatprep.subr.bf16.mxu0 %v8863_v0 }
 0xd3e   : > { %v6358_v32 = vpop.f32.mrb[66].mxu1 }
 0xd3f   : > { %v8399_v33 = vpop.f32.mrb[67].mxu1 }
 0xd40   : > { %v6286_v34 = vpop.f32.mrb[66].mxu0 }
 0xd41   : > { %v6359_v37 = vadd.f32 %v6358_v32, %v6286_v34  ;;  %v8392_v38 = vpop.f32.mrb[67].mxu0 }
 0xd42   : > { %v6538_v40 = vpop.f32.mrb[68].mxu1 }
 0xd43   : > { %v6362_v41 = vadd.f32 %v6359_v37, %v9104_v45  ;;  %v8413_v42 = vpop.f32.mrb[69].mxu1 }
 0xd44   : > { %v6466_v46 = vpop.f32.mrb[68].mxu0 }
 0xd45   : > { %v6370_v48 = vrot.slane %v6362_v41, %v9107_v50  ;;  %v6539_v49 = vadd.f32 %v6538_v40, %v6466_v46  ;;  %v8406_v51 = vpop.f32.mrb[69].mxu0 }
 0xd47   : > { %v6371_v7 = vcombine.high %v6370_v48, %v6370_v48  ;;  %v6378_v53 = vrot.slane %v6370_v48, %v9107_v50  ;;  %v6542_v54 = vadd.f32 %v6539_v49, %v9104_v45 }
 0xd48   : > { %v8418_v14 = vpop.f32.mrb[70].mxu0 }
 0xd49   : > { %v6385_v56 = vrot.slane %v6371_v7, %v9107_v50  ;;  %v6386_v57 = vcombine.high %v6378_v53, %v6378_v53  ;;  %6392 = vst.msk [vmem:[%s9119_s12 + $0x1a] sm:$0x1] %vm528_vm7, %v6378_v53  ;;  %v6550_v58 = vrot.slane %v6542_v54, %v9107_v50  ;;  %v6658_v59 = vpop.f32.mrb[71].mxu0  ;;  %v6848_v4 = vrot.slane %v8418_v14, 4 }
 0xd4a   : > { %v6668_v60 = vrot.slane %v6658_v59, 4  ;;  %8431 = vmatmul.mubr.msk.f32.vlgmr.msra.gmra.mrb[72].mxu0 %vm348_vm6, %v6658_v59 }
 0xd4b   : > { %v6387_v62 = vcombine.high %v6385_v56, %v6385_v56  ;;  %6393 = vst.msk [vmem:[%s9119_s12 + $0x3a] sm:$0x1] %vm528_vm7, %v6385_v56  ;;  %6394 = vst.msk [vmem:[%s9119_s12 + $0x5a] sm:$0x1] %vm528_vm7, %v6386_v57  ;;  %v6551_v63 = vcombine.high %v6550_v58, %v6550_v58  ;;  %v6558_v1 = vrot.slane %v6550_v58, %v9107_v50  ;;  %8659 = vmatpush3.bf16.msra.mxu0 %v9044_v15 }
 0xd4c   : > { %8444 = vmatprep.mubr.msk.f32.mxu0 %vm8864_vm5, %v8865_v19  ;;  %8424 = vmatmul.mubr.msk.f32.vlgmr.msra.gmra.mrb[70].mxu1 %vm348_vm6, %v6668_v60 }
 0xd4d   : > { %8660 = vmatprep.subr.bf16.mxu0 %v8863_v0  ;;  %6395 = vst.msk [vmem:[%s9119_s12 + $0x7a] sm:$0x1] %vm528_vm7, %v6387_v62  ;;  %v6565_v2 = vrot.slane %v6551_v63, %v9107_v50  ;;  %v6566_v3 = vcombine.high %v6558_v1, %v6558_v1  ;;  %6572 = vst.msk [vmem:[%s9119_s12 + $0x1b] sm:$0x1] %vm528_vm7, %v6558_v1  ;;  %8656 = vmatpush3.bf16.msra.mxu1 %v9059_v18 }
 0xd4e   : > { %8437 = vmatprep.mubr.msk.f32.mxu1 %vm8864_vm5, %v8865_v19  ;;  %8445 = vmatmul.mubr.msk.f32.vlgmr.msra.gmra.mrb[74].mxu0 %vm348_vm6, %v8418_v14 }
 0xd4f   : > { %8447 = vmatprep.subr.msk.mxu1 %vm268_vm4, %v7040_v61  ;;  %v6567_v5 = vcombine.high %v6565_v2, %v6565_v2  ;;  %6573 = vst.msk [vmem:[%s9119_s12 + $0x3b] sm:$0x1] %vm528_vm7, %v6565_v2  ;;  %6574 = vst.msk [vmem:[%s9119_s12 + $0x5b] sm:$0x1] %vm528_vm7, %v6566_v3  ;;  %8662 = vmatpush3.bf16.msra.mxu0 %v9059_v18 }
 0xd50   : > { %8456 = vmatprep.mubr.msk.f32.mxu0 %vm8864_vm5, %v8865_v19  ;;  %8438 = vmatmul.mubr.msk.f32.vlgmr.msra.gmra.mrb[72].mxu1 %vm348_vm6, %v6848_v4 }
 0xd51   : > { %8666 = vmatprep.subr.bf16.mxu0 %v8863_v0  ;;  %6575 = vst.msk [vmem:[%s9119_s12 + $0x7b] sm:$0x1] %vm528_vm7, %v6567_v5  ;;  %8448 = vmatpush3.msk.msra.mxu1 %vm268_vm4, %v7040_v61 }
 0xd52   : > { %8449 = vmatprep.mubr.msk.f32.mxu1 %vm261_vm1, %v9503_v25  ;;  %8663 = vmatprep.subr.bf16.mxu1 %v8863_v0 }
 0xd54   : > { %8450 = vmatmul.mubr.msk.f32.vlgmr.msra.gmra.mrb[74].mxu1 %vm261_vm1, %v9511_v26 }
 0xd55   : > { %8665 = vmatpush3.bf16.msra.mxu1 %v9044_v15  ;;  %8463 = vmatprep.mubr.msk.f32.mxu1 %vm8864_vm5, %v8865_v19 }
 0xd56   : > { %8669 = vmatprep.subr.bf16.mxu1 %v8863_v0 }
 0xe1d   : > { %v6809_v6 = vpop.f32.mrb[72].mxu0 }
 0xe1e   : > { %v8432_v8 = vpop.f32.mrb[73].mxu0 }
 0xe1f   : > { %v6737_v9 = vpop.f32.mrb[70].mxu1 }
 0xe20   : > { %v6810_v10 = vadd.f32 %v6809_v6, %v6737_v9  ;;  %v8425_v11 = vpop.f32.mrb[71].mxu1 }
 0xe21   : > { %v6989_v12 = vpop.f32.mrb[74].mxu0 }
 0xe22   : > { %v6813_v25 = vadd.f32 %v6810_v10, %v9104_v45  ;;  %v8446_v13 = vpop.f32.mrb[75].mxu0 }
 0xe23   : > { %v6917_v16 = vpop.f32.mrb[72].mxu1 }
 0xe24   : > { %v6821_v26 = vrot.slane %v6813_v25, %v9107_v50  ;;  %v6990_v17 = vadd.f32 %v6989_v12, %v6917_v16  ;;  %v8439_v20 = vpop.f32.mrb[73].mxu1 }
 0xe26   : > { %v6822_v21 = vcombine.high %v6821_v26, %v6821_v26  ;;  %v6829_v0 = vrot.slane %v6821_v26, %v9107_v50  ;;  %v6993_v22 = vadd.f32 %v6990_v17, %v9104_v45 }
 0xe27   : > { %v8451_v23 = vpop.f32.mrb[74].mxu1 }
 0xe28   : > { %v6836_v24 = vrot.slane %v6822_v21, %v9107_v50  ;;  %v6837_v27 = vcombine.high %v6829_v0, %v6829_v0  ;;  %6843 = vst.msk [vmem:[%s9119_s12 + $0x1c] sm:$0x1] %vm528_vm7, %v6829_v0  ;;  %v7001_v28 = vrot.slane %v6993_v22, %v9107_v50  ;;  %v7109_v29 = vpop.f32.mrb[75].mxu1  ;;  %v7299_v36 = vrot.slane %v8451_v23, 4 }
 0xe29   : > { %v7119_v30 = vrot.slane %v7109_v29, 4  ;;  %8464 = vmatmul.mubr.msk.f32.vlgmr.msra.gmra.mrb[76].mxu1 %vm348_vm6, %v7109_v29 }
 0xe2a   : > { %v6838_v31 = vcombine.high %v6836_v24, %v6836_v24  ;;  %6844 = vst.msk [vmem:[%s9119_s12 + $0x3c] sm:$0x1] %vm528_vm7, %v6836_v24  ;;  %6845 = vst.msk [vmem:[%s9119_s12 + $0x5c] sm:$0x1] %vm528_vm7, %v6837_v27  ;;  %v7002_v32 = vcombine.high %v7001_v28, %v7001_v28  ;;  %v7009_v33 = vrot.slane %v7001_v28, %v9107_v50  ;;  %8671 = vmatpush3.bf16.msra.mxu1 %v9044_v15 }
 0xe2b   : > { %8477 = vmatprep.mubr.msk.f32.mxu1 %vm8864_vm5, %v8865_v19  ;;  %8457 = vmatmul.mubr.msk.f32.vlgmr.msra.gmra.mrb[76].mxu0 %vm348_vm6, %v7119_v30 }
 0xe2c   : > { %6846 = vst.msk [vmem:[%s9119_s12 + $0x7c] sm:$0x1] %vm528_vm7, %v6838_v31  ;;  %v7016_v34 = vrot.slane %v7002_v32, %v9107_v50  ;;  %v7017_v35 = vcombine.high %v7009_v33, %v7009_v33  ;;  %7023 = vst.msk [vmem:[%s9119_s12 + $0x1d] sm:$0x1] %vm528_vm7, %v7009_v33  ;;  %8668 = vmatpush3.bf16.msra.mxu0 %v9059_v18  ;;  %8470 = vmatprep.mubr.msk.f32.mxu0 %vm8864_vm5, %v8865_v19 }
 0xe2d   : > { %8478 = vmatmul.mubr.msk.f32.vlgmr.msra.gmra.mrb[78].mxu1 %vm348_vm6, %v8451_v23 }
 0xe2e   : > { %v7018_v15 = vcombine.high %v7016_v34, %v7016_v34  ;;  %7024 = vst.msk [vmem:[%s9119_s12 + $0x3d] sm:$0x1] %vm528_vm7, %v7016_v34  ;;  %7025 = vst.msk [vmem:[%s9119_s12 + $0x5d] sm:$0x1] %vm528_vm7, %v7017_v35 }
 0xe2f   : > { %8471 = vmatmul.mubr.msk.f32.vlgmr.msra.gmra.mrb[78].mxu0 %vm348_vm6, %v7299_v36 }
 0xe30   : > { %7026 = vst.msk [vmem:[%s9119_s12 + $0x7d] sm:$0x1] %vm528_vm7, %v7018_v15 }
 0xefc   : > { %v7260_v37 = vpop.f32.mrb[76].mxu1 }
 0xefd   : > { %v8465_v38 = vpop.f32.mrb[77].mxu1 }
 0xefe   : > { %v7188_v39 = vpop.f32.mrb[76].mxu0 }
 0xeff   : > { %v7261_v18 = vadd.f32 %v7260_v37, %v7188_v39  ;;  %v8458_v40 = vpop.f32.mrb[77].mxu0 }
 0xf00   : > { %v7440_v19 = vpop.f32.mrb[78].mxu1 }
 0xf01   : > { %v7264_v41 = vadd.f32 %v7261_v18, %v9104_v45  ;;  %v8479_v42 = vpop.f32.mrb[79].mxu1 }
 0xf02   : > { %v7368_v43 = vpop.f32.mrb[78].mxu0 }
 0xf03   : > { %v7272_v44 = vrot.slane %v7264_v41, %v9107_v50  ;;  %v7441_v46 = vadd.f32 %v7440_v19, %v7368_v43  ;;  %v8472_v47 = vpop.f32.mrb[79].mxu0 }
 0xf05   : > { %v7273_v48 = vcombine.high %v7272_v44, %v7272_v44  ;;  %v7280_v49 = vrot.slane %v7272_v44, %v9107_v50  ;;  %v7444_v51 = vadd.f32 %v7441_v46, %v9104_v45 }
 0xf07   : > { %v7287_v52 = vrot.slane %v7273_v48, %v9107_v50  ;;  %v7288_v7 = vcombine.high %v7280_v49, %v7280_v49  ;;  %7294 = vst.msk [vmem:[%s9119_s12 + $0x1e] sm:$0x1] %vm528_vm7, %v7280_v49  ;;  %v7452_v53 = vrot.slane %v7444_v51, %v9107_v50 }
 0xf09   : > { %v7289_v54 = vcombine.high %v7287_v52, %v7287_v52  ;;  %7295 = vst.msk [vmem:[%s9119_s12 + $0x3e] sm:$0x1] %vm528_vm7, %v7287_v52  ;;  %7296 = vst.msk [vmem:[%s9119_s12 + $0x5e] sm:$0x1] %vm528_vm7, %v7288_v7  ;;  %v7453_v55 = vcombine.high %v7452_v53, %v7452_v53  ;;  %v7460_v14 = vrot.slane %v7452_v53, %v9107_v50 }
 0xf0b   : > { %7297 = vst.msk [vmem:[%s9119_s12 + $0x7e] sm:$0x1] %vm528_vm7, %v7289_v54  ;;  %v7467_v45 = vrot.slane %v7453_v55, %v9107_v50  ;;  %v7468_v56 = vcombine.high %v7460_v14, %v7460_v14  ;;  %7474 = vst.msk [vmem:[%s9119_s12 + $0x1f] sm:$0x1] %vm528_vm7, %v7460_v14 }
 0xf0d   : > { %v7469_v57 = vcombine.high %v7467_v45, %v7467_v45  ;;  %7475 = vst.msk [vmem:[%s9119_s12 + $0x3f] sm:$0x1] %vm528_vm7, %v7467_v45  ;;  %7476 = vst.msk [vmem:[%s9119_s12 + $0x5f] sm:$0x1] %vm528_vm7, %v7468_v56 }
 0xf0f   : > { %7477 = vst.msk [vmem:[%s9119_s12 + $0x7f] sm:$0x1] %vm528_vm7, %v7469_v57 }
 0xf10   : > { %8789 = shalt.err (!%p8786_p5)
}
 0xf11   : > { %s8790_s10 = scalar_lea.hbm %s9975_s9, 2048  ;;  %s8794_s13 = scalar_lea.hbm %s10036_s4, 4096 }
 0xf12   : > { %p8791_p4 = scmp.ne.s32.totalorder %s9975_s9, %s8790_s10  ;;  %p8795_p12 = scmp.lt.u32.totalorder %s9975_s9, %s10036_s4 }
 0xf13   : > { %p8796_p1 = scmp.lt.u32.totalorder %s8794_s13, %s8790_s10  ;;  %p8798_p8 = scmp.lt.u32.totalorder %s8790_s10, %s9975_s9 }
 0xf14   : > { %p8792_p7 = pnand %p8791_p4, %p10044_p9 }
 0xf15   : > { %p8797_p3 = por %p8796_p1, %p8795_p12 }
 0xf16   : > { %p8793_p10 = pneg %p8792_p7 }
 0xf17   : > { %p8799_p11 = por %p8798_p8, %p8797_p3 }
 0xf19   : > { %p8800_p0 = pnand %p8799_p11, %p8793_p10 }
 0xf1b   : > { %8803 = shalt.err (!%p8800_p0)
}
 0xf1c   : > { %s8869_s26 = smov 128   ;;  %s8870_s7 = smov 8  }
 0xf1d   : > { %8674 = dma.vmem_to_hbm [thread:$0]  (%p10044_p9), %s9977_s5, 2048, %s9975_s9, %s7479_s18, %s8869_s26, %s8869_s26, %s8870_s7  }
 0xf1e PF: > { %s7509_s8 = sand.u32 1, %s8838_s15   ;;  %p10045_p6 = scmp.ne.s32.totalorder %s10041_s30, 0 }
 0xf1f   : > { %p10046_p13 = scmp.ge.s32.totalorder %s8858_s20, 2  ;;  %s7510_s11 = scalar_lea.sflag [#allocation4], %s7509_s8 }
 0xf21   : > { %p8681_p2 = pnand %p10046_p13, %p10045_p6 }
 0xf23   : > { %8833 = dma.done.wait (!%p8681_p2), %s7510_s11, 2048  }
 0xf24   : > { %8835 = vsyncadd (!%p8681_p2), %s7510_s11, 4294965248  ;;  %s20_s20 = sadd.s32 1, %s8858_s20   ;;  %s10047_s15 = smov %s8842_s16 }
 0xf25   : > { %p17_p5 = scmp.ge.s32.totalorder %s20_s20, 4   ;;  %s10048_s16 = smov %s8846_s17 }
 0xf26   : > { %s10049_s17 = smov %s8952_s29  ;;  %s10050_s18 = smov %s8854_s19 }
 0xf27   : > { %s10051_s19 = smov %s10053_s23  ;;  %19 = sbr.rel (!%p17_p5) target bundleno = 6 (0x6), region = 82 }
 0xf2e   :  { %7515 = vsyncpa [#allocation3], 1 }
 0xf2f   :  { %7517 = vsyncpa [#allocation3 + $0x1], 1 }
 0xf30   :  { %7518 = vsyncpa [#allocation4], 1 }
 0xf31   :  { %7520 = vsyncpa [#allocation4 + $0x1], 1 }

</bundles_post_ra>
